<compile_context>
chip_gen: v7x
topology: tpu7x:2x2x1
jax: 0.10.0
libtpu: 0.0.40
codegen_flags: <defaults>
</compile_context>

<pallas_src>
import functools

import jax
import jax.numpy as jnp
from jax import lax
from jax.experimental import pallas as pl
from jax.experimental.pallas import tpu as pltpu


def _round_up(x, m):
    return (x + m - 1) // m * m


_VMEM_CEILING_CACHE = None


def _vmem_ceiling():
    """VMEM budget ceiling with headroom (v7x: ~48 MiB, v5e/v6e: ~96 MiB)."""
    global _VMEM_CEILING_CACHE
    if _VMEM_CEILING_CACHE is None:
        ceiling = 48 * 1024 * 1024  # safe on every generation, incl. v7x (64 MiB phys)
        try:
            cap = getattr(pltpu.get_tpu_info(), "vmem_capacity_bytes", None)
            if cap:
                ceiling = int(cap) * 3 // 4  # leave 25% for internal scratch
        except Exception:
            pass
        _VMEM_CEILING_CACHE = ceiling
    return _VMEM_CEILING_CACHE


# ----------------------------------------------------------------------------
# Two-phase path, phase 1: per-class statistics -> ratio-scaled std table.
# ----------------------------------------------------------------------------
def _stats_kernel(feat_ref, lab_ref, ratio_ref, std_ref, sums_ref, sumsq_ref, cnt_ref):
    i = pl.program_id(0)

    @pl.when(i == 0)
    def _init():
        sums_ref[...] = jnp.zeros_like(sums_ref)
        sumsq_ref[...] = jnp.zeros_like(sumsq_ref)
        cnt_ref[...] = jnp.zeros_like(cnt_ref)

    f = feat_ref[...].astype(jnp.float32)                       # (tile_n, D)
    labels = lab_ref[...]                                       # (1, tile_n) lane-dense
    c_pad = sums_ref.shape[0]
    tn = f.shape[0]

    # one_hot built directly in MXU-natural (C_pad, tile_n) orientation: standard
    # last-of-LHS x first-of-RHS contraction, no XLU transposes.
    class_ids = lax.broadcasted_iota(jnp.int32, (c_pad, tn), 0)
    one_hot_t = (labels == class_ids).astype(jnp.float32)       # (C_pad, tile_n)

    hi = jax.lax.Precision.HIGHEST
    sums_ref[...] += jnp.dot(one_hot_t, f, precision=hi,
                             preferred_element_type=jnp.float32)
    sumsq_ref[...] += jnp.dot(one_hot_t, f * f, precision=hi,
                              preferred_element_type=jnp.float32)
    cnt_ref[...] += jnp.sum(one_hot_t, axis=1, keepdims=True)   # (C_pad, 1) lane reduce

    @pl.when(i == pl.num_programs(0) - 1)
    def _finalize():
        cnt = cnt_ref[...]                                      # (C_pad, 1)
        mean = sums_ref[...] / jnp.maximum(cnt, 1.0)
        # TODO(synk): E[x^2]-E[x]^2 can cancel when |mean| >> std even at HIGHEST
        # precision; switch to a Welford/Chan combine if that regime matters.
        var = (sumsq_ref[...] - cnt * mean * mean) / jnp.maximum(cnt - 1.0, 1.0)
        # TODO(synk): torch .std(0) yields NaN for singleton classes; std = 0 here.
        # ratio folded into the table so the hot apply pass does one fewer mul.
        std_ref[...] = ratio_ref[0] * jnp.sqrt(jnp.maximum(var, 0.0))


# ----------------------------------------------------------------------------
# Two-phase path, phase 2: augment + fused row L2-normalization.
# ----------------------------------------------------------------------------
def _apply_kernel(feat_ref, lab_ref, noise_ref, std_ref, out_ref):
    f = feat_ref[...].astype(jnp.float32)                       # (tile_n, D)
    labels = lab_ref[...]                                       # (tile_n, 1)
    c_pad = std_ref.shape[0]
    tn = f.shape[0]

    class_ids = lax.broadcasted_iota(jnp.int32, (tn, c_pad), 1)
    one_hot = (labels == class_ids).astype(jnp.float32)         # (tile_n, C_pad)
    covar = jnp.dot(one_hot, std_ref[...], preferred_element_type=jnp.float32)

    out = f + covar * noise_ref[...].astype(jnp.float32)        # ratio already in std
    sq = jnp.sum(out * out, axis=1, keepdims=True)
    # clamp_min(||out||, 1e-12) == sqrt(max(sq, 1e-24)); fused rsqrt + multiply.
    inv = lax.rsqrt(jnp.maximum(sq, 1e-24))
    out_ref[...] = (out * inv).astype(out_ref.dtype)


# ----------------------------------------------------------------------------
# Fused path: stats + apply in a single pallas_call (whole slab resident in VMEM).
# ----------------------------------------------------------------------------
def _fused_kernel(feat_ref, lab_lane_ref, lab_row_ref, noise_ref, ratio_ref, out_ref,
                  *, c_pad):
    f = feat_ref[...].astype(jnp.float32)                       # (N, D)
    n = f.shape[0]
    hi = jax.lax.Precision.HIGHEST

    # ---- per-class std (ratio folded in) ----
    lab_lane = lab_lane_ref[...]                                # (1, N)
    cls_t = lax.broadcasted_iota(jnp.int32, (c_pad, n), 0)
    one_hot_t = (lab_lane == cls_t).astype(jnp.float32)         # (C_pad, N)
    sums = jnp.dot(one_hot_t, f, precision=hi, preferred_element_type=jnp.float32)
    sumsq = jnp.dot(one_hot_t, f * f, precision=hi, preferred_element_type=jnp.float32)
    cnt = jnp.sum(one_hot_t, axis=1, keepdims=True)             # (C_pad, 1)
    mean = sums / jnp.maximum(cnt, 1.0)
    var = (sumsq - cnt * mean * mean) / jnp.maximum(cnt - 1.0, 1.0)
    std = ratio_ref[0] * jnp.sqrt(jnp.maximum(var, 0.0))        # (C_pad, D)

    # ---- augment + row L2-normalize ----
    lab_row = lab_row_ref[...]                                  # (N, 1)
    cls = lax.broadcasted_iota(jnp.int32, (n, c_pad), 1)
    one_hot = (lab_row == cls).astype(jnp.float32)              # (N, C_pad)
    covar = jnp.dot(one_hot, std, preferred_element_type=jnp.float32)
    out = f + covar * noise_ref[...].astype(jnp.float32)
    sq = jnp.sum(out * out, axis=1, keepdims=True)
    out_ref[...] = (out * lax.rsqrt(jnp.maximum(sq, 1e-24))).astype(out_ref.dtype)


# ----------------------------------------------------------------------------
# Jitted implementation (static config: c_pad, tile_n, n_pad, fuse).
# ----------------------------------------------------------------------------
@functools.partial(jax.jit, static_argnames=("c_pad", "tile_n", "n_pad", "fuse"))
def _isea_impl(features, labels, noise, ratio, *, c_pad, tile_n, n_pad, fuse):
    n, d = features.shape
    out_dtype = features.dtype
    itemsize = jnp.dtype(out_dtype).itemsize
    ceiling = _vmem_ceiling()
    labels = labels.astype(jnp.int32)
    ratio = jnp.asarray(ratio, jnp.float32).reshape(1)

    def limit(nbytes):
        return int(min(max(2 * nbytes, 32 * 1024 * 1024), ceiling))

    if fuse:
        # Single pass over HBM per array; full-array blocks, so no padding at all.
        lab_lane = labels.reshape(1, n)
        lab_row = labels.reshape(n, 1)
        fused_bytes = (3 * n * d * itemsize + 6 * n * d * 4
                       + 2 * n * c_pad * 4 + 3 * c_pad * d * 4)
        return pl.pallas_call(
            functools.partial(_fused_kernel, c_pad=c_pad),
            out_shape=jax.ShapeDtypeStruct((n, d), out_dtype),
            grid=(1,),
            in_specs=[
                pl.BlockSpec((n, d), lambda i: (0, 0)),         # features
                pl.BlockSpec((1, n), lambda i: (0, 0)),         # labels (lane-dense)
                pl.BlockSpec((n, 1), lambda i: (0, 0)),         # labels (sublane)
                pl.BlockSpec((n, d), lambda i: (0, 0)),         # noise
                pl.BlockSpec(memory_space=pltpu.MemorySpace.SMEM),  # ratio
            ],
            out_specs=pl.BlockSpec((n, d), lambda i: (0, 0)),
            compiler_params=pltpu.CompilerParams(
                dimension_semantics=("arbitrary",),
                vmem_limit_bytes=limit(fused_bytes)),
            cost_estimate=pl.CostEstimate(
                flops=int(6 * n * c_pad * d + 8 * n * d),
                transcendentals=int(c_pad * d + n),
                bytes_accessed=int(3 * n * d * itemsize + 2 * n * 4)),
        )(features, lab_lane, lab_row, noise, ratio)

    # ---------------- two-phase row-tiled path ----------------
    if n_pad != n:
        features = jnp.pad(features, ((0, n_pad - n), (0, 0)))
        noise = jnp.pad(noise, ((0, n_pad - n), (0, 0)))
        labels = jnp.pad(labels, (0, n_pad - n), constant_values=-1)
    lab_lane = labels.reshape(1, n_pad)
    lab_row = labels.reshape(n_pad, 1)
    num_tiles = n_pad // tile_n

    # Phase 1: ratio-scaled per-class std table.
    stats_bytes = (2 * tile_n * d * itemsize + 2 * tile_n * 4
                   + 5 * c_pad * d * 4 + 3 * tile_n * d * 4 + c_pad * tile_n * 4)
    std = pl.pallas_call(
        _stats_kernel,
        out_shape=jax.ShapeDtypeStruct((c_pad, d), jnp.float32),
        grid=(num_tiles,),
        in_specs=[
            pl.BlockSpec((tile_n, d), lambda i: (i, 0)),        # features tile
            pl.BlockSpec((1, tile_n), lambda i: (0, i)),        # labels (lane-dense)
            pl.BlockSpec(memory_space=pltpu.MemorySpace.SMEM),  # ratio
        ],
        out_specs=pl.BlockSpec((c_pad, d), lambda i: (0, 0)),
        scratch_shapes=[
            pltpu.VMEM((c_pad, d), jnp.float32),                # per-class sums
            pltpu.VMEM((c_pad, d), jnp.float32),                # per-class sum of squares
            pltpu.VMEM((c_pad, 1), jnp.float32),                # per-class counts
        ],
        compiler_params=pltpu.CompilerParams(
            dimension_semantics=("arbitrary",),
            vmem_limit_bytes=limit(stats_bytes)),
        cost_estimate=pl.CostEstimate(
            flops=int(4 * n_pad * c_pad * d),
            transcendentals=int(c_pad * d),
            bytes_accessed=int(n_pad * d * itemsize + n_pad * 4 + c_pad * d * 4)),
    )(features, lab_lane, ratio)

    # Phase 2: augment + row L2-normalize (std table resident; ratio already folded).
    # TODO(synk): mark the constant-index std BlockSpec single-buffered
    # (pipeline_mode=pl.Buffered(1)) to save one c_pad*d*4 VMEM buffer.
    apply_bytes = (6 * tile_n * d * itemsize + 2 * tile_n * 4
                   + 2 * c_pad * d * 4 + 4 * tile_n * d * 4 + tile_n * c_pad * 4)
    out = pl.pallas_call(
        _apply_kernel,
        out_shape=jax.ShapeDtypeStruct((n_pad, d), out_dtype),
        grid=(num_tiles,),
        in_specs=[
            pl.BlockSpec((tile_n, d), lambda i: (i, 0)),        # features
            pl.BlockSpec((tile_n, 1), lambda i: (i, 0)),        # labels (sublane)
            pl.BlockSpec((tile_n, d), lambda i: (i, 0)),        # noise
            pl.BlockSpec((c_pad, d), lambda i: (0, 0)),         # std table (resident)
        ],
        out_specs=pl.BlockSpec((tile_n, d), lambda i: (i, 0)),
        compiler_params=pltpu.CompilerParams(
            dimension_semantics=("parallel",),                  # megacore on v7x
            vmem_limit_bytes=limit(apply_bytes)),
        cost_estimate=pl.CostEstimate(
            flops=int(2 * n_pad * c_pad * d + 8 * n_pad * d),
            transcendentals=int(n_pad),
            bytes_accessed=int(3 * n_pad * d * itemsize + n_pad * 4 + c_pad * d * 4)),
    )(features, lab_row, noise, std)

    return out if n_pad == n else out[:n]


# ----------------------------------------------------------------------------
# Host-side wrapper: static config (tile size, fuse decision) then jitted impl.
# ----------------------------------------------------------------------------
def isea_forward(features, labels, ratio, num_classes, *, noise=None, key=None,
                 tile_n=None, fuse=None):
    """features: (N, D); labels: (N,) int; ratio: float; noise: optional (N, D)."""
    n, d = features.shape
    if noise is None:
        # torch.randn_like equivalent, generated by XLA and streamed into the kernel.
        if key is None:
            key = jax.random.PRNGKey(0)
        noise = jax.random.normal(key, features.shape, dtype=features.dtype)

    itemsize = jnp.dtype(features.dtype).itemsize
    c_pad = _round_up(max(int(num_classes), 1), 128)
    ceiling = _vmem_ceiling()

    # Fuse when the whole slab plus f32 temps comfortably fits in VMEM.
    fused_bytes = (3 * n * d * itemsize + 6 * n * d * 4
                   + 2 * n * c_pad * 4 + 3 * c_pad * d * 4)
    if fuse is None:
        fuse = fused_bytes <= int(0.45 * ceiling)

    if fuse:
        tile_sel, n_pad = n, n                                   # unused in fused path
    else:
        if tile_n is None:
            # Largest 128-multiple row tile whose apply-pass footprint fits ~60% of
            # the ceiling (bigger on v5e/v6e, smaller on v7x), capped at 2048.
            budget = int(0.6 * ceiling)
            fixed = 2 * c_pad * d * 4
            per_row = 6 * d * itemsize + 4 * d * 4 + c_pad * 4 + 8
            tile_sel = max(128, min(2048, ((budget - fixed) // per_row) // 128 * 128))
        else:
            tile_sel = max(128, _round_up(int(tile_n), 128))
        tile_sel = min(tile_sel, _round_up(n, 128))
        n_pad = _round_up(n, tile_sel)

    return _isea_impl(features, labels, noise, jnp.float32(ratio),
                      c_pad=c_pad, tile_n=int(tile_sel), n_pad=int(n_pad),
                      fuse=bool(fuse))


class ISEALayer:
    """Host-side wrapper holding the iteration counter (like the nn.Module)."""

    def __init__(self, iter=1000, alpha=1.0, num_classes=4):
        self.iter = iter
        self.alpha = alpha
        self.count = 1
        self.num_classes = num_classes

    def __call__(self, features, labels, noise=None, key=None, tile_n=None, fuse=None):
        ratio = min(self.count / self.iter, self.alpha)
        if noise is None and key is None:
            key = jax.random.PRNGKey(self.count)
        self.count += 1
        return isea_forward(features, labels, ratio, self.num_classes,
                            noise=noise, key=key, tile_n=tile_n, fuse=fuse)


# ----------------------------------------------------------------------------
# Pure-JAX reference (mirrors the torch module with explicit noise).
# ----------------------------------------------------------------------------
def _reference(features, labels, noise, ratio, num_classes):
    f = features.astype(jnp.float32)
    covar = jnp.zeros_like(f)
    for lbl in range(num_classes):
        idx = labels == lbl
        cnt = jnp.sum(idx)
        sel = jnp.where(idx[:, None], f, 0.0)
        mean = jnp.sum(sel, axis=0) / jnp.maximum(cnt, 1)
        var = jnp.sum(jnp.where(idx[:, None], (f - mean) ** 2, 0.0), axis=0) / jnp.maximum(cnt - 1, 1)
        std = jnp.sqrt(jnp.maximum(var, 0.0))
        covar = jnp.where(idx[:, None], std[None, :], covar)
    out = f + ratio * covar * noise.astype(jnp.float32)
    denom = jnp.maximum(jnp.linalg.norm(out, axis=1, keepdims=True), 1e-12)
    return out / denom


if __name__ == "__main__":
    key = jax.random.PRNGKey(0)
    k1, k2, k3, k4 = jax.random.split(key, 4)

    # ---- Test 1: aligned shapes, forced two-phase multi-tile path (no padding) ----
    N, D, C = 256, 256, 4
    feats = jax.random.normal(k1, (N, D), dtype=jnp.float32)
    labels = (jnp.arange(N, dtype=jnp.int32) % C).astype(jnp.int32)
    noise = jax.random.normal(k2, (N, D), dtype=jnp.float32)
    out1 = isea_forward(feats, labels, 1.0 / 1000.0, C, noise=noise,
                        fuse=False, tile_n=128)
    out1 = jax.block_until_ready(out1)
    ref1 = _reference(feats, labels, noise, 1.0 / 1000.0, C)
    assert out1.shape == (N, D)
    assert jnp.allclose(out1, ref1, atol=1e-4, rtol=1e-4), "mismatch (two-phase, aligned)"

    # ---- Test 2: ragged shapes via the fused path (no padding materialized) ----
    N2, D2, C2 = 10, 72, 4
    feats2 = jax.random.normal(k3, (N2, D2), dtype=jnp.float32)
    labels2 = jnp.array([0, 1, 2, 3, 0, 1, 2, 3, 0, 1], dtype=jnp.int32)
    noise2 = jax.random.normal(k4, (N2, D2), dtype=jnp.float32)
    ref2 = _reference(feats2, labels2, noise2, 2.0 / 1000.0, C2)
    out2 = isea_forward(feats2, labels2, 2.0 / 1000.0, C2, noise=noise2)   # auto-fuse
    out2 = jax.block_until_ready(out2)
    assert out2.shape == (N2, D2)
    assert jnp.allclose(out2, ref2, atol=1e-4, rtol=1e-4), "mismatch (fused, ragged)"

    # ---- Test 2b: same ragged shapes but forced two-phase (row padding path) ----
    out2b = isea_forward(feats2, labels2, 2.0 / 1000.0, C2, noise=noise2, fuse=False)
    out2b = jax.block_until_ready(out2b)
    assert out2b.shape == (N2, D2)
    assert jnp.allclose(out2b, ref2, atol=1e-4, rtol=1e-4), "mismatch (two-phase, padded)"

    # ---- Test 3: layer API with internally generated noise ----
    layer = ISEALayer(iter=1000, alpha=1.0, num_classes=C)
    out3 = layer(feats, labels)                                           # ratio = 1/1000
    out3 = jax.block_until_ready(out3)
    norms3 = jnp.linalg.norm(out3, axis=1)
    assert jnp.allclose(norms3, 1.0, atol=1e-4), "rows not L2-normalized (layer path)"
    base = feats / jnp.maximum(jnp.linalg.norm(feats, axis=1, keepdims=True), 1e-12)
    assert float(jnp.max(jnp.abs(out3 - base))) < 0.05, "perturbation out of range"

    # ---- Test 4: bf16 in -> bf16 out smoke test (in-kernel dtype casts) ----
    out4 = isea_forward(feats.astype(jnp.bfloat16), labels, 1.0 / 1000.0, C,
                        noise=noise.astype(jnp.bfloat16))
    out4 = jax.block_until_ready(out4)
    assert out4.dtype == jnp.bfloat16
    norms4 = jnp.linalg.norm(out4.astype(jnp.float32), axis=1)
    assert jnp.allclose(norms4, 1.0, atol=3e-2), "rows not L2-normalized (bf16 path)"

    print("KERNEL_OK")
</pallas_src>

<mosaic_0001>
module attributes {stable_mosaic.version = 11 : i64} {
  func.func @_apply_kernel(%arg0: i32, %arg1: memref<128x256xf32, #tpu.memory_space<vmem>>, %arg2: memref<128x1xi32, #tpu.memory_space<vmem>>, %arg3: memref<128x256xf32, #tpu.memory_space<vmem>>, %arg4: memref<128x256xf32, #tpu.memory_space<vmem>>, %arg5: memref<128x256xf32, #tpu.memory_space<vmem>>) attributes {dimension_semantics = [#tpu.dimension_semantics<parallel>], iteration_bounds = array<i64: 2>, scalar_prefetch = 0 : i64, scratch_operands = 0 : i64, tpu.core_type = #tpu.core_type<tc>, window_params = [{transform_indices = @transform_0, window_bounds = array<i64: 128, 256>}, {transform_indices = @transform_1, window_bounds = array<i64: 128, 1>}, {transform_indices = @transform_2, window_bounds = array<i64: 128, 256>}, {pipeline_mode = #tpu.pipeline_mode<synchronous>, transform_indices = @transform_3, window_bounds = array<i64: 128, 256>}, {transform_indices = @transform_4, window_bounds = array<i64: 128, 256>}]} {
    %c0 = arith.constant 0 : index
    %c0_0 = arith.constant 0 : index
    %0 = vector.load %arg1[%c0, %c0_0] : memref<128x256xf32, #tpu.memory_space<vmem>>, vector<128x256xf32>
    %c0_1 = arith.constant 0 : index
    %c0_2 = arith.constant 0 : index
    %1 = vector.load %arg2[%c0_1, %c0_2] : memref<128x1xi32, #tpu.memory_space<vmem>>, vector<128x1xi32>
    %2 = tpu.iota {dimensions = array<i32: 1>} : vector<128x128xi32>
    %3 = vector.broadcast %1 : vector<128x1xi32> to vector<128x128xi32>
    %4 = arith.cmpi eq, %3, %2 : vector<128x128xi32>
    %5 = arith.extui %4 : vector<128x128xi1> to vector<128x128xi32>
    %6 = arith.sitofp %5 : vector<128x128xi32> to vector<128x128xf32>
    %c0_3 = arith.constant 0 : index
    %c0_4 = arith.constant 0 : index
    %7 = vector.load %arg4[%c0_3, %c0_4] : memref<128x256xf32, #tpu.memory_space<vmem>>, vector<128x256xf32>
    %cst = arith.constant dense<0.000000e+00> : vector<128x256xf32>
    %8 = tpu.matmul %6, %7, %cst {dimension_numbers = #tpu.dot_dimension_numbers<[1], [0], [0], [1], [0, 0, 1, 1], [], []>} : vector<128x128xf32>, vector<128x256xf32>, vector<128x256xf32> -> vector<128x256xf32>
    %c0_5 = arith.constant 0 : index
    %c0_6 = arith.constant 0 : index
    %9 = vector.load %arg3[%c0_5, %c0_6] : memref<128x256xf32, #tpu.memory_space<vmem>>, vector<128x256xf32>
    %10 = arith.mulf %8, %9 : vector<128x256xf32>
    %11 = arith.addf %0, %10 : vector<128x256xf32>
    %12 = arith.mulf %11, %11 : vector<128x256xf32>
    %cst_7 = arith.constant dense<0.000000e+00> : vector<128xf32>
    %13 = vector.multi_reduction <add>, %12, %cst_7 [1] : vector<128x256xf32> to vector<128xf32>
    %14 = vector.shape_cast %13 : vector<128xf32> to vector<128x1xf32>
    %cst_8 = arith.constant 1.000000e-24 : f32
    %15 = vector.broadcast %cst_8 : f32 to vector<128x1xf32>
    %16 = arith.maximumf %14, %15 : vector<128x1xf32>
    %17 = math.rsqrt %16 : vector<128x1xf32>
    %18 = vector.broadcast %17 : vector<128x1xf32> to vector<128x256xf32>
    %19 = arith.mulf %11, %18 : vector<128x256xf32>
    %c0_9 = arith.constant 0 : index
    %c0_10 = arith.constant 0 : index
    %20 = vector.load %arg5[%c0_9, %c0_10] : memref<128x256xf32, #tpu.memory_space<vmem>>, vector<128x256xf32>
    tpu.vector_store %arg5[%c0_9, %c0_10], %19 {strides = array<i32>} : memref<128x256xf32, #tpu.memory_space<vmem>>, vector<128x256xf32>,
    return
  }
  func.func @transform_0(%arg0: i32) -> (i32, i32) {
    %c0_i32 = arith.constant 0 : i32
    %c0_i32_0 = arith.constant 0 : i32
    return %arg0, %c0_i32 : i32, i32
  }
  func.func @transform_1(%arg0: i32) -> (i32, i32) {
    %c0_i32 = arith.constant 0 : i32
    %c0_i32_0 = arith.constant 0 : i32
    return %arg0, %c0_i32 : i32, i32
  }
  func.func @transform_2(%arg0: i32) -> (i32, i32) {
    %c0_i32 = arith.constant 0 : i32
    %c0_i32_0 = arith.constant 0 : i32
    return %arg0, %c0_i32 : i32, i32
  }
  func.func @transform_3(%arg0: i32) -> (i32, i32) {
    %c0_i32 = arith.constant 0 : i32
    %c0_i32_0 = arith.constant 0 : i32
    %c0_i32_1 = arith.constant 0 : i32
    return %c0_i32, %c0_i32_0 : i32, i32
  }
  func.func @transform_4(%arg0: i32) -> (i32, i32) {
    %c0_i32 = arith.constant 0 : i32
    %c0_i32_0 = arith.constant 0 : i32
    return %arg0, %c0_i32 : i32, i32
  }
}

module attributes {stable_mosaic.version = 11 : i64} {
  func.func @_stats_kernel(%arg0: i32, %arg1: memref<128x256xf32, #tpu.memory_space<vmem>>, %arg2: memref<1x128xi32, #tpu.memory_space<vmem>>, %arg3: memref<1xf32, #tpu.memory_space<smem>>, %arg4: memref<128x256xf32, #tpu.memory_space<vmem>>, %arg5: memref<128x256xf32, #tpu.memory_space<vmem>>, %arg6: memref<128x256xf32, #tpu.memory_space<vmem>>, %arg7: memref<128x1xf32, #tpu.memory_space<vmem>>) attributes {dimension_semantics = [#tpu.dimension_semantics<arbitrary>], iteration_bounds = array<i64: 2>, scalar_prefetch = 0 : i64, scratch_operands = 3 : i64, tpu.core_type = #tpu.core_type<tc>, window_params = [{transform_indices = @transform_0, window_bounds = array<i64: 128, 256>}, {transform_indices = @transform_1, window_bounds = array<i64: 1, 128>}, {transform_indices = @transform_2, window_bounds = array<i64: 1>}, {pipeline_mode = #tpu.pipeline_mode<synchronous>, transform_indices = @transform_3, window_bounds = array<i64: 128, 256>}]} {
    %c0_i32 = arith.constant 0 : i32
    %0 = arith.cmpi eq, %arg0, %c0_i32 : i32
    %1 = arith.extui %0 : i1 to i32
    %c0_i32_0 = arith.constant 0 : i32
    %2 = arith.cmpi ne, %1, %c0_i32_0 : i32
    scf.if %2 {
      %cst_19 = arith.constant 0.000000e+00 : f32
      %27 = vector.broadcast %cst_19 : f32 to vector<128x256xf32>
      %c0_20 = arith.constant 0 : index
      %c0_21 = arith.constant 0 : index
      %28 = vector.load %arg5[%c0_20, %c0_21] : memref<128x256xf32, #tpu.memory_space<vmem>>, vector<128x256xf32>
      tpu.vector_store %arg5[%c0_20, %c0_21], %27 {strides = array<i32>} : memref<128x256xf32, #tpu.memory_space<vmem>>, vector<128x256xf32>,
      %cst_22 = arith.constant 0.000000e+00 : f32
      %29 = vector.broadcast %cst_22 : f32 to vector<128x256xf32>
      %c0_23 = arith.constant 0 : index
      %c0_24 = arith.constant 0 : index
      %30 = vector.load %arg6[%c0_23, %c0_24] : memref<128x256xf32, #tpu.memory_space<vmem>>, vector<128x256xf32>
      tpu.vector_store %arg6[%c0_23, %c0_24], %29 {strides = array<i32>} : memref<128x256xf32, #tpu.memory_space<vmem>>, vector<128x256xf32>,
      %cst_25 = arith.constant 0.000000e+00 : f32
      %31 = vector.broadcast %cst_25 : f32 to vector<128x1xf32>
      %c0_26 = arith.constant 0 : index
      %c0_27 = arith.constant 0 : index
      %32 = vector.load %arg7[%c0_26, %c0_27] : memref<128x1xf32, #tpu.memory_space<vmem>>, vector<128x1xf32>
      tpu.vector_store %arg7[%c0_26, %c0_27], %31 {strides = array<i32>} : memref<128x1xf32, #tpu.memory_space<vmem>>, vector<128x1xf32>,
    } else {
    }
    %c0 = arith.constant 0 : index
    %c0_1 = arith.constant 0 : index
    %3 = vector.load %arg1[%c0, %c0_1] : memref<128x256xf32, #tpu.memory_space<vmem>>, vector<128x256xf32>
    %c0_2 = arith.constant 0 : index
    %c0_3 = arith.constant 0 : index
    %4 = vector.load %arg2[%c0_2, %c0_3] : memref<1x128xi32, #tpu.memory_space<vmem>>, vector<1x128xi32>
    %5 = tpu.iota {dimensions = array<i32: 0>} : vector<128x128xi32>
    %6 = vector.broadcast %4 : vector<1x128xi32> to vector<128x128xi32>
    %7 = arith.cmpi eq, %6, %5 : vector<128x128xi32>
    %8 = arith.extui %7 : vector<128x128xi1> to vector<128x128xi32>
    %9 = arith.sitofp %8 : vector<128x128xi32> to vector<128x128xf32>
    %c0_4 = arith.constant 0 : index
    %c0_5 = arith.constant 0 : index
    %10 = vector.load %arg5[%c0_4, %c0_5] : memref<128x256xf32, #tpu.memory_space<vmem>>, vector<128x256xf32>
    %cst = arith.constant dense<0.000000e+00> : vector<128x256xf32>
    %11 = tpu.matmul %9, %3, %cst {dimension_numbers = #tpu.dot_dimension_numbers<[1], [0], [0], [1], [0, 0, 1, 1], [], []>, precision = #tpu.contract_precision<fp32>} : vector<128x128xf32>, vector<128x256xf32>, vector<128x256xf32> -> vector<128x256xf32>
    %12 = arith.addf %10, %11 : vector<128x256xf32>
    %c0_6 = arith.constant 0 : index
    %c0_7 = arith.constant 0 : index
    %13 = vector.load %arg5[%c0_6, %c0_7] : memref<128x256xf32, #tpu.memory_space<vmem>>, vector<128x256xf32>
    tpu.vector_store %arg5[%c0_6, %c0_7], %12 {strides = array<i32>} : memref<128x256xf32, #tpu.memory_space<vmem>>, vector<128x256xf32>,
    %c0_8 = arith.constant 0 : index
    %c0_9 = arith.constant 0 : index
    %14 = vector.load %arg6[%c0_8, %c0_9] : memref<128x256xf32, #tpu.memory_space<vmem>>, vector<128x256xf32>
    %15 = arith.mulf %3, %3 : vector<128x256xf32>
    %cst_10 = arith.constant dense<0.000000e+00> : vector<128x256xf32>
    %16 = tpu.matmul %9, %15, %cst_10 {dimension_numbers = #tpu.dot_dimension_numbers<[1], [0], [0], [1], [0, 0, 1, 1], [], []>, precision = #tpu.contract_precision<fp32>} : vector<128x128xf32>, vector<128x256xf32>, vector<128x256xf32> -> vector<128x256xf32>
    %17 = arith.addf %14, %16 : vector<128x256xf32>
    %c0_11 = arith.constant 0 : index
    %c0_12 = arith.constant 0 : index
    %18 = vector.load %arg6[%c0_11, %c0_12] : memref<128x256xf32, #tpu.memory_space<vmem>>, vector<128x256xf32>
    tpu.vector_store %arg6[%c0_11, %c0_12], %17 {strides = array<i32>} : memref<128x256xf32, #tpu.memory_space<vmem>>, vector<128x256xf32>,
    %c0_13 = arith.constant 0 : index
    %c0_14 = arith.constant 0 : index
    %19 = vector.load %arg7[%c0_13, %c0_14] : memref<128x1xf32, #tpu.memory_space<vmem>>, vector<128x1xf32>
    %cst_15 = arith.constant dense<0.000000e+00> : vector<128xf32>
    %20 = vector.multi_reduction <add>, %9, %cst_15 [1] : vector<128x128xf32> to vector<128xf32>
    %21 = vector.shape_cast %20 : vector<128xf32> to vector<128x1xf32>
    %22 = arith.addf %19, %21 : vector<128x1xf32>
    %c0_16 = arith.constant 0 : index
    %c0_17 = arith.constant 0 : index
    %23 = vector.load %arg7[%c0_16, %c0_17] : memref<128x1xf32, #tpu.memory_space<vmem>>, vector<128x1xf32>
    tpu.vector_store %arg7[%c0_16, %c0_17], %22 {strides = array<i32>} : memref<128x1xf32, #tpu.memory_space<vmem>>, vector<128x1xf32>,
    %c1_i32 = arith.constant 1 : i32
    %24 = arith.cmpi eq, %arg0, %c1_i32 : i32
    %25 = arith.extui %24 : i1 to i32
    %c0_i32_18 = arith.constant 0 : i32
    %26 = arith.cmpi ne, %25, %c0_i32_18 : i32
    scf.if %26 {
      %c0_19 = arith.constant 0 : index
      %c0_20 = arith.constant 0 : index
      %27 = vector.load %arg7[%c0_19, %c0_20] : memref<128x1xf32, #tpu.memory_space<vmem>>, vector<128x1xf32>
      %c0_21 = arith.constant 0 : index
      %c0_22 = arith.constant 0 : index
      %28 = vector.load %arg5[%c0_21, %c0_22] : memref<128x256xf32, #tpu.memory_space<vmem>>, vector<128x256xf32>
      %cst_23 = arith.constant 1.000000e+00 : f32
      %29 = vector.broadcast %cst_23 : f32 to vector<128x1xf32>
      %30 = arith.maximumf %27, %29 : vector<128x1xf32>
      %31 = vector.broadcast %30 : vector<128x1xf32> to vector<128x256xf32>
      %32 = arith.divf %28, %31 : vector<128x256xf32>
      %c0_24 = arith.constant 0 : index
      %c0_25 = arith.constant 0 : index
      %33 = vector.load %arg6[%c0_24, %c0_25] : memref<128x256xf32, #tpu.memory_space<vmem>>, vector<128x256xf32>
      %34 = vector.broadcast %27 : vector<128x1xf32> to vector<128x256xf32>
      %35 = arith.mulf %34, %32 : vector<128x256xf32>
      %36 = arith.mulf %35, %32 : vector<128x256xf32>
      %37 = arith.subf %33, %36 : vector<128x256xf32>
      %cst_26 = arith.constant 1.000000e+00 : f32
      %38 = vector.broadcast %cst_26 : f32 to vector<128x1xf32>
      %39 = arith.subf %27, %38 : vector<128x1xf32>
      %cst_27 = arith.constant 1.000000e+00 : f32
      %40 = vector.broadcast %cst_27 : f32 to vector<128x1xf32>
      %41 = arith.maximumf %39, %40 : vector<128x1xf32>
      %42 = vector.broadcast %41 : vector<128x1xf32> to vector<128x256xf32>
      %43 = arith.divf %37, %42 : vector<128x256xf32>
      %c0_28 = arith.constant 0 : index
      %44 = memref.load %arg3[%c0_28] : memref<1xf32, #tpu.memory_space<smem>>
      %cst_29 = arith.constant 0.000000e+00 : f32
      %45 = vector.broadcast %cst_29 : f32 to vector<128x256xf32>
      %46 = arith.maximumf %43, %45 : vector<128x256xf32>
      %47 = math.sqrt %46 : vector<128x256xf32>
      %48 = vector.broadcast %44 : f32 to vector<128x256xf32>
      %49 = arith.mulf %48, %47 : vector<128x256xf32>
      %c0_30 = arith.constant 0 : index
      %c0_31 = arith.constant 0 : index
      %50 = vector.load %arg4[%c0_30, %c0_31] : memref<128x256xf32, #tpu.memory_space<vmem>>, vector<128x256xf32>
      tpu.vector_store %arg4[%c0_30, %c0_31], %49 {strides = array<i32>} : memref<128x256xf32, #tpu.memory_space<vmem>>, vector<128x256xf32>,
    } else {
    }
    return
  }
  func.func @transform_0(%arg0: i32) -> (i32, i32) {
    %c0_i32 = arith.constant 0 : i32
    %c0_i32_0 = arith.constant 0 : i32
    return %arg0, %c0_i32 : i32, i32
  }
  func.func @transform_1(%arg0: i32) -> (i32, i32) {
    %c0_i32 = arith.constant 0 : i32
    %c0_i32_0 = arith.constant 0 : i32
    return %c0_i32, %arg0 : i32, i32
  }
  func.func @transform_2(%arg0: i32) -> i32 {
    %c0_i32 = arith.constant 0 : i32
    %c0_i32_0 = arith.constant 0 : i32
    return %c0_i32 : i32
  }
  func.func @transform_3(%arg0: i32) -> (i32, i32) {
    %c0_i32 = arith.constant 0 : i32
    %c0_i32_0 = arith.constant 0 : i32
    %c0_i32_1 = arith.constant 0 : i32
    return %c0_i32, %c0_i32_0 : i32, i32
  }
}

</mosaic_0001>

<bundles_post_ra>
// kernel: _isea_impl.3
= control target key start
LH: loop header
LB: loop body
LE: loop exit
PB: predicated region body
PF: predicated region fallthrough
CT: control target
= control target key end

     0   :  { %9 = vsyncpa [#allocation3], 0  ;;  %s1764_s0 = inlined_call_operand.vmem [shape: f32[256,256], index: 0, kind: input, shape index: {}]   ;;  %s1765_s1 = inlined_call_operand.vmem [shape: s32[256,1], index: 1, kind: input, shape index: {}]   ;;  %s1766_s2 = inlined_call_operand.vmem [shape: f32[256,256], index: 2, kind: input, shape index: {}]   ;;  %s1767_s3 = inlined_call_operand.vmem [shape: f32[128,256], index: 3, kind: input, shape index: {}]   ;;  %s1768_s4 = inlined_call_operand.hbm [shape: f32[256,256], index: 4, kind: output, shape index: {}]  }
   0x1   :  { %11 = vsyncpa [#allocation3 + $0x1], 0  ;;  %s1237_s15 = smov 0   ;;  %s1239_s16 = smov 0  }
   0x2   :  { %s1241_s17 = smov 0   ;;  %s1243_s18 = smov 0  }
   0x3 LB: > { %s1258_s19 = sadd.s32 4294967295, %s1204_s18   ;;  %s961_s20 = sadd.s32 4294967294, %s1204_s18   ;;  %s1204_s18 = sphi %s1243_s18, %s1774_s18   ;;  %s1200_s17 = sphi %s1241_s17, %s1773_s17   ;;  %s1196_s16 = sphi %s1239_s16, %s1772_s16   ;;  %s1192_s15 = sphi %s1237_s15, %s1771_s15  }
   0x4   : > { %s1262_s21 = sadd.s32 1, %s1204_s18   ;;  %s123_s22 = sadd.s32 1, %s1200_s17 }
   0x5   : > { %s120_s23 = ssub.s32 %s1204_s18, %s1262_s21  ;;  %p133_p0 = scmp.ne.s32.totalorder %s1200_s17, %s1196_s16 }
   0x6   : > { %p121_p1 = scmp.eq.s32.totalorder %s120_s23, 0  ;;  %p134_p2 = scmp.eq.s32.totalorder %s1258_s19, 1 }
   0x7   : > { %p139_p3 = scmp.ne.s32.totalorder %s1196_s16, %s1192_s15  ;;  %p140_p4 = scmp.eq.s32.totalorder %s961_s20, 1 }
   0x8   : > { %s1273_s24 = scalar_select %p121_p1, %s1200_s17, %s123_s22  }
   0x9   : > { %p1275_p5 = por %p134_p2, %p133_p0  ;;  %p1279_p6 = por %p140_p4, %p139_p3 }
   0xa   : > { %p964_p7 = scmp.ge.s32.totalorder %s1204_s18, 1  ;;  %p190_p8 = scmp.lt.s32.totalorder %s1204_s18, 3 }
   0xc   : > { %p191_p9 = pnand %p964_p7, %p190_p8 }
   0xd   : > { %s966_s27 = sshll.u32 (!%p191_p9), %s1258_s19, 4  ;;  %v396_v0 = vld [vmem:[%s1767_s3 + $0x8] sm:$0xff] (!%p191_p9)  ;;  %v398_v1 = vld [vmem:[%s1767_s3 + $0x18] sm:$0xff] (!%p191_p9)  ;;  %v395_v2 = vld [vmem:[%s1767_s3] sm:$0xff] (!%p191_p9)  ;;  %v1206_v3 = vmov (!%p191_p9), 0   ;;  %v1207_v30 = vmov (!%p191_p9), 0.0  }
   0xe   : > { %194 = sbr.rel (%p191_p9) target bundleno = 583 (0x247), region = 36  ;;  %1109 = vset.pattern.permute.xlu1 (!%p191_p9), %v1206_v3  ;;  %1108 = vset.pattern.permute.xlu0 (!%p191_p9), %v1206_v3  ;;  %p229_p10 = scmp.lt.s32.totalorder (!%p191_p9), %s966_s27, 31  ;;  %v1016_v4 = vpack.c.bf16 (!%p191_p9), %v398_v1, %v396_v0  ;;  %v397_v5 = vld [vmem:[%s1767_s3 + $0x10] sm:$0xff] (!%p191_p9)  ;;  %v400_v6 = vld [vmem:[%s1767_s3 + $0x28] sm:$0xff] (!%p191_p9)  ;;  %v402_v7 = vld [vmem:[%s1767_s3 + $0x38] sm:$0xff] (!%p191_p9) }
   0xf   : > { %v1018_v8 = vpack.c.bf16 (!%p191_p9), %v397_v5, %v395_v2  ;;  %v1020_v9 = vpack.c.bf16 (!%p191_p9), %v402_v7, %v400_v6  ;;  %v399_v10 = vld [vmem:[%s1767_s3 + $0x20] sm:$0xff] (!%p191_p9)  ;;  %v401_v11 = vld [vmem:[%s1767_s3 + $0x30] sm:$0xff] (!%p191_p9)  ;;  %v404_v12 = vld [vmem:[%s1767_s3 + $0x48] sm:$0xff] (!%p191_p9)  ;;  %491 = vmatprep.mubr.f32.mxu0 (!%p191_p9), %v1207_v30  ;;  %539 = vmatprep.mubr.f32.mxu1 (!%p191_p9), %v1207_v30  ;;  %v297_v2 = vlaneseq (!%p191_p9)  ;;  %v1208_v6 = vmov (!%p191_p9), 1.0   ;;  %s1015_s23 = sshll.u32 (!%p191_p9), %s1258_s19, 12  ;;  %s1209_s7 = smov (!%p191_p9), [#allocation2]  }
  0x10   : > { %1017 = vmatprep.subr.bf16.mxu0 (!%p191_p9), %v1016_v4  ;;  %1048 = vmatprep.subr.bf16.mxu1 (!%p191_p9), %v1016_v4  ;;  %v406_v13 = vld [vmem:[%s1767_s3 + $0x58] sm:$0xff] (!%p191_p9)  ;;  %v1022_v14 = vpack.c.bf16 (!%p191_p9), %v401_v11, %v399_v10  ;;  %v403_v16 = vld [vmem:[%s1767_s3 + $0x40] sm:$0xff] (!%p191_p9)  ;;  %v405_v17 = vld [vmem:[%s1767_s3 + $0x50] sm:$0xff] (!%p191_p9)  ;;  %s1713_s5 = scalar_lea.hbm (!%p191_p9), %s1768_s4, %s1015_s23 }
  0x11   : > { %1019 = vmatpush1.bf16.msra.mxu0 (!%p191_p9), %v1018_v8  ;;  %1056 = vmatpush1.bf16.msra.mxu1 (!%p191_p9), %v1018_v8  ;;  %v1024_v15 = vpack.c.bf16 (!%p191_p9), %v406_v13, %v404_v12  ;;  %v408_v18 = vld [vmem:[%s1767_s3 + $0x68] sm:$0xff] (!%p191_p9)  ;;  %v410_v21 = vld [vmem:[%s1767_s3 + $0x78] sm:$0xff] (!%p191_p9)  ;;  %v1026_v24 = vpack.c.bf16 (!%p191_p9), %v405_v17, %v403_v16  ;;  %v407_v26 = vld [vmem:[%s1767_s3 + $0x60] sm:$0xff] (!%p191_p9)  ;;  %v1408_v3 = vand.u32 (!%p191_p9), 127, %v297_v2 }
  0x12   : > { %1021 = vmatprep.subr.bf16.mxu0 (!%p191_p9), %v1020_v9  ;;  %1049 = vmatprep.subr.bf16.mxu1 (!%p191_p9), %v1020_v9  ;;  %v1028_v25 = vpack.c.bf16 (!%p191_p9), %v410_v21, %v408_v18  ;;  %v409_v27 = vld [vmem:[%s1767_s3 + $0x70] sm:$0xff] (!%p191_p9)  ;;  %v412_v28 = vld [vmem:[%s1767_s3 + $0x88] sm:$0xff] (!%p191_p9)  ;;  %v414_v29 = vld [vmem:[%s1767_s3 + $0x98] sm:$0xff] (!%p191_p9) }
  0x13   : > { %v1030_v33 = vpack.c.bf16 (!%p191_p9), %v409_v27, %v407_v26  ;;  %v1032_v34 = vpack.c.bf16 (!%p191_p9), %v414_v29, %v412_v28  ;;  %v411_v35 = vld [vmem:[%s1767_s3 + $0x80] sm:$0xff] (!%p191_p9)  ;;  %v413_v36 = vld [vmem:[%s1767_s3 + $0x90] sm:$0xff] (!%p191_p9)  ;;  %v416_v37 = vld [vmem:[%s1767_s3 + $0xa8] sm:$0xff] (!%p191_p9) }
  0x14   : > { %v418_v38 = vld [vmem:[%s1767_s3 + $0xb8] sm:$0xff] (!%p191_p9)  ;;  %v1034_v41 = vpack.c.bf16 (!%p191_p9), %v413_v36, %v411_v35  ;;  %v415_v43 = vld [vmem:[%s1767_s3 + $0xa0] sm:$0xff] (!%p191_p9)  ;;  %v417_v44 = vld [vmem:[%s1767_s3 + $0xb0] sm:$0xff] (!%p191_p9) }
  0x15   : > { %s1776_s27 = smov (!%p229_p10, %s966_s27), 31  ;;  %1023 = vmatpush1.bf16.msra.mxu0 %v1022_v14  ;;  %1057 = vmatpush1.bf16.msra.mxu1 %v1022_v14  ;;  %v1036_v42 = vpack.c.bf16 %v418_v38, %v416_v37  ;;  %v420_v45 = vld [vmem:[%s1767_s3 + $0xc8] sm:$0xff]  ;;  %v422_v46 = vld [vmem:[%s1767_s3 + $0xd8] sm:$0xff]  ;;  %v1038_v49 = vpack.c.bf16 %v417_v44, %v415_v43  ;;  %v419_v51 = vld [vmem:[%s1767_s3 + $0xc0] sm:$0xff] }
  0x16   : > { %s970_s6 = sshll.u32 %s1776_s27, 3  ;;  %1025 = vmatprep.subr.bf16.mxu0 %v1024_v15  ;;  %1050 = vmatprep.subr.bf16.mxu1 %v1024_v15  ;;  %v1040_v50 = vpack.c.bf16 %v422_v46, %v420_v45  ;;  %v421_v52 = vld [vmem:[%s1767_s3 + $0xd0] sm:$0xff]  ;;  %v424_v53 = vld [vmem:[%s1767_s3 + $0xe8] sm:$0xff]  ;;  %v426_v54 = vld [vmem:[%s1767_s3 + $0xf8] sm:$0xff] }
  0x17   : > { %s1322_s9 = scalar_lea.vmem %s1765_s1, %s970_s6  ;;  %v1042_v57 = vpack.c.bf16 %v421_v52, %v419_v51  ;;  %v1044_v58 = vpack.c.bf16 %v426_v54, %v424_v53  ;;  %v423_v59 = vld [vmem:[%s1767_s3 + $0xe0] sm:$0xff]  ;;  %v425_v60 = vld [vmem:[%s1767_s3 + $0xf0] sm:$0xff] }
  0x18   : > { %v282_v19 = vld [vmem:[%s1322_s9 + $0x8] sm:$0xff]  ;;  %v281_v20 = vld [vmem:[%s1322_s9] sm:$0xff]  ;;  %v291_v31 = vld [vmem:[%s1322_s9 + $0x50] sm:$0xff]  ;;  %v1046_v63 = vpack.c.bf16 %v425_v60, %v423_v59 }
  0x19   : > { %303 = vperm.xlu1 %1109, %v282_v19   ;;  %300 = vperm.xlu0 %1108, %v281_v20   ;;  %v290_v22 = vld [vmem:[%s1322_s9 + $0x48] sm:$0xff]  ;;  %v289_v23 = vld [vmem:[%s1322_s9 + $0x40] sm:$0xff]  ;;  %v283_v32 = vld [vmem:[%s1322_s9 + $0x10] sm:$0xff] }
  0x1a   : > { %1027 = vmatpush1.bf16.msra.mxu0 %v1026_v24  ;;  %1058 = vmatpush1.bf16.msra.mxu1 %v1026_v24  ;;  %v292_v39 = vld [vmem:[%s1322_s9 + $0x58] sm:$0xff]  ;;  %v293_v47 = vld [vmem:[%s1322_s9 + $0x60] sm:$0xff]  ;;  %v294_v55 = vld [vmem:[%s1322_s9 + $0x68] sm:$0xff] }
  0x1b   : > { %1029 = vmatprep.subr.bf16.mxu0 %v1028_v25  ;;  %1051 = vmatprep.subr.bf16.mxu1 %v1028_v25  ;;  %v284_v40 = vld [vmem:[%s1322_s9 + $0x18] sm:$0xff]  ;;  %v285_v48 = vld [vmem:[%s1322_s9 + $0x20] sm:$0xff]  ;;  %v286_v56 = vld [vmem:[%s1322_s9 + $0x28] sm:$0xff] }
  0x1c   : > { %v295_v61 = vld [vmem:[%s1322_s9 + $0x70] sm:$0xff]  ;;  %v296_v0 = vld [vmem:[%s1322_s9 + $0x78] sm:$0xff] }
  0x1d   : > { %327 = vperm.xlu1 %1109, %v290_v22   ;;  %324 = vperm.xlu0 %1108, %v289_v23   ;;  %v287_v62 = vld [vmem:[%s1322_s9 + $0x30] sm:$0xff]  ;;  %v288_v1 = vld [vmem:[%s1322_s9 + $0x38] sm:$0xff]  ;;  %s1012_s9 = sshll.u32 %s1776_s27, 4  ;;  %s225_s27 = sand.u32 1, %s1196_s16  }
  0x1e   : > { %1031 = vmatpush1.bf16.msra.mxu0 %v1030_v33  ;;  %1059 = vmatpush1.bf16.msra.mxu1 %v1030_v33  ;;  %s1444_s11 = scalar_lea.vmem %s1766_s2, %s1012_s9  ;;  %s1449_s14 = scalar_lea.vmem %s1764_s0, %s1012_s9 }
  0x1f   : > { %1033 = vmatprep.subr.bf16.mxu0 %v1032_v34  ;;  %1052 = vmatprep.subr.bf16.mxu1 %v1032_v34  ;;  %v588_v21 = vld [vmem:[%s1444_s11] sm:$0xff]  ;;  %v589_v22 = vld [vmem:[%s1444_s11 + $0x8] sm:$0xff]  ;;  %v590_v29 = vld [vmem:[%s1444_s11 + $0x10] sm:$0xff]  ;;  %s965_s20 = sshll.u32 %s225_s27, 8  ;;  %s1723_s19 = scalar_lea.sflag [#allocation3], %s225_s27 }
  0x20   : > { %v249_v23 = vld [vmem:[%s1449_s14] sm:$0xff]  ;;  %v250_v26 = vld [vmem:[%s1449_s14 + $0x8] sm:$0xff]  ;;  %v251_v35 = vld [vmem:[%s1449_s14 + $0x10] sm:$0xff]  ;;  %s1648_s22 = scalar_lea.vmem [#allocation2], %s965_s20  ;;  %s1146_s9 = sshll.u32 %s1209_s7, 4  ;;  %s1147_s9 = int_to_ptr.vmem [resolvable:$false] %s1146_s9 }
  0x21   : > { %330 = vperm.xlu1 %1109, %v291_v31   ;;  %306 = vperm.xlu0 %1108, %v283_v32   ;;  %v591_v32 = vld [vmem:[%s1444_s11 + $0x18] sm:$0xff]  ;;  %v605_v33 = vld [vmem:[%s1444_s11 + $0x88] sm:$0xff]  ;;  %v265_v37 = vld [vmem:[%s1449_s14 + $0x80] sm:$0xff]  ;;  %s875_s28 = sshll.u32 %s1648_s22, 4  ;;  %s1148_s8 = scalar_lea.vmem %s1147_s9, 8192  ;;  %s1715_s28 = int_to_ptr.vmem [resolvable:$true] %s875_s28 }
  0x22   : > { %1035 = vmatpush1.bf16.msra.mxu0 %v1034_v41  ;;  %1060 = vmatpush1.bf16.msra.mxu1 %v1034_v41  ;;  %v252_v41 = vld [vmem:[%s1449_s14 + $0x18] sm:$0xff]  ;;  %v266_v43 = vld [vmem:[%s1449_s14 + $0x88] sm:$0xff]  ;;  %v267_v59 = vld [vmem:[%s1449_s14 + $0x90] sm:$0xff]  ;;  %s1142_s6 = scalar_lea.vmem %s1715_s28, 4096  ;;  %p1149_p0 = scmp.lt.s32.totalorder %s1715_s28, %s1147_s9 }
  0x23   : > { %1037 = vmatprep.subr.bf16.mxu0 %v1036_v42  ;;  %1053 = vmatprep.subr.bf16.mxu1 %v1036_v42  ;;  %v593_v53 = vld [vmem:[%s1444_s11 + $0x28] sm:$0xff]  ;;  %v607_v54 = vld [vmem:[%s1444_s11 + $0x98] sm:$0xff]  ;;  %p1143_p11 = scmp.ne.s32.totalorder %s1715_s28, %s1142_s6  ;;  %p1150_p1 = scmp.lt.s32.totalorder %s1148_s8, %s1142_s6 }
  0x24   : > { %v268_v2 = vld [vmem:[%s1449_s14 + $0x98] sm:$0xff] }
  0x25   : > { %333 = vperm.xlu1 %1109, %v292_v39   ;;  %309 = vperm.xlu0 %1108, %v284_v40   ;;  %p1144_p12 = pnand %p1143_p11, %p1275_p5  ;;  %p1151_p2 = por %p1150_p1, %p1149_p0 }
  0x26   : > { %1039 = vmatpush1.bf16.msra.mxu0 %v1038_v49  ;;  %1061 = vmatpush1.bf16.msra.mxu1 %v1038_v49  ;;  %v606_v49 = vld [vmem:[%s1444_s11 + $0x90] sm:$0xff] }
  0x27   : > { %1041 = vmatprep.subr.bf16.mxu0 %v1040_v50  ;;  %1054 = vmatprep.subr.bf16.mxu1 %v1040_v50  ;;  %p1145_p13 = pneg %p1144_p12 }
  0x29   : > { %336 = vperm.xlu1 %1109, %v293_v47   ;;  %312 = vperm.xlu0 %1108, %v285_v48   ;;  %v592_v48 = vld [vmem:[%s1444_s11 + $0x20] sm:$0xff]  ;;  %p1152_p3 = pnand %p1151_p2, %p1145_p13 }
  0x2a   : > { %1043 = vmatpush1.bf16.msra.mxu0 %v1042_v57  ;;  %1062 = vmatpush1.bf16.msra.mxu1 %v1042_v57  ;;  %v253_v57 = vld [vmem:[%s1449_s14 + $0x20] sm:$0xff] }
  0x2b   : > { %1045 = vmatprep.subr.bf16.mxu0 %v1044_v58  ;;  %1055 = vmatprep.subr.bf16.mxu1 %v1044_v58 }
  0x2d   : > { %339 = vperm.xlu1 %1109, %v294_v55   ;;  %315 = vperm.xlu0 %1108, %v286_v56  }
  0x2e   : > { %1047 = vmatpush1.bf16.msra.mxu0 %v1046_v63  ;;  %1063 = vmatpush1.bf16.msra.mxu1 %v1046_v63 }
  0x31   : > { %342 = vperm.xlu1 %1109, %v295_v61   ;;  %318 = vperm.xlu0 %1108, %v287_v62  }
  0x35   : > { %345 = vperm.xlu1 %1109, %v296_v0   ;;  %321 = vperm.xlu0 %1108, %v288_v1   ;;  %v254_v0 = vld [vmem:[%s1449_s14 + $0x28] sm:$0xff] }
  0x98   : > { %v304_v4 = vpop.permute.xlu1 %303  ;;  %v301_v5 = vpop.permute.xlu0 %300 }
  0x99   : > { %vm347_vm0 = vcmp.eq.s32.totalorder %v301_v5, %v1408_v3  ;;  %vm348_vm1 = vcmp.eq.s32.totalorder %v304_v4, %v1408_v3 }
  0x9a   : > { %990 = vmatmul.mubr.msk.f32.vlgmr.msra.gmra.mrb[0].mxu0 %vm347_vm0, %v1208_v6 }
  0x9b   : > { %497 = vmatprep.mubr.f32.mxu0 %v1207_v30 }
  0x9c   : > { %v328_v7 = vpop.permute.xlu1 %327  ;;  %v325_v8 = vpop.permute.xlu0 %324 }
  0x9d   : > { %vm355_vm2 = vcmp.eq.s32.totalorder %v325_v8, %v1408_v3  ;;  %vm356_vm3 = vcmp.eq.s32.totalorder %v328_v7, %v1408_v3  ;;  %v594_v7 = vld [vmem:[%s1444_s11 + $0x30] sm:$0xff]  ;;  %v608_v8 = vld [vmem:[%s1444_s11 + $0xa0] sm:$0xff] }
  0x9e   : > { %991 = vmatmul.mubr.msk.f32.gmra.mrb[2].mxu0 %vm348_vm1, %v1208_v6  ;;  %998 = vmatmul.mubr.msk.f32.vlgmr.msra.gmra.mrb[0].mxu1 %vm355_vm2, %v1208_v6 }
  0x9f   : > { %503 = vmatprep.mubr.f32.mxu0 %v1207_v30  ;;  %545 = vmatprep.mubr.f32.mxu1 %v1207_v30 }
  0xa0   : > { %v331_v9 = vpop.permute.xlu1 %330  ;;  %v307_v10 = vpop.permute.xlu0 %306 }
  0xa1   : > { %vm349_vm4 = vcmp.eq.s32.totalorder %v307_v10, %v1408_v3  ;;  %vm357_vm5 = vcmp.eq.s32.totalorder %v331_v9, %v1408_v3 }
  0xa2   : > { %992 = vmatmul.mubr.msk.f32.gmra.mrb[4].mxu0 %vm349_vm4, %v1208_v6  ;;  %999 = vmatmul.mubr.msk.f32.gmra.mrb[2].mxu1 %vm356_vm3, %v1208_v6 }
  0xa3   : > { %509 = vmatprep.mubr.f32.mxu0 %v1207_v30  ;;  %551 = vmatprep.mubr.f32.mxu1 %v1207_v30 }
  0xa4   : > { %v334_v11 = vpop.permute.xlu1 %333  ;;  %v310_v12 = vpop.permute.xlu0 %309 }
  0xa5   : > { %vm350_vm6 = vcmp.eq.s32.totalorder %v310_v12, %v1408_v3  ;;  %vm358_vm7 = vcmp.eq.s32.totalorder %v334_v11, %v1408_v3  ;;  %v595_v12 = vld [vmem:[%s1444_s11 + $0x38] sm:$0xff] }
  0xa6   : > { %993 = vmatmul.mubr.msk.f32.gmra.mrb[6].mxu0 %vm350_vm6, %v1208_v6  ;;  %1000 = vmatmul.mubr.msk.f32.gmra.mrb[4].mxu1 %vm357_vm5, %v1208_v6 }
  0xa7   : > { %515 = vmatprep.mubr.f32.mxu0 %v1207_v30  ;;  %557 = vmatprep.mubr.f32.mxu1 %v1207_v30 }
  0xa8   : > { %v337_v13 = vpop.permute.xlu1 %336  ;;  %v313_v14 = vpop.permute.xlu0 %312 }
  0xa9   : > { %vm351_vm8 = vcmp.eq.s32.totalorder %v313_v14, %v1408_v3  ;;  %vm359_vm9 = vcmp.eq.s32.totalorder %v337_v13, %v1408_v3  ;;  %v609_v13 = vld [vmem:[%s1444_s11 + $0xa8] sm:$0xff] }
  0xaa   : > { %994 = vmatmul.mubr.msk.f32.gmra.mrb[8].mxu0 %vm351_vm8, %v1208_v6  ;;  %1001 = vmatmul.mubr.msk.f32.gmra.mrb[6].mxu1 %vm358_vm7, %v1208_v6 }
  0xab   : > { %521 = vmatprep.mubr.f32.mxu0 %v1207_v30  ;;  %563 = vmatprep.mubr.f32.mxu1 %v1207_v30 }
  0xac   : > { %v340_v15 = vpop.permute.xlu1 %339  ;;  %v316_v16 = vpop.permute.xlu0 %315 }
  0xad   : > { %vm352_vm10 = vcmp.eq.s32.totalorder %v316_v16, %v1408_v3  ;;  %vm360_vm11 = vcmp.eq.s32.totalorder %v340_v15, %v1408_v3 }
  0xae   : > { %995 = vmatmul.mubr.msk.f32.gmra.mrb[10].mxu0 %vm352_vm10, %v1208_v6  ;;  %1002 = vmatmul.mubr.msk.f32.gmra.mrb[8].mxu1 %vm359_vm9, %v1208_v6 }
  0xaf   : > { %527 = vmatprep.mubr.f32.mxu0 %v1207_v30  ;;  %569 = vmatprep.mubr.f32.mxu1 %v1207_v30 }
  0xb0   : > { %v343_v17 = vpop.permute.xlu1 %342  ;;  %v319_v18 = vpop.permute.xlu0 %318 }
  0xb1   : > { %vm353_vm12 = vcmp.eq.s32.totalorder %v319_v18, %v1408_v3  ;;  %vm361_vm13 = vcmp.eq.s32.totalorder %v343_v17, %v1408_v3  ;;  %v255_v17 = vld [vmem:[%s1449_s14 + $0x30] sm:$0xff] }
  0xb2   : > { %996 = vmatmul.mubr.msk.f32.gmra.mrb[12].mxu0 %vm353_vm12, %v1208_v6  ;;  %1003 = vmatmul.mubr.msk.f32.gmra.mrb[10].mxu1 %vm360_vm11, %v1208_v6 }
  0xb3   : > { %533 = vmatprep.mubr.f32.mxu0 %v1207_v30  ;;  %575 = vmatprep.mubr.f32.mxu1 %v1207_v30 }
  0xb4   : > { %v322_v19 = vpop.permute.xlu0 %321  ;;  %v346_v20 = vpop.permute.xlu1 %345 }
  0xb5   : > { %vm354_vm14 = vcmp.eq.s32.totalorder %v322_v19, %v1408_v3  ;;  %vm362_vm15 = vcmp.eq.s32.totalorder %v346_v20, %v1408_v3  ;;  %v269_v19 = vld [vmem:[%s1449_s14 + $0xa0] sm:$0xff] }
  0xb6   : > { %997 = vmatmul.mubr.msk.f32.gmra.mrb[14].mxu0 %vm354_vm14, %v1208_v6  ;;  %1004 = vmatmul.mubr.msk.f32.gmra.mrb[12].mxu1 %vm361_vm13, %v1208_v6 }
  0xb7   : > { %581 = vmatprep.mubr.f32.mxu1 %v1207_v30  ;;  %v604_v30 = vld [vmem:[%s1444_s11 + $0x80] sm:$0xff] }
  0xba   : > { %1005 = vmatmul.mubr.msk.f32.gmra.mrb[14].mxu1 %vm362_vm15, %v1208_v6 }
 0x16d   : > { %v493_v24 = vpop.f32.mrb[0].mxu0 }
 0x16e   : > { %v620_v25 = vmul.f32 %v588_v21, %v493_v24  ;;  %v495_v27 = vpop.f32.mrb[1].mxu0 }
 0x16f   : > { %v621_v28 = vmul.f32 %v589_v22, %v495_v27  ;;  %v270_v27 = vld [vmem:[%s1449_s14 + $0xa8] sm:$0xff] }
 0x170   : > { %v1457_v31 = vadd.f32 %v620_v25, %v249_v23  ;;  %v256_v25 = vld [vmem:[%s1449_s14 + $0x38] sm:$0xff] }
 0x171   : > { %v1461_v34 = vadd.f32 %v621_v28, %v250_v26  ;;  %v499_v36 = vpop.f32.mrb[2].mxu0  ;;  %v541_v38 = vpop.f32.mrb[0].mxu1 }
 0x172   : > { %v622_v39 = vmul.f32 %v590_v29, %v499_v36  ;;  %v636_v40 = vmul.f32 %v604_v30, %v541_v38  ;;  %v501_v42 = vpop.f32.mrb[3].mxu0  ;;  %v543_v44 = vpop.f32.mrb[1].mxu1  ;;  %v684_v45 = vmul.f32 %v1457_v31, %v1457_v31 }
 0x173   : > { %v623_v46 = vmul.f32 %v591_v32, %v501_v42  ;;  %v637_v47 = vmul.f32 %v605_v33, %v543_v44  ;;  %v685_v50 = vmul.f32 %v1461_v34, %v1461_v34  ;;  %v596_v33 = vld [vmem:[%s1444_s11 + $0x40] sm:$0xff] }
 0x174   : > { %v1473_v51 = vadd.f32 %v622_v39, %v251_v35  ;;  %v1475_v52 = vadd.f32 %v636_v40, %v265_v37  ;;  %v610_v35 = vld [vmem:[%s1444_s11 + $0xb0] sm:$0xff]  ;;  %v597_v39 = vld [vmem:[%s1444_s11 + $0x48] sm:$0xff]  ;;  %v611_v40 = vld [vmem:[%s1444_s11 + $0xb8] sm:$0xff] }
 0x175   : > { %v1479_v55 = vadd.f32 %v623_v46, %v252_v41  ;;  %v1481_v56 = vadd.f32 %v637_v47, %v266_v43  ;;  %v505_v58 = vpop.f32.mrb[4].mxu0  ;;  %v547_v60 = vpop.f32.mrb[2].mxu1  ;;  %v716_v61 = vadd.f32 %v685_v50, %v684_v45  ;;  %v257_v45 = vld [vmem:[%s1449_s14 + $0x40] sm:$0xff]  ;;  %v271_v47 = vld [vmem:[%s1449_s14 + $0xb0] sm:$0xff] }
 0x176   : > { %v624_v62 = vmul.f32 %v592_v48, %v505_v58  ;;  %v638_v63 = vmul.f32 %v606_v49, %v547_v60  ;;  %v507_v1 = vpop.f32.mrb[5].mxu0  ;;  %v549_v3 = vpop.f32.mrb[3].mxu1  ;;  %v700_v4 = vmul.f32 %v1475_v52, %v1475_v52  ;;  %v686_v14 = vmul.f32 %v1473_v51, %v1473_v51 }
 0x177   : > { %v625_v5 = vmul.f32 %v593_v53, %v507_v1  ;;  %v639_v6 = vmul.f32 %v607_v54, %v549_v3  ;;  %717 = vadd.xlane.f32.xlu0 %v716_v61  ;;  %v701_v9 = vmul.f32 %v1481_v56, %v1481_v56  ;;  %v687_v22 = vmul.f32 %v1479_v55, %v1479_v55  ;;  %v612_v1 = vld [vmem:[%s1444_s11 + $0xc0] sm:$0xff] }
 0x178   : > { %v1493_v10 = vadd.f32 %v624_v62, %v253_v57  ;;  %v1495_v11 = vadd.f32 %v638_v63, %v267_v59  ;;  %v258_v57 = vld [vmem:[%s1449_s14 + $0x48] sm:$0xff]  ;;  %v272_v59 = vld [vmem:[%s1449_s14 + $0xb8] sm:$0xff] }
 0x179   : > { %v1501_v15 = vadd.f32 %v625_v5, %v254_v0  ;;  %v1503_v16 = vadd.f32 %v639_v6, %v268_v2  ;;  %v511_v18 = vpop.f32.mrb[6].mxu0  ;;  %v553_v20 = vpop.f32.mrb[4].mxu1  ;;  %v740_v21 = vadd.f32 %v701_v9, %v700_v4  ;;  %v719_v49 = vadd.f32 %v687_v22, %v686_v14  ;;  %v598_v0 = vld [vmem:[%s1444_s11 + $0x50] sm:$0xff]  ;;  %v599_v5 = vld [vmem:[%s1444_s11 + $0x58] sm:$0xff]  ;;  %v613_v6 = vld [vmem:[%s1444_s11 + $0xc8] sm:$0xff] }
 0x17a   : > { %v626_v23 = vmul.f32 %v594_v7, %v511_v18  ;;  %v640_v24 = vmul.f32 %v608_v8, %v553_v20  ;;  %v513_v26 = vpop.f32.mrb[7].mxu0  ;;  %v555_v28 = vpop.f32.mrb[5].mxu1  ;;  %v702_v29 = vmul.f32 %v1495_v11, %v1495_v11  ;;  %v688_v41 = vmul.f32 %v1493_v10, %v1493_v10 }
 0x17b   : > { %v627_v30 = vmul.f32 %v595_v12, %v513_v26  ;;  %v641_v32 = vmul.f32 %v609_v13, %v555_v28  ;;  %741 = vadd.xlane.f32.xlu1 %v740_v21  ;;  %v703_v36 = vmul.f32 %v1503_v16, %v1503_v16  ;;  %v689_v42 = vmul.f32 %v1501_v15, %v1501_v15  ;;  %v259_v13 = vld [vmem:[%s1449_s14 + $0x50] sm:$0xff] }
 0x17c   : > { %v1517_v37 = vadd.f32 %v626_v23, %v255_v17  ;;  %v1519_v38 = vadd.f32 %v640_v24, %v269_v19  ;;  %v273_v17 = vld [vmem:[%s1449_s14 + $0xc0] sm:$0xff]  ;;  %v260_v23 = vld [vmem:[%s1449_s14 + $0x58] sm:$0xff] }
 0x17d   : > { %v1527_v43 = vadd.f32 %v627_v30, %v256_v25  ;;  %v1529_v44 = vadd.f32 %v641_v32, %v270_v27  ;;  %v517_v46 = vpop.f32.mrb[8].mxu0  ;;  %v559_v48 = vpop.f32.mrb[6].mxu1  ;;  %v743_v50 = vadd.f32 %v703_v36, %v702_v29  ;;  %v722_v7 = vadd.f32 %v689_v42, %v688_v41  ;;  %v274_v25 = vld [vmem:[%s1449_s14 + $0xc8] sm:$0xff]  ;;  %v600_v30 = vld [vmem:[%s1444_s11 + $0x60] sm:$0xff]  ;;  %v614_v32 = vld [vmem:[%s1444_s11 + $0xd0] sm:$0xff] }
 0x17e   : > { %v628_v53 = vmul.f32 %v596_v33, %v517_v46  ;;  %v642_v54 = vmul.f32 %v610_v35, %v559_v48  ;;  %v519_v58 = vpop.f32.mrb[9].mxu0  ;;  %v561_v60 = vpop.f32.mrb[7].mxu1  ;;  %v704_v61 = vmul.f32 %v1519_v38, %v1519_v38  ;;  %v690_v8 = vmul.f32 %v1517_v37, %v1517_v37 }
 0x17f   : > { %v629_v62 = vmul.f32 %v597_v39, %v519_v58  ;;  %v643_v63 = vmul.f32 %v611_v40, %v561_v60  ;;  %720 = vadd.xlane.f32.xlu1 %v719_v49  ;;  %744 = vadd.xlane.f32.xlu0 %v743_v50  ;;  %v705_v2 = vmul.f32 %v1529_v44, %v1529_v44  ;;  %v601_v39 = vld [vmem:[%s1444_s11 + $0x68] sm:$0xff]  ;;  %v615_v40 = vld [vmem:[%s1444_s11 + $0xd8] sm:$0xff]  ;;  %v275_v49 = vld [vmem:[%s1449_s14 + $0xd0] sm:$0xff] }
 0x180   : > { %v1541_v3 = vadd.f32 %v628_v53, %v257_v45  ;;  %v1543_v4 = vadd.f32 %v642_v54, %v271_v47  ;;  %v691_v20 = vmul.f32 %v1527_v43, %v1527_v43  ;;  %v261_v47 = vld [vmem:[%s1449_s14 + $0x60] sm:$0xff] }
 0x181   : > { %v1549_v9 = vadd.f32 %v629_v62, %v258_v57  ;;  %v1551_v12 = vadd.f32 %v643_v63, %v272_v59  ;;  %v523_v14 = vpop.f32.mrb[10].mxu0  ;;  %v565_v18 = vpop.f32.mrb[8].mxu1  ;;  %v746_v19 = vadd.f32 %v705_v2, %v704_v61  ;;  %v262_v59 = vld [vmem:[%s1449_s14 + $0x68] sm:$0xff]  ;;  %v276_v61 = vld [vmem:[%s1449_s14 + $0xd8] sm:$0xff]  ;;  %v602_v2 = vld [vmem:[%s1444_s11 + $0x70] sm:$0xff] }
 0x182   : > { %v630_v21 = vmul.f32 %v598_v0, %v523_v14  ;;  %v644_v22 = vmul.f32 %v612_v1, %v565_v18  ;;  %v525_v24 = vpop.f32.mrb[11].mxu0  ;;  %v567_v26 = vpop.f32.mrb[9].mxu1  ;;  %v692_v27 = vmul.f32 %v1541_v3, %v1541_v3  ;;  %v706_v41 = vmul.f32 %v1543_v4, %v1543_v4  ;;  %v617_v14 = vld [vmem:[%s1444_s11 + $0xe8] sm:$0xff] }
 0x183   : > { %v631_v28 = vmul.f32 %v599_v5, %v525_v24  ;;  %v645_v29 = vmul.f32 %v613_v6, %v567_v26  ;;  %747 = vadd.xlane.f32.xlu1 %v746_v19  ;;  %723 = vadd.xlane.f32.xlu0 %v722_v7  ;;  %v693_v33 = vmul.f32 %v1549_v9, %v1549_v9  ;;  %v616_v5 = vld [vmem:[%s1444_s11 + $0xe0] sm:$0xff] }
 0x184   : > { %v1565_v35 = vadd.f32 %v630_v21, %v259_v13  ;;  %v1567_v36 = vadd.f32 %v644_v22, %v273_v17  ;;  %v707_v42 = vmul.f32 %v1551_v12, %v1551_v12  ;;  %v725_v54 = vadd.f32 %v691_v20, %v690_v8  ;;  %v603_v13 = vld [vmem:[%s1444_s11 + $0x78] sm:$0xff]  ;;  %v263_v21 = vld [vmem:[%s1449_s14 + $0x70] sm:$0xff] }
 0x185   : > { %v1575_v45 = vadd.f32 %v631_v28, %v260_v23  ;;  %v1577_v46 = vadd.f32 %v645_v29, %v274_v25  ;;  %v529_v48 = vpop.f32.mrb[12].mxu0  ;;  %v571_v50 = vpop.f32.mrb[10].mxu1  ;;  %v728_v53 = vadd.f32 %v693_v33, %v692_v27  ;;  %v277_v23 = vld [vmem:[%s1449_s14 + $0xe0] sm:$0xff]  ;;  %v264_v29 = vld [vmem:[%s1449_s14 + $0x78] sm:$0xff] }
 0x186   : > { %v632_v57 = vmul.f32 %v600_v30, %v529_v48  ;;  %v646_v58 = vmul.f32 %v614_v32, %v571_v50  ;;  %v531_v60 = vpop.f32.mrb[13].mxu0  ;;  %v573_v62 = vpop.f32.mrb[11].mxu1  ;;  %v708_v63 = vmul.f32 %v1567_v36, %v1567_v36  ;;  %v749_v17 = vadd.f32 %v707_v42, %v706_v41  ;;  %v278_v32 = vld [vmem:[%s1449_s14 + $0xe8] sm:$0xff]  ;;  %v618_v42 = vld [vmem:[%s1444_s11 + $0xf0] sm:$0xff]  ;;  %v619_v50 = vld [vmem:[%s1444_s11 + $0xf8] sm:$0xff] }
 0x187   : > { %v633_v0 = vmul.f32 %v601_v39, %v531_v60  ;;  %v647_v1 = vmul.f32 %v615_v40, %v573_v62  ;;  %729 = vadd.xlane.f32.xlu1 %v728_v53  ;;  %726 = vadd.xlane.f32.xlu0 %v725_v54  ;;  %v709_v6 = vmul.f32 %v1577_v46, %v1577_v46 }
 0x188   : > { %v1589_v7 = vadd.f32 %v632_v57, %v261_v47  ;;  %v1591_v8 = vadd.f32 %v646_v58, %v275_v49  ;;  %v694_v18 = vmul.f32 %v1565_v35, %v1565_v35  ;;  %v695_v26 = vmul.f32 %v1575_v45, %v1575_v45 }
 0x189   : > { %v1597_v19 = vadd.f32 %v633_v0, %v262_v59  ;;  %v1599_v20 = vadd.f32 %v647_v1, %v276_v61  ;;  %v535_v22 = vpop.f32.mrb[14].mxu0  ;;  %v577_v24 = vpop.f32.mrb[12].mxu1  ;;  %v752_v25 = vadd.f32 %v709_v6, %v708_v63  ;;  %v279_v59 = vld [vmem:[%s1449_s14 + $0xf0] sm:$0xff]  ;;  %v280_v0 = vld [vmem:[%s1449_s14 + $0xf8] sm:$0xff] }
 0x18a   : > { %v634_v27 = vmul.f32 %v602_v2, %v535_v22  ;;  %v648_v28 = vmul.f32 %v616_v5, %v577_v24  ;;  %v537_v30 = vpop.f32.mrb[15].mxu0  ;;  %v579_v33 = vpop.f32.mrb[13].mxu1  ;;  %v696_v39 = vmul.f32 %v1589_v7, %v1589_v7  ;;  %v710_v53 = vmul.f32 %v1591_v8, %v1591_v8 }
 0x18b   : > { %v635_v40 = vmul.f32 %v603_v13, %v537_v30  ;;  %v649_v41 = vmul.f32 %v617_v14, %v579_v33  ;;  %753 = vadd.xlane.f32.xlu1 %v752_v25  ;;  %750 = vadd.xlane.f32.xlu0 %v749_v17  ;;  %v697_v47 = vmul.f32 %v1597_v19, %v1597_v19 }
 0x18c   : > { %v1612_v48 = vadd.f32 %v634_v27, %v263_v21  ;;  %v1614_v49 = vadd.f32 %v648_v28, %v277_v23  ;;  %v711_v54 = vmul.f32 %v1599_v20, %v1599_v20  ;;  %v731_v62 = vadd.f32 %v695_v26, %v694_v18 }
 0x18d   : > { %v1621_v57 = vadd.f32 %v635_v40, %v264_v29  ;;  %v1623_v58 = vadd.f32 %v649_v41, %v278_v32  ;;  %v583_v60 = vpop.f32.mrb[14].mxu1  ;;  %v734_v61 = vadd.f32 %v697_v47, %v696_v39 }
 0x18e   : > { %v650_v63 = vmul.f32 %v618_v42, %v583_v60  ;;  %v585_v1 = vpop.f32.mrb[15].mxu1  ;;  %v712_v2 = vmul.f32 %v1614_v49, %v1614_v49  ;;  %v755_v14 = vadd.f32 %v711_v54, %v710_v53  ;;  %v698_v18 = vmul.f32 %v1612_v48, %v1612_v48 }
 0x18f   : > { %v651_v5 = vmul.f32 %v619_v50, %v585_v1  ;;  %735 = vadd.xlane.f32.xlu1 %v734_v61  ;;  %732 = vadd.xlane.f32.xlu0 %v731_v62  ;;  %v713_v6 = vmul.f32 %v1623_v58, %v1623_v58  ;;  %v699_v22 = vmul.f32 %v1621_v57, %v1621_v57 }
 0x190   : > { %v1631_v13 = vadd.f32 %v650_v63, %v279_v59 }
 0x191   : > { %v1633_v17 = vadd.f32 %v651_v5, %v280_v0  ;;  %v758_v21 = vadd.f32 %v713_v6, %v712_v2  ;;  %v737_v23 = vadd.f32 %v699_v22, %v698_v18 }
 0x192   : > { %v714_v24 = vmul.f32 %v1631_v13, %v1631_v13 }
 0x193   : > { %759 = vadd.xlane.f32.xlu1 %v758_v21  ;;  %756 = vadd.xlane.f32.xlu0 %v755_v14  ;;  %v715_v25 = vmul.f32 %v1633_v17, %v1633_v17 }
 0x195   : > { %v761_v26 = vadd.f32 %v715_v25, %v714_v24 }
 0x197   : > { %738 = vadd.xlane.f32.xlu0 %v737_v23 }
 0x19b   : > { %762 = vadd.xlane.f32.xlu0 %v761_v26 }
 0x204   : > { %v718_v27 = vpop.xlane.xlu0 %717 }
 0x205   : > { %v764_v28 = vmax.f32 %v718_v27, 1e-24 }
 0x207   : > { %1110 = vrsqrt.f32 %v764_v28 }
 0x208   : > { %v742_v29 = vpop.xlane.xlu1 %741 }
 0x209   : > { %v772_v30 = vmax.f32 %v742_v29, 1e-24 }
 0x20b   : > { %1112 = vrsqrt.f32 %v772_v30 }
 0x20c   : > { %v721_v32 = vpop.xlane.xlu1 %720  ;;  %v745_v33 = vpop.xlane.xlu0 %744 }
 0x20d   : > { %v765_v39 = vmax.f32 %v721_v32, 1e-24  ;;  %v773_v40 = vmax.f32 %v745_v33, 1e-24 }
 0x20f   : > { %1114 = vrsqrt.f32 %v765_v39 }
 0x210   : > { %1116 = vrsqrt.f32 %v773_v40  ;;  %v748_v41 = vpop.xlane.xlu1 %747  ;;  %v724_v42 = vpop.xlane.xlu0 %723 }
 0x211   : > { %v1111_v47 = vpop.eup %1110  ;;  %v774_v50 = vmax.f32 %v748_v41, 1e-24  ;;  %v766_v53 = vmax.f32 %v724_v42, 1e-24 }
 0x212   : > { %v796_v54 = vmul.f32 %v1111_v47, %v1457_v31  ;;  %v797_v59 = vmul.f32 %v1111_v47, %v1461_v34 }
 0x213   : > { %1118 = vrsqrt.f32 %v774_v50 }
 0x214   : > { %828 = vst [vmem:[%s1648_s22] sm:$0xff] %v796_v54  ;;  %829 = vst [vmem:[%s1648_s22 + $0x8] sm:$0xff] %v797_v59  ;;  %1120 = vrsqrt.f32 %v766_v53  ;;  %v730_v60 = vpop.xlane.xlu1 %729  ;;  %v727_v61 = vpop.xlane.xlu0 %726 }
 0x215   : > { %v1113_v62 = vpop.eup %1112  ;;  %v768_v63 = vmax.f32 %v730_v60, 1e-24  ;;  %v767_v0 = vmax.f32 %v727_v61, 1e-24 }
 0x216   : > { %v812_v1 = vmul.f32 %v1113_v62, %v1475_v52  ;;  %v813_v31 = vmul.f32 %v1113_v62, %v1481_v56 }
 0x217   : > { %1122 = vrsqrt.f32 %v768_v63 }
 0x218   : > { %844 = vst [vmem:[%s1648_s22 + $0x80] sm:$0xff] %v812_v1  ;;  %845 = vst [vmem:[%s1648_s22 + $0x88] sm:$0xff] %v813_v31  ;;  %1124 = vrsqrt.f32 %v767_v0  ;;  %v754_v34 = vpop.xlane.xlu1 %753  ;;  %v751_v2 = vpop.xlane.xlu0 %750 }
 0x219   : > { %v1115_v5 = vpop.eup %1114  ;;  %v776_v6 = vmax.f32 %v754_v34, 1e-24  ;;  %v775_v14 = vmax.f32 %v751_v2, 1e-24 }
 0x21a   : > { %v1117_v21 = vpop.eup %1116  ;;  %v798_v18 = vmul.f32 %v1115_v5, %v1473_v51  ;;  %v799_v52 = vmul.f32 %v1115_v5, %v1479_v55 }
 0x21b   : > { %v814_v56 = vmul.f32 %v1117_v21, %v1495_v11  ;;  %v815_v22 = vmul.f32 %v1117_v21, %v1503_v16  ;;  %1126 = vrsqrt.f32 %v776_v6 }
 0x21c   : > { %830 = vst [vmem:[%s1648_s22 + $0x10] sm:$0xff] %v798_v18  ;;  %831 = vst [vmem:[%s1648_s22 + $0x18] sm:$0xff] %v799_v52  ;;  %1128 = vrsqrt.f32 %v775_v14  ;;  %v736_v23 = vpop.xlane.xlu1 %735  ;;  %v733_v24 = vpop.xlane.xlu0 %732 }
 0x21d   : > { %v1119_v25 = vpop.eup %1118  ;;  %846 = vst [vmem:[%s1648_s22 + $0x90] sm:$0xff] %v814_v56  ;;  %847 = vst [vmem:[%s1648_s22 + $0x98] sm:$0xff] %v815_v22  ;;  %v770_v51 = vmax.f32 %v736_v23, 1e-24  ;;  %v769_v26 = vmax.f32 %v733_v24, 1e-24 }
 0x21e   : > { %v1121_v55 = vpop.eup %1120  ;;  %v816_v11 = vmul.f32 %v1119_v25, %v1519_v38  ;;  %v817_v16 = vmul.f32 %v1119_v25, %v1529_v44 }
 0x21f   : > { %v800_v27 = vmul.f32 %v1121_v55, %v1493_v10  ;;  %v801_v28 = vmul.f32 %v1121_v55, %v1501_v15  ;;  %1130 = vrsqrt.f32 %v770_v51 }
 0x220   : > { %848 = vst [vmem:[%s1648_s22 + $0xa0] sm:$0xff] %v816_v11  ;;  %849 = vst [vmem:[%s1648_s22 + $0xa8] sm:$0xff] %v817_v16  ;;  %1132 = vrsqrt.f32 %v769_v26  ;;  %v760_v29 = vpop.xlane.xlu1 %759  ;;  %v757_v30 = vpop.xlane.xlu0 %756 }
 0x221   : > { %v1123_v32 = vpop.eup %1122  ;;  %832 = vst [vmem:[%s1648_s22 + $0x20] sm:$0xff] %v800_v27  ;;  %833 = vst [vmem:[%s1648_s22 + $0x28] sm:$0xff] %v801_v28  ;;  %v778_v38 = vmax.f32 %v760_v29, 1e-24  ;;  %v777_v33 = vmax.f32 %v757_v30, 1e-24 }
 0x222   : > { %v1125_v44 = vpop.eup %1124  ;;  %v804_v10 = vmul.f32 %v1123_v32, %v1541_v3  ;;  %v805_v15 = vmul.f32 %v1123_v32, %v1549_v9 }
 0x223   : > { %v802_v39 = vmul.f32 %v1125_v44, %v1517_v37  ;;  %v803_v40 = vmul.f32 %v1125_v44, %v1527_v43  ;;  %1134 = vrsqrt.f32 %v778_v38 }
 0x224   : > { %836 = vst [vmem:[%s1648_s22 + $0x40] sm:$0xff] %v804_v10  ;;  %837 = vst [vmem:[%s1648_s22 + $0x48] sm:$0xff] %v805_v15  ;;  %1136 = vrsqrt.f32 %v777_v33  ;;  %v739_v41 = vpop.xlane.xlu0 %738 }
 0x225   : > { %v1127_v42 = vpop.eup %1126  ;;  %834 = vst [vmem:[%s1648_s22 + $0x30] sm:$0xff] %v802_v39  ;;  %835 = vst [vmem:[%s1648_s22 + $0x38] sm:$0xff] %v803_v40  ;;  %v771_v47 = vmax.f32 %v739_v41, 1e-24 }
 0x226   : > { %v1129_v3 = vpop.eup %1128  ;;  %v820_v9 = vmul.f32 %v1127_v42, %v1567_v36  ;;  %v821_v37 = vmul.f32 %v1127_v42, %v1577_v46 }
 0x227   : > { %v818_v43 = vmul.f32 %v1129_v3, %v1543_v4  ;;  %v819_v50 = vmul.f32 %v1129_v3, %v1551_v12  ;;  %1138 = vrsqrt.f32 %v771_v47 }
 0x228   : > { %852 = vst [vmem:[%s1648_s22 + $0xc0] sm:$0xff] %v820_v9  ;;  %853 = vst [vmem:[%s1648_s22 + $0xc8] sm:$0xff] %v821_v37  ;;  %v763_v53 = vpop.xlane.xlu0 %762 }
 0x229   : > { %v1131_v54 = vpop.eup %1130  ;;  %850 = vst [vmem:[%s1648_s22 + $0xb0] sm:$0xff] %v818_v43  ;;  %851 = vst [vmem:[%s1648_s22 + $0xb8] sm:$0xff] %v819_v50  ;;  %v779_v59 = vmax.f32 %v763_v53, 1e-24 }
 0x22a   : > { %v1133_v60 = vpop.eup %1132  ;;  %v808_v36 = vmul.f32 %v1131_v54, %v1589_v7  ;;  %v809_v4 = vmul.f32 %v1131_v54, %v1597_v19 }
 0x22b   : > { %v806_v12 = vmul.f32 %v1133_v60, %v1565_v35  ;;  %v807_v46 = vmul.f32 %v1133_v60, %v1575_v45  ;;  %1140 = vrsqrt.f32 %v779_v59 }
 0x22c   : > { %840 = vst [vmem:[%s1648_s22 + $0x60] sm:$0xff] %v808_v36  ;;  %841 = vst [vmem:[%s1648_s22 + $0x68] sm:$0xff] %v809_v4 }
 0x22d   : > { %v1135_v61 = vpop.eup %1134  ;;  %838 = vst [vmem:[%s1648_s22 + $0x50] sm:$0xff] %v806_v12  ;;  %839 = vst [vmem:[%s1648_s22 + $0x58] sm:$0xff] %v807_v46 }
 0x22e   : > { %v1137_v7 = vpop.eup %1136  ;;  %v824_v62 = vmul.f32 %v1135_v61, %v1614_v49  ;;  %v825_v19 = vmul.f32 %v1135_v61, %v1623_v58 }
 0x22f   : > { %v822_v35 = vmul.f32 %v1137_v7, %v1591_v8  ;;  %v823_v45 = vmul.f32 %v1137_v7, %v1599_v20 }
 0x230   : > { %856 = vst [vmem:[%s1648_s22 + $0xe0] sm:$0xff] %v824_v62  ;;  %857 = vst [vmem:[%s1648_s22 + $0xe8] sm:$0xff] %v825_v19 }
 0x231   : > { %v1139_v63 = vpop.eup %1138  ;;  %854 = vst [vmem:[%s1648_s22 + $0xd0] sm:$0xff] %v822_v35  ;;  %855 = vst [vmem:[%s1648_s22 + $0xd8] sm:$0xff] %v823_v45 }
 0x232   : > { %v810_v0 = vmul.f32 %v1139_v63, %v1612_v48  ;;  %v811_v1 = vmul.f32 %v1139_v63, %v1621_v57 }
 0x234   : > { %842 = vst [vmem:[%s1648_s22 + $0x70] sm:$0xff] %v810_v0  ;;  %843 = vst [vmem:[%s1648_s22 + $0x78] sm:$0xff] %v811_v1 }
 0x235   : > { %v1141_v8 = vpop.eup %1140 }
 0x236   : > { %v826_v20 = vmul.f32 %v1141_v8, %v1631_v13  ;;  %v827_v48 = vmul.f32 %v1141_v8, %v1633_v17 }
 0x238   : > { %858 = vst [vmem:[%s1648_s22 + $0xf0] sm:$0xff] %v826_v20  ;;  %859 = vst [vmem:[%s1648_s22 + $0xf8] sm:$0xff] %v827_v48 }
 0x239   : > { %1155 = shalt.err (!%p1152_p3)
}
 0x23a   : > { %s1156_s10 = scalar_lea.hbm %s1713_s5, 4096  ;;  %s1160_s13 = scalar_lea.hbm %s1768_s4, 8192 }
 0x23b   : > { %p1157_p4 = scmp.ne.s32.totalorder %s1713_s5, %s1156_s10  ;;  %p1161_p9 = scmp.lt.u32.totalorder %s1713_s5, %s1768_s4 }
 0x23c   : > { %p1162_p10 = scmp.lt.u32.totalorder %s1160_s13, %s1156_s10  ;;  %p1164_p12 = scmp.lt.u32.totalorder %s1156_s10, %s1713_s5 }
 0x23d   : > { %p1158_p7 = pnand %p1157_p4, %p1275_p5 }
 0x23e   : > { %p1163_p11 = por %p1162_p10, %p1161_p9 }
 0x23f   : > { %p1159_p8 = pneg %p1158_p7 }
 0x240   : > { %p1165_p13 = por %p1164_p12, %p1163_p11 }
 0x242   : > { %p1166_p0 = pnand %p1165_p13, %p1159_p8 }
 0x244   : > { %1169 = shalt.err (!%p1166_p0)
}
 0x245   : > { %s1210_s20 = smov 256   ;;  %s1211_s22 = smov 16  }
 0x246   : > { %1064 = dma.vmem_to_hbm [thread:$0]  (%p1275_p5), %s1715_s28, 4096, %s1713_s5, %s1723_s19, %s1210_s20, %s1210_s20, %s1211_s22  }
 0x247 PF: > { %p1070_p1 = scmp.ge.s32.totalorder %s1204_s18, 2  ;;  %s890_s23 = sand.u32 1, %s1192_s15  }
 0x248   : > { %s891_s29 = scalar_lea.sflag [#allocation3], %s890_s23 }
 0x249   : > { %p1067_p2 = pnand %p1070_p1, %p1279_p6 }
 0x24b   : > { %1187 = dma.done.wait (!%p1067_p2), %s891_s29, 4096  }
 0x24c   : > { %1189 = vsyncadd (!%p1067_p2), %s891_s29, 4294963200  ;;  %p14_p3 = scmp.ge.s32.totalorder %s1262_s21, 4   ;;  %s1771_s15 = smov %s1196_s16 }
 0x24d   : > { %s1772_s16 = smov %s1200_s17  ;;  %s1773_s17 = smov %s1273_s24 }
 0x24e   : > { %s1774_s18 = smov %s1262_s21  ;;  %16 = sbr.rel (!%p14_p3) target bundleno = 3 (0x3), region = 77 }
 0x255   :  { %896 = vsyncpa [#allocation3], 1 }
 0x256   :  { %898 = vsyncpa [#allocation3 + $0x1], 1 }

// kernel: _isea_impl.2
= control target key start
LH: loop header
LB: loop body
LE: loop exit
PB: predicated region body
PF: predicated region fallthrough
CT: control target
= control target key end

     0   :  { %s8536_s0 = inlined_call_operand.hbm [shape: f32[256,256], index: 0, kind: input, shape index: {}]   ;;  %s8537_s1 = inlined_call_operand.vmem [shape: s32[1,256], index: 1, kind: input, shape index: {}]   ;;  %s8538_s2 = inlined_call_operand.<no memory space> [shape: f32[1], index: 2, kind: input, shape index: {}]   ;;  %s8539_s3 = inlined_call_operand.vmem [shape: f32[128,256], index: 3, kind: output, shape index: {}]  }
   0x1   :  { %8 = sst [smem:[#allocation5]] %s8538_s2 }
   0x2   :  { %9 = vsyncpa [#allocation7], 0 }
   0x3   :  { %11 = vsyncpa [#allocation7 + $0x1], 0  ;;  %s5918_s14 = smov 0   ;;  %s5920_s15 = smov 0  }
   0x4   :  { %s5922_s16 = smov 0   ;;  %s5924_s17 = smov 0  }
   0x5 LB: > { %s5937_s2 = sadd.s32 4294967295, %s5886_s17   ;;  %s5940_s18 = sadd.s32 1, %s5886_s17   ;;  %s5886_s17 = sphi %s5924_s17, %s9293_s17   ;;  %s5882_s16 = sphi %s5922_s16, %s9292_s16   ;;  %s5878_s15 = sphi %s5920_s15, %s9291_s15   ;;  %s5874_s14 = sphi %s5918_s14, %s9290_s14  }
   0x6   : > { %s21_s19 = ssub.s32 %s5886_s17, %s5940_s18  ;;  %s24_s20 = sadd.s32 1, %s5882_s16 }
   0x7   : > { %p22_p0 = scmp.eq.s32.totalorder %s21_s19, 0  ;;  %p31_p1 = scmp.ne.s32.totalorder %s5882_s16, %s5878_s15 }
   0x8   : > { %p32_p2 = scmp.eq.s32.totalorder %s5886_s17, 0  ;;  %p37_p3 = scmp.ne.s32.totalorder %s5878_s15, %s5874_s14 }
   0x9   : > { %s5950_s21 = scalar_select %p22_p0, %s5882_s16, %s24_s20  }
   0xa   : > { %p33_p4 = por %p32_p2, %p31_p1  ;;  %p38_p5 = scmp.eq.s32.totalorder %s5937_s2, 0 }
   0xb   : > { %p5653_p6 = scmp.lt.s32.totalorder %s5886_s17, 2  ;;  %s132_s23 = sand.u32 1, %s5882_s16  }
   0xc   : > { %p5954_p7 = por %p38_p5, %p37_p3  ;;  %s4802_s24 = sshll.u32 %s132_s23, 8 }
   0xd   : > { %s4942_s25 = sshll.u32 %s5886_s17, 12  ;;  %s136_s29 = scalar_lea.vmem [#allocation6], %s4802_s24 }
   0xe   : > { %s5963_s28 = scalar_lea.hbm %s8536_s0, %s4942_s25  ;;  %s144_s30 = sshll.u32 %s136_s29, 4  ;;  %s5965_s30 = int_to_ptr.vmem [resolvable:$true] %s144_s30 }
   0xf   : > { %p5967_p8 = pnand %p5653_p6, %p33_p4  ;;  %s5972_s5 = scalar_lea.sflag [#allocation7], %s132_s23 }
  0x10   : > { %s5822_s6 = scalar_lea.hbm %s5963_s28, 4096  ;;  %s5827_s9 = scalar_lea.hbm %s8536_s0, 8192 }
  0x11   : > { %p5823_p10 = scmp.ne.s32.totalorder %s5963_s28, %s5822_s6  ;;  %p5824_p11 = pneg %p5967_p8 }
  0x12   : > { %p5828_p0 = scmp.lt.u32.totalorder %s5963_s28, %s8536_s0  ;;  %p5829_p1 = scmp.lt.u32.totalorder %s5827_s9, %s5822_s6 }
  0x13   : > { %p5825_p12 = pnand %p5824_p11, %p5823_p10  ;;  %p5831_p3 = scmp.lt.u32.totalorder %s5822_s6, %s5963_s28 }
  0x14   : > { %p5830_p2 = por %p5829_p1, %p5828_p0 }
  0x15   : > { %p5826_p13 = pneg %p5825_p12 }
  0x16   : > { %p5832_p4 = por %p5831_p3, %p5830_p2 }
  0x18   : > { %p5833_p5 = pnand %p5832_p4, %p5826_p13 }
  0x1a   : > { %5836 = shalt.err (!%p5833_p5)
}
  0x1b   : > { %s5837_s12 = scalar_lea.vmem %s5965_s30, 4096  ;;  %s5888_s13 = smov [#allocation6]  }
  0x1c   : > { %p5838_p6 = scmp.ne.s32.totalorder %s5965_s30, %s5837_s12  ;;  %s5842_s14 = sshll.u32 %s5888_s13, 4  ;;  %s5843_s14 = int_to_ptr.vmem [resolvable:$false] %s5842_s14 }
  0x1d   : > { %s5844_s19 = scalar_lea.vmem %s5843_s14, 8192  ;;  %p5845_p9 = scmp.lt.s32.totalorder %s5965_s30, %s5843_s14 }
  0x1e   : > { %p5840_p10 = pnand %p5838_p6, %p5824_p11  ;;  %p5846_p0 = scmp.lt.s32.totalorder %s5844_s19, %s5837_s12 }
  0x20   : > { %p5841_p12 = pneg %p5840_p10  ;;  %p5847_p1 = por %p5846_p0, %p5845_p9 }
  0x22   : > { %p5848_p2 = pnand %p5847_p1, %p5841_p12 }
  0x24   : > { %5851 = shalt.err (!%p5848_p2)
}
  0x25   : > { %s5889_s20 = smov 256   ;;  %s5890_s23 = smov 16  }
  0x26   : > { %5652 = dma.hbm_to_vmem [thread:$0]  (!%p5967_p8), %s5963_s28, 4096, %s5965_s30, %s5972_s5, %s5889_s20, %s5889_s20, %s5890_s23  }
  0x27   : > { %p158_p11 = scmp.lt.s32.totalorder %s5886_s17, 3  ;;  %p8858_p13 = scmp.ge.s32.totalorder %s5886_s17, 1 }
  0x29   : > { %p159_p3 = pnand %p8858_p13, %p158_p11 }
  0x2b   : > { %162 = sbr.rel (%p159_p3) target bundleno = 1062 (0x426), region = 32 }
  0x32   : > { %s164_s24 = sand.u32 1, %s5878_s15  }
  0x33   : > { %s4807_s25 = sshll.u32 %s164_s24, 8  ;;  %s165_s26 = scalar_lea.sflag [#allocation7], %s164_s24 }
  0x34   : > { %s6004_s27 = scalar_lea.vmem [#allocation6], %s4807_s25 }
  0x35   : > { %5869 = dma.done.wait (%p5954_p7), %s165_s26, 4096  }
  0x36   : > { %5871 = vsyncadd (%p5954_p7), %s165_s26, 4294963200  ;;  %p190_p9 = scmp.lt.s32.totalorder %s5937_s2, 1  ;;  %p4808_p8 = scmp.ne.s32.totalorder %s5937_s2, 0 }
  0x37   : > { %vm261_vm0 = vcmask (!%p4808_p8), 7168   ;;  %v5891_v0 = vmov (!%p4808_p8), 0.0  }
  0x38   : > { %s6012_s28 = scalar_select %p190_p9, %s5937_s2, 1 }
  0x39   : > { %196 = sbr.rel (%p4808_p8) target bundleno = 97 (0x61), region = 40  ;;  %197 = vst [vmem:[#allocation2] sm:$0xff] (!%p4808_p8), %v5891_v0  ;;  %198 = vst [vmem:[#allocation2 + $0x8] sm:$0xff] (!%p4808_p8), %v5891_v0 }
  0x3a   : > { %s192_s30 = scalar_lea.vmem %s8537_s1, %s6012_s28  ;;  %199 = vst [vmem:[#allocation2 + $0x10] sm:$0xff] (!%p4808_p8), %v5891_v0  ;;  %200 = vst [vmem:[#allocation2 + $0x18] sm:$0xff] (!%p4808_p8), %v5891_v0 }
  0x3b   : > { %201 = vst [vmem:[#allocation2 + $0x20] sm:$0xff] (!%p4808_p8), %v5891_v0  ;;  %202 = vst [vmem:[#allocation2 + $0x28] sm:$0xff] (!%p4808_p8), %v5891_v0 }
  0x3c   : > { %203 = vst [vmem:[#allocation2 + $0x30] sm:$0xff] (!%p4808_p8), %v5891_v0  ;;  %204 = vst [vmem:[#allocation2 + $0x38] sm:$0xff] (!%p4808_p8), %v5891_v0 }
  0x3d   : > { %205 = vst [vmem:[#allocation2 + $0x40] sm:$0xff] (!%p4808_p8), %v5891_v0  ;;  %206 = vst [vmem:[#allocation2 + $0x48] sm:$0xff] (!%p4808_p8), %v5891_v0 }
  0x3e   : > { %207 = vst [vmem:[#allocation2 + $0x50] sm:$0xff] (!%p4808_p8), %v5891_v0  ;;  %208 = vst [vmem:[#allocation2 + $0x58] sm:$0xff] (!%p4808_p8), %v5891_v0 }
  0x3f   : > { %209 = vst [vmem:[#allocation2 + $0x60] sm:$0xff] (!%p4808_p8), %v5891_v0  ;;  %210 = vst [vmem:[#allocation2 + $0x68] sm:$0xff] (!%p4808_p8), %v5891_v0 }
  0x40   : > { %211 = vst [vmem:[#allocation2 + $0x70] sm:$0xff] %v5891_v0  ;;  %212 = vst [vmem:[#allocation2 + $0x78] sm:$0xff] %v5891_v0 }
  0x41   : > { %213 = vst [vmem:[#allocation2 + $0x80] sm:$0xff] %v5891_v0  ;;  %214 = vst [vmem:[#allocation2 + $0x88] sm:$0xff] %v5891_v0 }
  0x42   : > { %215 = vst [vmem:[#allocation2 + $0x90] sm:$0xff] %v5891_v0  ;;  %216 = vst [vmem:[#allocation2 + $0x98] sm:$0xff] %v5891_v0 }
  0x43   : > { %217 = vst [vmem:[#allocation2 + $0xa0] sm:$0xff] %v5891_v0  ;;  %218 = vst [vmem:[#allocation2 + $0xa8] sm:$0xff] %v5891_v0 }
  0x44   : > { %219 = vst [vmem:[#allocation2 + $0xb0] sm:$0xff] %v5891_v0  ;;  %220 = vst [vmem:[#allocation2 + $0xb8] sm:$0xff] %v5891_v0 }
  0x45   : > { %221 = vst [vmem:[#allocation2 + $0xc0] sm:$0xff] %v5891_v0  ;;  %222 = vst [vmem:[#allocation2 + $0xc8] sm:$0xff] %v5891_v0 }
  0x46   : > { %223 = vst [vmem:[#allocation2 + $0xd0] sm:$0xff] %v5891_v0  ;;  %224 = vst [vmem:[#allocation2 + $0xd8] sm:$0xff] %v5891_v0 }
  0x47   : > { %225 = vst [vmem:[#allocation2 + $0xe0] sm:$0xff] %v5891_v0  ;;  %226 = vst [vmem:[#allocation2 + $0xe8] sm:$0xff] %v5891_v0 }
  0x48   : > { %227 = vst [vmem:[#allocation2 + $0xf0] sm:$0xff] %v5891_v0  ;;  %228 = vst [vmem:[#allocation2 + $0xf8] sm:$0xff] %v5891_v0 }
  0x49   : > { %229 = vst [vmem:[#allocation3] sm:$0xff] %v5891_v0  ;;  %230 = vst [vmem:[#allocation3 + $0x8] sm:$0xff] %v5891_v0 }
  0x4a   : > { %231 = vst [vmem:[#allocation3 + $0x10] sm:$0xff] %v5891_v0  ;;  %232 = vst [vmem:[#allocation3 + $0x18] sm:$0xff] %v5891_v0 }
  0x4b   : > { %233 = vst [vmem:[#allocation3 + $0x20] sm:$0xff] %v5891_v0  ;;  %234 = vst [vmem:[#allocation3 + $0x28] sm:$0xff] %v5891_v0 }
  0x4c   : > { %235 = vst [vmem:[#allocation3 + $0x30] sm:$0xff] %v5891_v0  ;;  %236 = vst [vmem:[#allocation3 + $0x38] sm:$0xff] %v5891_v0 }
  0x4d   : > { %237 = vst [vmem:[#allocation3 + $0x40] sm:$0xff] %v5891_v0  ;;  %238 = vst [vmem:[#allocation3 + $0x48] sm:$0xff] %v5891_v0 }
  0x4e   : > { %239 = vst [vmem:[#allocation3 + $0x50] sm:$0xff] %v5891_v0  ;;  %240 = vst [vmem:[#allocation3 + $0x58] sm:$0xff] %v5891_v0 }
  0x4f   : > { %241 = vst [vmem:[#allocation3 + $0x60] sm:$0xff] %v5891_v0  ;;  %242 = vst [vmem:[#allocation3 + $0x68] sm:$0xff] %v5891_v0 }
  0x50   : > { %243 = vst [vmem:[#allocation3 + $0x70] sm:$0xff] %v5891_v0  ;;  %244 = vst [vmem:[#allocation3 + $0x78] sm:$0xff] %v5891_v0 }
  0x51   : > { %245 = vst [vmem:[#allocation3 + $0x80] sm:$0xff] %v5891_v0  ;;  %246 = vst [vmem:[#allocation3 + $0x88] sm:$0xff] %v5891_v0 }
  0x52   : > { %247 = vst [vmem:[#allocation3 + $0x90] sm:$0xff] %v5891_v0  ;;  %248 = vst [vmem:[#allocation3 + $0x98] sm:$0xff] %v5891_v0 }
  0x53   : > { %249 = vst [vmem:[#allocation3 + $0xa0] sm:$0xff] %v5891_v0  ;;  %250 = vst [vmem:[#allocation3 + $0xa8] sm:$0xff] %v5891_v0 }
  0x54   : > { %251 = vst [vmem:[#allocation3 + $0xb0] sm:$0xff] %v5891_v0  ;;  %252 = vst [vmem:[#allocation3 + $0xb8] sm:$0xff] %v5891_v0 }
  0x55   : > { %253 = vst [vmem:[#allocation3 + $0xc0] sm:$0xff] %v5891_v0  ;;  %254 = vst [vmem:[#allocation3 + $0xc8] sm:$0xff] %v5891_v0 }
  0x56   : > { %255 = vst [vmem:[#allocation3 + $0xd0] sm:$0xff] %v5891_v0  ;;  %256 = vst [vmem:[#allocation3 + $0xd8] sm:$0xff] %v5891_v0 }
  0x57   : > { %257 = vst [vmem:[#allocation3 + $0xe0] sm:$0xff] %v5891_v0  ;;  %258 = vst [vmem:[#allocation3 + $0xe8] sm:$0xff] %v5891_v0 }
  0x58   : > { %259 = vst [vmem:[#allocation3 + $0xf0] sm:$0xff] %v5891_v0  ;;  %260 = vst [vmem:[#allocation3 + $0xf8] sm:$0xff] %v5891_v0 }
  0x59   : > { %262 = vst.msk [vmem:[#allocation4] sm:$0xff] %vm261_vm0, %v5891_v0  ;;  %263 = vst.msk [vmem:[#allocation4 + $0x8] sm:$0xff] %vm261_vm0, %v5891_v0 }
  0x5a   : > { %264 = vst.msk [vmem:[#allocation4 + $0x10] sm:$0xff] %vm261_vm0, %v5891_v0  ;;  %265 = vst.msk [vmem:[#allocation4 + $0x18] sm:$0xff] %vm261_vm0, %v5891_v0 }
  0x5b   : > { %266 = vst.msk [vmem:[#allocation4 + $0x20] sm:$0xff] %vm261_vm0, %v5891_v0  ;;  %267 = vst.msk [vmem:[#allocation4 + $0x28] sm:$0xff] %vm261_vm0, %v5891_v0 }
  0x5c   : > { %268 = vst.msk [vmem:[#allocation4 + $0x30] sm:$0xff] %vm261_vm0, %v5891_v0  ;;  %269 = vst.msk [vmem:[#allocation4 + $0x38] sm:$0xff] %vm261_vm0, %v5891_v0 }
  0x5d   : > { %270 = vst.msk [vmem:[#allocation4 + $0x40] sm:$0xff] %vm261_vm0, %v5891_v0  ;;  %271 = vst.msk [vmem:[#allocation4 + $0x48] sm:$0xff] %vm261_vm0, %v5891_v0 }
  0x5e   : > { %272 = vst.msk [vmem:[#allocation4 + $0x50] sm:$0xff] %vm261_vm0, %v5891_v0  ;;  %273 = vst.msk [vmem:[#allocation4 + $0x58] sm:$0xff] %vm261_vm0, %v5891_v0 }
  0x5f   : > { %274 = vst.msk [vmem:[#allocation4 + $0x60] sm:$0xff] %vm261_vm0, %v5891_v0  ;;  %275 = vst.msk [vmem:[#allocation4 + $0x68] sm:$0xff] %vm261_vm0, %v5891_v0 }
  0x60   : > { %276 = vst.msk [vmem:[#allocation4 + $0x70] sm:$0xff] %vm261_vm0, %v5891_v0  ;;  %277 = vst.msk [vmem:[#allocation4 + $0x78] sm:$0xff] %vm261_vm0, %v5891_v0 }
  0x61 PF: > { %v279_v1 = vld [vmem:[%s6004_s27 + $0x8] sm:$0xff]  ;;  %v281_v2 = vld [vmem:[%s6004_s27 + $0x18] sm:$0xff]  ;;  %v278_v3 = vld [vmem:[%s6004_s27] sm:$0xff]  ;;  %v8540_v10 = vmov 0.0   ;;  %p4922_p7 = scmp.ne.s32.totalorder %s5937_s2, 1 }
  0x62   : > { %v412_v5 = vand.u32 4294901760, %v279_v1  ;;  %v416_v6 = vand.u32 4294901760, %v281_v2  ;;  %v280_v7 = vld [vmem:[%s6004_s27 + $0x10] sm:$0xff]  ;;  %v414_v8 = vand.u32 4294901760, %v278_v3  ;;  %v2099_v9 = vmul.f32 %v279_v1, %v279_v1  ;;  %508 = vmatprep.mubr.f32.mxu0 %v8540_v10  ;;  %2226 = vmatprep.mubr.f32.mxu1 %v8540_v10  ;;  %v283_v15 = vld [vmem:[%s6004_s27 + $0x28] sm:$0xff]  ;;  %v285_v16 = vld [vmem:[%s6004_s27 + $0x38] sm:$0xff] }
  0x63   : > { %v418_v11 = vand.u32 4294901760, %v280_v7  ;;  %v2101_v12 = vmul.f32 %v281_v2, %v281_v2  ;;  %v2098_v13 = vmul.f32 %v278_v3, %v278_v3  ;;  %v2100_v14 = vmul.f32 %v280_v7, %v280_v7  ;;  %v282_v21 = vld [vmem:[%s6004_s27 + $0x20] sm:$0xff]  ;;  %v284_v30 = vld [vmem:[%s6004_s27 + $0x30] sm:$0xff]  ;;  %v287_v35 = vld [vmem:[%s6004_s27 + $0x48] sm:$0xff]  ;;  %s7802_s2 = sld [smem:[#allocation5]] (!%p4922_p7) }
  0x64   : > { %v6123_v17 = vpack.c.bf16 %v416_v6, %v412_v5  ;;  %v6125_v18 = vsub.f32 %v279_v1, %v412_v5  ;;  %v6127_v19 = vsub.f32 %v281_v2, %v416_v6  ;;  %v6129_v20 = vsub.f32 %v278_v3, %v414_v8  ;;  %v289_v40 = vld [vmem:[%s6004_s27 + $0x58] sm:$0xff]  ;;  %v286_v49 = vld [vmem:[%s6004_s27 + $0x40] sm:$0xff]  ;;  %v288_v58 = vld [vmem:[%s6004_s27 + $0x50] sm:$0xff] }
  0x65   : > { %v6132_v22 = vpack.c.bf16 %v418_v11, %v414_v8  ;;  %v6134_v23 = vsub.f32 %v280_v7, %v418_v11  ;;  %v2130_v24 = vand.u32 4294901760, %v2099_v9  ;;  %v2134_v25 = vand.u32 4294901760, %v2101_v12  ;;  %v291_v3 = vld [vmem:[%s6004_s27 + $0x68] sm:$0xff]  ;;  %v293_v5 = vld [vmem:[%s6004_s27 + $0x78] sm:$0xff] }
  0x66   : > { %8859 = vst [vmem:[#allocation9_spill] sm:$0xff] %v6123_v17  ;;  %8860 = vst [vmem:[#allocation10_spill] sm:$0xff] %v6125_v18  ;;  %4944 = vmatprep.subr.bf16.mxu0 %v6123_v17  ;;  %v2132_v26 = vand.u32 4294901760, %v2098_v13  ;;  %v2136_v27 = vand.u32 4294901760, %v2100_v14  ;;  %v420_v28 = vand.u32 4294901760, %v283_v15  ;;  %v424_v29 = vand.u32 4294901760, %v285_v16 }
  0x67   : > { %8861 = vst [vmem:[#allocation11_spill] sm:$0xff] %v6127_v19  ;;  %8862 = vst [vmem:[#allocation12_spill] sm:$0xff] %v6129_v20  ;;  %4946 = vmatpush1.bf16.msra.mxu0 %v6132_v22  ;;  %v6139_v31 = vpack.c.bf16 %v2134_v25, %v2130_v24  ;;  %v6141_v32 = vsub.f32 %v2099_v9, %v2130_v24  ;;  %v6143_v33 = vsub.f32 %v2101_v12, %v2134_v25 }
  0x68   : > { %8863 = vst [vmem:[#allocation13_spill] sm:$0xff] %v6132_v22  ;;  %8864 = vst [vmem:[#allocation14_spill] sm:$0xff] %v6134_v23  ;;  %v422_v34 = vand.u32 4294901760, %v282_v21  ;;  %v6146_v36 = vpack.c.bf16 %v2136_v27, %v2132_v26  ;;  %v6148_v37 = vsub.f32 %v2098_v13, %v2132_v26  ;;  %v6150_v38 = vsub.f32 %v2100_v14, %v2136_v27 }
  0x69   : > { %8865 = vst [vmem:[#allocation15_spill] sm:$0xff] %v6139_v31  ;;  %8866 = vst [vmem:[#allocation16_spill] sm:$0xff] %v6141_v32  ;;  %v6152_v39 = vpack.c.bf16 %v424_v29, %v420_v28  ;;  %5136 = vmatprep.subr.bf16.mxu1 %v6139_v31  ;;  %v6156_v41 = vsub.f32 %v283_v15, %v420_v28  ;;  %v6158_v42 = vsub.f32 %v285_v16, %v424_v29  ;;  %v302_v31 = vld [vmem:[%s6004_s27 + $0xc0] sm:$0xff] }
  0x6a   : > { %8867 = vst [vmem:[#allocation17_spill] sm:$0xff] %v6143_v33  ;;  %8868 = vst [vmem:[#allocation18_spill] sm:$0xff] %v6146_v36  ;;  %v426_v43 = vand.u32 4294901760, %v284_v30  ;;  %v6160_v44 = vsub.f32 %v282_v21, %v422_v34  ;;  %5138 = vmatpush1.bf16.msra.mxu1 %v6146_v36  ;;  %v2103_v45 = vmul.f32 %v283_v15, %v283_v15  ;;  %v428_v48 = vand.u32 4294901760, %v287_v35  ;;  %v290_v15 = vld [vmem:[%s6004_s27 + $0x60] sm:$0xff]  ;;  %v305_v36 = vld [vmem:[%s6004_s27 + $0xd8] sm:$0xff] }
  0x6b   : > { %8869 = vst [vmem:[#allocation19_spill] sm:$0xff] %v6148_v37  ;;  %8870 = vst [vmem:[#allocation20_spill] sm:$0xff] %v6150_v38  ;;  %4948 = vmatprep.subr.bf16.mxu0 %v6152_v39  ;;  %v2105_v46 = vmul.f32 %v285_v16, %v285_v16  ;;  %v2102_v47 = vmul.f32 %v282_v21, %v282_v21  ;;  %v2104_v52 = vmul.f32 %v284_v30, %v284_v30 }
  0x6c   : > { %8871 = vst [vmem:[#allocation21_spill] sm:$0xff] %v6152_v39  ;;  %8872 = vst [vmem:[#allocation22_spill] sm:$0xff] %v6156_v41  ;;  %v6165_v50 = vpack.c.bf16 %v426_v43, %v422_v34  ;;  %v6167_v51 = vsub.f32 %v284_v30, %v426_v43  ;;  %v432_v53 = vand.u32 4294901760, %v289_v40  ;;  %v2138_v54 = vand.u32 4294901760, %v2103_v45  ;;  %v292_v30 = vld [vmem:[%s6004_s27 + $0x70] sm:$0xff]  ;;  %v303_v39 = vld [vmem:[%s6004_s27 + $0xc8] sm:$0xff] }
  0x6d   : > { %8873 = vst [vmem:[#allocation23_spill] sm:$0xff] %v6158_v42  ;;  %8874 = vst [vmem:[#allocation24_spill] sm:$0xff] %v6160_v44  ;;  %v2142_v55 = vand.u32 4294901760, %v2105_v46  ;;  %v2140_v56 = vand.u32 4294901760, %v2102_v47  ;;  %v6169_v57 = vsub.f32 %v287_v35, %v428_v48  ;;  %v2144_v59 = vand.u32 4294901760, %v2104_v52 }
  0x6e   : > { %8875 = vst [vmem:[#allocation25_spill] sm:$0xff] %v6165_v50  ;;  %8876 = vst [vmem:[#allocation26_spill] sm:$0xff] %v6167_v51  ;;  %4950 = vmatpush1.bf16.msra.mxu0 %v6165_v50  ;;  %v6173_v60 = vpack.c.bf16 %v432_v53, %v428_v48  ;;  %v6175_v61 = vsub.f32 %v289_v40, %v432_v53  ;;  %v430_v62 = vand.u32 4294901760, %v286_v49  ;;  %v434_v8 = vand.u32 4294901760, %v288_v58 }
  0x6f   : > { %8877 = vst [vmem:[#allocation27_spill] sm:$0xff] %v6169_v57  ;;  %v6177_v63 = vpack.c.bf16 %v2142_v55, %v2138_v54  ;;  %v6179_v0 = vsub.f32 %v2103_v45, %v2138_v54  ;;  %v6181_v1 = vsub.f32 %v2105_v46, %v2142_v55  ;;  %v6183_v2 = vsub.f32 %v2102_v47, %v2140_v56 }
  0x70   : > { %8878 = vst [vmem:[#allocation28_spill] sm:$0xff] %v6173_v60  ;;  %8879 = vst [vmem:[#allocation29_spill] sm:$0xff] %v6175_v61  ;;  %v6187_v6 = vpack.c.bf16 %v2144_v59, %v2140_v56  ;;  %v6189_v7 = vsub.f32 %v2104_v52, %v2144_v59  ;;  %4952 = vmatprep.subr.bf16.mxu0 %v6173_v60  ;;  %v6192_v9 = vsub.f32 %v286_v49, %v430_v62  ;;  %v297_v52 = vld [vmem:[%s6004_s27 + $0x98] sm:$0xff] }
  0x71   : > { %8880 = vst [vmem:[#allocation30_spill] sm:$0xff] %v6177_v63  ;;  %8881 = vst [vmem:[#allocation31_spill] sm:$0xff] %v6179_v0  ;;  %5140 = vmatprep.subr.bf16.mxu1 %v6177_v63  ;;  %v2107_v11 = vmul.f32 %v287_v35, %v287_v35  ;;  %v2109_v12 = vmul.f32 %v289_v40, %v289_v40  ;;  %v2106_v13 = vmul.f32 %v286_v49, %v286_v49  ;;  %v295_v49 = vld [vmem:[%s6004_s27 + $0x88] sm:$0xff] }
  0x72   : > { %8882 = vst [vmem:[#allocation32_spill] sm:$0xff] %v6181_v1  ;;  %8883 = vst [vmem:[#allocation33_spill] sm:$0xff] %v6183_v2  ;;  %v2108_v14 = vmul.f32 %v288_v58, %v288_v58  ;;  %5142 = vmatpush1.bf16.msra.mxu1 %v6187_v6  ;;  %v6197_v16 = vpack.c.bf16 %v434_v8, %v430_v62  ;;  %v6199_v21 = vsub.f32 %v288_v58, %v434_v8 }
  0x73   : > { %8884 = vst [vmem:[#allocation34_spill] sm:$0xff] %v6187_v6  ;;  %8885 = vst [vmem:[#allocation35_spill] sm:$0xff] %v6189_v7  ;;  %v436_v24 = vand.u32 4294901760, %v291_v3  ;;  %v440_v25 = vand.u32 4294901760, %v293_v5  ;;  %v2146_v26 = vand.u32 4294901760, %v2107_v11  ;;  %v2150_v27 = vand.u32 4294901760, %v2109_v12 }
  0x74   : > { %8886 = vst [vmem:[#allocation36_spill] sm:$0xff] %v6192_v9  ;;  %8887 = vst [vmem:[#allocation37_spill] sm:$0xff] %v6197_v16  ;;  %v2148_v28 = vand.u32 4294901760, %v2106_v13  ;;  %v2152_v29 = vand.u32 4294901760, %v2108_v14  ;;  %4954 = vmatpush1.bf16.msra.mxu0 %v6197_v16  ;;  %v438_v43 = vand.u32 4294901760, %v290_v15  ;;  %v442_v55 = vand.u32 4294901760, %v292_v30 }
  0x75   : > { %8888 = vst [vmem:[#allocation38_spill] sm:$0xff] %v6199_v21  ;;  %v6203_v34 = vpack.c.bf16 %v440_v25, %v436_v24  ;;  %v6205_v35 = vsub.f32 %v291_v3, %v436_v24  ;;  %v6207_v40 = vsub.f32 %v293_v5, %v440_v25  ;;  %v6209_v45 = vpack.c.bf16 %v2150_v27, %v2146_v26 }
  0x76   : > { %v6211_v46 = vsub.f32 %v2107_v11, %v2146_v26  ;;  %v6213_v47 = vsub.f32 %v2109_v12, %v2150_v27  ;;  %v6215_v48 = vpack.c.bf16 %v2152_v29, %v2148_v28  ;;  %v6219_v53 = vsub.f32 %v2106_v13, %v2148_v28  ;;  %v294_v11 = vld [vmem:[%s6004_s27 + $0x80] sm:$0xff] }
  0x77   : > { %8889 = vst [vmem:[#allocation39_spill] sm:$0xff] %v6203_v34  ;;  %8890 = vst [vmem:[#allocation40_spill] sm:$0xff] %v6205_v35  ;;  %v6221_v54 = vsub.f32 %v2108_v14, %v2152_v29  ;;  %4956 = vmatprep.subr.bf16.mxu0 %v6203_v34  ;;  %v6224_v56 = vsub.f32 %v290_v15, %v438_v43  ;;  %5144 = vmatprep.subr.bf16.mxu1 %v6209_v45  ;;  %v444_v14 = vand.u32 4294901760, %v295_v49  ;;  %v296_v29 = vld [vmem:[%s6004_s27 + $0x90] sm:$0xff]  ;;  %v299_v34 = vld [vmem:[%s6004_s27 + $0xa8] sm:$0xff] }
  0x78   : > { %8891 = vst [vmem:[#allocation41_spill] sm:$0xff] %v6207_v40  ;;  %8892 = vst [vmem:[#allocation42_spill] sm:$0xff] %v6209_v45  ;;  %v2111_v58 = vmul.f32 %v291_v3, %v291_v3  ;;  %v2113_v59 = vmul.f32 %v293_v5, %v293_v5  ;;  %v2110_v62 = vmul.f32 %v290_v15, %v290_v15  ;;  %5146 = vmatpush1.bf16.msra.mxu1 %v6215_v48  ;;  %v298_v45 = vld [vmem:[%s6004_s27 + $0xa0] sm:$0xff] }
  0x79   : > { %8893 = vst [vmem:[#allocation43_spill] sm:$0xff] %v6211_v46  ;;  %8894 = vst [vmem:[#allocation44_spill] sm:$0xff] %v6213_v47  ;;  %v2112_v8 = vmul.f32 %v292_v30, %v292_v30  ;;  %v6229_v12 = vpack.c.bf16 %v442_v55, %v438_v43  ;;  %v6231_v13 = vsub.f32 %v292_v30, %v442_v55  ;;  %v448_v24 = vand.u32 4294901760, %v297_v52 }
  0x7a   : > { %8895 = vst [vmem:[#allocation45_spill] sm:$0xff] %v6215_v48  ;;  %8896 = vst [vmem:[#allocation46_spill] sm:$0xff] %v6219_v53  ;;  %v2154_v25 = vand.u32 4294901760, %v2111_v58  ;;  %v2158_v26 = vand.u32 4294901760, %v2113_v59  ;;  %v2156_v27 = vand.u32 4294901760, %v2110_v62  ;;  %v6237_v5 = vsub.f32 %v295_v49, %v444_v14  ;;  %v301_v48 = vld [vmem:[%s6004_s27 + $0xb8] sm:$0xff] }
  0x7b   : > { %8897 = vst [vmem:[#allocation47_spill] sm:$0xff] %v6221_v54  ;;  %8898 = vst [vmem:[#allocation48_spill] sm:$0xff] %v6224_v56  ;;  %v2160_v28 = vand.u32 4294901760, %v2112_v8  ;;  %4958 = vmatpush1.bf16.msra.mxu0 %v6229_v12  ;;  %v6235_v3 = vpack.c.bf16 %v448_v24, %v444_v14  ;;  %v6239_v15 = vsub.f32 %v297_v52, %v448_v24  ;;  %v446_v43 = vand.u32 4294901760, %v294_v11 }
  0x7c   : > { %8899 = vst [vmem:[#allocation49_spill] sm:$0xff] %v6229_v12  ;;  %8900 = vst [vmem:[#allocation50_spill] sm:$0xff] %v6231_v13  ;;  %v6241_v30 = vpack.c.bf16 %v2158_v26, %v2154_v25  ;;  %v6243_v55 = vsub.f32 %v2111_v58, %v2154_v25  ;;  %v6245_v10 = vsub.f32 %v2113_v59, %v2158_v26  ;;  %v450_v14 = vand.u32 4294901760, %v296_v29 }
  0x7d   : > { %8901 = vst [vmem:[#allocation51_spill] sm:$0xff] %v6235_v3  ;;  %8902 = vst [vmem:[#allocation52_spill] sm:$0xff] %v6237_v5  ;;  %v6247_v4 = vpack.c.bf16 %v2160_v28, %v2156_v27  ;;  %v6251_v16 = vsub.f32 %v2110_v62, %v2156_v27  ;;  %v6253_v12 = vsub.f32 %v2112_v8, %v2160_v28  ;;  %4960 = vmatprep.subr.bf16.mxu0 %v6235_v3 }
  0x7e   : > { %8903 = vst [vmem:[#allocation53_spill] sm:$0xff] %v6239_v15  ;;  %8904 = vst [vmem:[#allocation54_spill] sm:$0xff] %v6241_v30  ;;  %v6256_v24 = vsub.f32 %v294_v11, %v446_v43  ;;  %5148 = vmatprep.subr.bf16.mxu1 %v6241_v30  ;;  %v2115_v58 = vmul.f32 %v295_v49, %v295_v49  ;;  %v2117_v25 = vmul.f32 %v297_v52, %v297_v52  ;;  %v300_v30 = vld [vmem:[%s6004_s27 + $0xb0] sm:$0xff] }
  0x7f   : > { %8905 = vst [vmem:[#allocation55_spill] sm:$0xff] %v6243_v55  ;;  %8906 = vst [vmem:[#allocation56_spill] sm:$0xff] %v6245_v10  ;;  %v2114_v59 = vmul.f32 %v294_v11, %v294_v11  ;;  %v2116_v26 = vmul.f32 %v296_v29, %v296_v29  ;;  %5150 = vmatpush1.bf16.msra.mxu1 %v6247_v4  ;;  %v6261_v60 = vpack.c.bf16 %v450_v14, %v446_v43 }
  0x80   : > { %8907 = vst [vmem:[#allocation57_spill] sm:$0xff] %v6247_v4  ;;  %8908 = vst [vmem:[#allocation58_spill] sm:$0xff] %v6251_v16  ;;  %v6263_v62 = vsub.f32 %v296_v29, %v450_v14  ;;  %v452_v8 = vand.u32 4294901760, %v299_v34  ;;  %v456_v27 = vand.u32 4294901760, %v301_v48  ;;  %v2162_v28 = vand.u32 4294901760, %v2115_v58 }
  0x81   : > { %8909 = vst [vmem:[#allocation59_spill] sm:$0xff] %v6253_v12  ;;  %8910 = vst [vmem:[#allocation60_spill] sm:$0xff] %v6261_v60  ;;  %v2166_v3 = vand.u32 4294901760, %v2117_v25  ;;  %v2164_v6 = vand.u32 4294901760, %v2114_v59  ;;  %v2168_v50 = vand.u32 4294901760, %v2116_v26  ;;  %4962 = vmatpush1.bf16.msra.mxu0 %v6261_v60  ;;  %v454_v43 = vand.u32 4294901760, %v298_v45 }
  0x82   : > { %v6267_v49 = vpack.c.bf16 %v456_v27, %v452_v8  ;;  %v6269_v52 = vsub.f32 %v299_v34, %v452_v8  ;;  %v6271_v11 = vsub.f32 %v301_v48, %v456_v27  ;;  %v6275_v14 = vsub.f32 %v2115_v58, %v2162_v28 }
  0x83   : > { %v6273_v29 = vpack.c.bf16 %v2166_v3, %v2162_v28  ;;  %v6277_v4 = vsub.f32 %v2117_v25, %v2166_v3  ;;  %v6279_v63 = vpack.c.bf16 %v2168_v50, %v2164_v6  ;;  %v6283_v22 = vsub.f32 %v2114_v59, %v2164_v6 }
  0x84   : > { %8911 = vst [vmem:[#allocation61_spill] sm:$0xff] %v6267_v49  ;;  %8912 = vst [vmem:[#allocation62_spill] sm:$0xff] %v6269_v52  ;;  %v6285_v60 = vsub.f32 %v2116_v26, %v2168_v50  ;;  %4964 = vmatprep.subr.bf16.mxu0 %v6267_v49  ;;  %v458_v8 = vand.u32 4294901760, %v300_v30  ;;  %v6288_v27 = vsub.f32 %v298_v45, %v454_v43  ;;  %v460_v50 = vand.u32 4294901760, %v303_v39  ;;  %v307_v52 = vld [vmem:[%s6004_s27 + $0xe8] sm:$0xff] }
  0x85   : > { %8913 = vst [vmem:[#allocation63_spill] sm:$0xff] %v6271_v11  ;;  %8914 = vst [vmem:[#allocation64_spill] sm:$0xff] %v6273_v29  ;;  %5152 = vmatprep.subr.bf16.mxu1 %v6273_v29  ;;  %v2119_v58 = vmul.f32 %v299_v34, %v299_v34  ;;  %v2121_v28 = vmul.f32 %v301_v48, %v301_v48  ;;  %v2118_v3 = vmul.f32 %v298_v45, %v298_v45  ;;  %v304_v29 = vld [vmem:[%s6004_s27 + $0xd0] sm:$0xff] }
  0x86   : > { %8915 = vst [vmem:[#allocation65_spill] sm:$0xff] %v6275_v14  ;;  %8916 = vst [vmem:[#allocation66_spill] sm:$0xff] %v6277_v4  ;;  %v2120_v25 = vmul.f32 %v300_v30, %v300_v30  ;;  %5154 = vmatpush1.bf16.msra.mxu1 %v6279_v63  ;;  %v6293_v17 = vpack.c.bf16 %v458_v8, %v454_v43  ;;  %v6295_v6 = vsub.f32 %v300_v30, %v458_v8 }
  0x87   : > { %8917 = vst [vmem:[#allocation67_spill] sm:$0xff] %v6279_v63  ;;  %8918 = vst [vmem:[#allocation68_spill] sm:$0xff] %v6283_v22  ;;  %v464_v59 = vand.u32 4294901760, %v305_v36  ;;  %v2170_v26 = vand.u32 4294901760, %v2119_v58  ;;  %v2174_v49 = vand.u32 4294901760, %v2121_v28  ;;  %v6301_v45 = vsub.f32 %v303_v39, %v460_v50 }
  0x88   : > { %8919 = vst [vmem:[#allocation69_spill] sm:$0xff] %v6285_v60  ;;  %8920 = vst [vmem:[#allocation70_spill] sm:$0xff] %v6288_v27  ;;  %v2172_v27 = vand.u32 4294901760, %v2118_v3  ;;  %v2176_v11 = vand.u32 4294901760, %v2120_v25  ;;  %4966 = vmatpush1.bf16.msra.mxu0 %v6293_v17  ;;  %v462_v43 = vand.u32 4294901760, %v302_v31  ;;  %v309_v60 = vld [vmem:[%s6004_s27 + $0xf8] sm:$0xff] }
  0x89   : > { %8921 = vst [vmem:[#allocation71_spill] sm:$0xff] %v6293_v17  ;;  %8922 = vst [vmem:[#allocation72_spill] sm:$0xff] %v6295_v6  ;;  %v6299_v34 = vpack.c.bf16 %v464_v59, %v460_v50  ;;  %v6303_v48 = vsub.f32 %v305_v36, %v464_v59  ;;  %v6305_v30 = vpack.c.bf16 %v2174_v49, %v2170_v26  ;;  %v466_v50 = vand.u32 4294901760, %v304_v29 }
  0x8a   : > { %8924 = vst [vmem:[#allocation74_spill] sm:$0xff] %v6301_v45  ;;  %v6307_v8 = vsub.f32 %v2119_v58, %v2170_v26  ;;  %v6309_v63 = vsub.f32 %v2121_v28, %v2174_v49  ;;  %v6311_v6 = vpack.c.bf16 %v2176_v11, %v2172_v27  ;;  %v6315_v22 = vsub.f32 %v2118_v3, %v2172_v27 }
  0x8b   : > { %8923 = vst [vmem:[#allocation73_spill] sm:$0xff] %v6299_v34  ;;  %8925 = vst [vmem:[#allocation75_spill] sm:$0xff] %v6303_v48  ;;  %v6317_v17 = vsub.f32 %v2120_v25, %v2176_v11  ;;  %4968 = vmatprep.subr.bf16.mxu0 %v6299_v34  ;;  %v6320_v59 = vsub.f32 %v302_v31, %v462_v43  ;;  %5156 = vmatprep.subr.bf16.mxu1 %v6305_v30  ;;  %v306_v48 = vld [vmem:[%s6004_s27 + $0xe0] sm:$0xff]  ;;  %v468_v11 = vand.u32 4294901760, %v307_v52 }
  0x8c   : > { %8926 = vst [vmem:[#allocation76_spill] sm:$0xff] %v6305_v30  ;;  %8927 = vst [vmem:[#allocation77_spill] sm:$0xff] %v6307_v8  ;;  %v2123_v58 = vmul.f32 %v303_v39, %v303_v39  ;;  %v2125_v26 = vmul.f32 %v305_v36, %v305_v36  ;;  %v2122_v49 = vmul.f32 %v302_v31, %v302_v31  ;;  %5158 = vmatpush1.bf16.msra.mxu1 %v6311_v6 }
  0x8d   : > { %8928 = vst [vmem:[#allocation78_spill] sm:$0xff] %v6309_v63  ;;  %8929 = vst [vmem:[#allocation79_spill] sm:$0xff] %v6311_v6  ;;  %v2124_v28 = vmul.f32 %v304_v29, %v304_v29  ;;  %v6325_v45 = vpack.c.bf16 %v466_v50, %v462_v43  ;;  %v6327_v27 = vsub.f32 %v304_v29, %v466_v50  ;;  %v472_v3 = vand.u32 4294901760, %v309_v60 }
  0x8e   : > { %8930 = vst [vmem:[#allocation80_spill] sm:$0xff] %v6315_v22  ;;  %8931 = vst [vmem:[#allocation81_spill] sm:$0xff] %v6317_v17  ;;  %v2178_v25 = vand.u32 4294901760, %v2123_v58  ;;  %v2182_v34 = vand.u32 4294901760, %v2125_v26  ;;  %v2180_v17 = vand.u32 4294901760, %v2122_v49  ;;  %v308_v22 = vld [vmem:[%s6004_s27 + $0xf0] sm:$0xff]  ;;  %v6333_v31 = vsub.f32 %v307_v52, %v468_v11 }
  0x8f   : > { %8932 = vst [vmem:[#allocation82_spill] sm:$0xff] %v6320_v59  ;;  %8933 = vst [vmem:[#allocation83_spill] sm:$0xff] %v6325_v45  ;;  %v2184_v59 = vand.u32 4294901760, %v2124_v28  ;;  %4970 = vmatpush1.bf16.msra.mxu0 %v6325_v45  ;;  %v6331_v39 = vpack.c.bf16 %v472_v3, %v468_v11  ;;  %v6335_v36 = vsub.f32 %v309_v60, %v472_v3  ;;  %v470_v43 = vand.u32 4294901760, %v306_v48 }
  0x90   : > { %8934 = vst [vmem:[#allocation84_spill] sm:$0xff] %v6327_v27  ;;  %8936 = vst [vmem:[#allocation86_spill] sm:$0xff] %v6333_v31  ;;  %v6337_v6 = vpack.c.bf16 %v2182_v34, %v2178_v25  ;;  %v6339_v29 = vsub.f32 %v2123_v58, %v2178_v25  ;;  %v6341_v50 = vsub.f32 %v2125_v26, %v2182_v34  ;;  %v474_v11 = vand.u32 4294901760, %v308_v22  ;;  %v6358_v34 = vld [vmem:[%s192_s30] ss:$0 sm:$0xff] }
  0x91   : > { %8935 = vst [vmem:[#allocation85_spill] sm:$0xff] %v6331_v39  ;;  %8937 = vst [vmem:[#allocation87_spill] sm:$0xff] %v6335_v36  ;;  %v6343_v30 = vpack.c.bf16 %v2184_v59, %v2180_v17  ;;  %v6345_v27 = vsub.f32 %v2122_v49, %v2180_v17  ;;  %v6347_v63 = vsub.f32 %v2124_v28, %v2184_v59  ;;  %4972 = vmatprep.subr.bf16.mxu0 %v6331_v39  ;;  %v8944_v26 = vlaneseq }
  0x92   : > { %8938 = vst [vmem:[#allocation88_spill] sm:$0xff] %v6337_v6  ;;  %v6350_v45 = vsub.f32 %v306_v48, %v470_v43  ;;  %5160 = vmatprep.subr.bf16.mxu1 %v6337_v6  ;;  %v2127_v3 = vmul.f32 %v307_v52, %v307_v52  ;;  %v2129_v36 = vmul.f32 %v309_v60, %v309_v60  ;;  %v8620_v52 = vand.u32 4294901760, %v6125_v18 }
  0x93   : > { %8939 = vst [vmem:[#allocation89_spill] sm:$0xff] %v6343_v30  ;;  %8940 = vst [vmem:[#allocation90_spill] sm:$0xff] %v6347_v63  ;;  %v2126_v31 = vmul.f32 %v306_v48, %v306_v48  ;;  %v2128_v58 = vmul.f32 %v308_v22, %v308_v22  ;;  %5162 = vmatpush1.bf16.msra.mxu1 %v6343_v30  ;;  %v6361_v17 = vpack.c.bf16 %v474_v11, %v470_v43  ;;  %v8945_v39 = vmov 0 }
  0x94   : > { %8941 = vst [vmem:[#allocation91_spill] sm:$0xff] %v6350_v45  ;;  %v6363_v59 = vsub.f32 %v308_v22, %v474_v11  ;;  %v6366_v49 = vshrl.u32 %v8944_v26, 7  ;;  %v2186_v60 = vand.u32 4294901760, %v2127_v3  ;;  %v2190_v48 = vand.u32 4294901760, %v2129_v36 }
  0x95   : > { %8942 = vst [vmem:[#allocation92_spill] sm:$0xff] %v6361_v17  ;;  %v2188_v28 = vand.u32 4294901760, %v2126_v31  ;;  %v2192_v25 = vand.u32 4294901760, %v2128_v58  ;;  %4974 = vmatpush1.bf16.msra.mxu0 %v6361_v17  ;;  %v688_v22 = vsub.f32 %v6125_v18, %v8620_v52  ;;  %v8623_v43 = vand.u32 4294901760, %v6127_v19 }
  0x96   : > { %8943 = vst [vmem:[#allocation93_spill] sm:$0xff] %v6363_v59  ;;  %vm6372_vm1 = vcmp.eq.s32.totalorder %v6358_v34, %v6366_v49  ;;  %v6381_v26 = vpack.c.bf16 %v2190_v48, %v2186_v60  ;;  %v6383_v30 = vsub.f32 %v2127_v3, %v2186_v60  ;;  %v6385_v6 = vsub.f32 %v2129_v36, %v2190_v48 }
  0x97   : > { %v8946_v39 = vsel %vm6372_vm1, 4294967295, %v8945_v39  ;;  %v6387_v17 = vpack.c.bf16 %v2192_v25, %v2188_v28  ;;  %v6389_v59 = vsub.f32 %v2126_v31, %v2188_v28  ;;  %v6391_v45 = vsub.f32 %v2128_v58, %v2192_v25 }
  0x98   : > { %8947 = vst [vmem:[#allocation94_spill] sm:$0xff] %v8946_v39  ;;  %8948 = vst [vmem:[#allocation95_spill] sm:$0xff] %v6381_v26  ;;  %v8952_v63 = vmov 0.0   ;;  %v689_v18 = vand.u32 4294901760, %v688_v22  ;;  %5164 = vmatprep.subr.bf16.mxu1 %v6381_v26  ;;  %v700_v36 = vsub.f32 %v6127_v19, %v8623_v43  ;;  %v8954_v3 = vand.u32 4294901760, %v6141_v32 }
  0x99   : > { %8949 = vst [vmem:[#allocation96_spill] sm:$0xff] %v6385_v6  ;;  %8950 = vst [vmem:[#allocation97_spill] sm:$0xff] %v6387_v17  ;;  %v4810_v52 = vsel %vm6372_vm1, 1.0, %v8952_v63  ;;  %v8630_v58 = vand.u32 4294901760, %v6143_v33  ;;  %5166 = vmatpush1.bf16.msra.mxu1 %v6387_v17  ;;  %v8635_v60 = vand.u32 4294901760, %v6129_v20  ;;  %v8641_v48 = vand.u32 4294901760, %v6134_v23 }
  0x9a   : > { %8951 = vst [vmem:[#allocation98_spill] sm:$0xff] %v6391_v45  ;;  %v6397_v11 = vsub.f32 %v4810_v52, %v4810_v52  ;;  %v2406_v31 = vsub.f32 %v6141_v32, %v8954_v3  ;;  %3800 = vadd.xlane.f32.xlu0 %v4810_v52  ;;  %v8644_v28 = vand.u32 4294901760, %v6148_v37  ;;  %v701_v43 = vand.u32 4294901760, %v700_v36 }
  0x9b   : > { %v2418_v3 = vsub.f32 %v6143_v33, %v8630_v58  ;;  %v694_v52 = vsub.f32 %v6129_v20, %v8635_v60  ;;  %v706_v17 = vsub.f32 %v6134_v23, %v8641_v48  ;;  %v8956_v39 = vand.u32 4294901760, %v6150_v38 }
  0x9c   : > { %8953 = vst [vmem:[#allocation99_spill] sm:$0xff] %v6397_v11  ;;  %v6412_v22 = vand.u32 4294901760, %v6397_v11  ;;  %v2407_v26 = vand.u32 4294901760, %v2406_v31  ;;  %v2412_v25 = vsub.f32 %v6148_v37, %v8644_v28  ;;  %v4975_v58 = vpack.c.bf16 %v701_v43, %v689_v18 }
  0x9d   : > { %v2424_v36 = vsub.f32 %v6150_v38, %v8956_v39  ;;  %v2419_v33 = vand.u32 4294901760, %v2418_v3  ;;  %v313_v32 = vadd.s32 8, %v6366_v49  ;;  %v695_v60 = vand.u32 4294901760, %v694_v52 }
  0x9e   : > { %8955 = vst [vmem:[#allocation100_spill] sm:$0xff] %v6412_v22  ;;  %v512_v31 = vsub.f32 %v6397_v11, %v6412_v22  ;;  %v707_v20 = vand.u32 4294901760, %v706_v17  ;;  %v2413_v19 = vand.u32 4294901760, %v2412_v25  ;;  %4976 = vmatprep.subr.bf16.mxu0 %v4975_v58  ;;  %v8957_v28 = vmov 0 }
  0x9f   : > { %v2425_v45 = vand.u32 4294901760, %v2424_v36  ;;  %v5167_v23 = vpack.c.bf16 %v2419_v33, %v2407_v26  ;;  %vm6433_vm2 = vcmp.eq.s32.totalorder %v6358_v34, %v313_v32  ;;  %v314_v39 = vadd.s32 16, %v6366_v49 }
  0xa0   : > { %v513_v48 = vand.u32 4294901760, %v512_v31  ;;  %v8958_v28 = vsel %vm6433_vm2, 4294967295, %v8957_v28  ;;  %v4977_v38 = vpack.c.bf16 %v707_v20, %v695_v60  ;;  %v4811_v18 = vsel %vm6433_vm2, 1.0, %v8952_v63 }
  0xa1   : > { %8959 = vst [vmem:[#allocation101_spill] sm:$0xff] %v8958_v28  ;;  %v5169_v22 = vpack.c.bf16 %v2425_v45, %v2413_v19  ;;  %v8653_v17 = vand.u32 4294901760, %v6156_v41  ;;  %v6442_v43 = vsub.f32 %v4811_v18, %v4811_v18  ;;  %vm6445_vm3 = vcmp.eq.s32.totalorder %v6358_v34, %v314_v39  ;;  %5168 = vmatprep.subr.bf16.mxu1 %v5167_v23 }
  0xa2   : > { %514 = vmatmul.mubr.f32.vlgmr.msra.gmra.mrb[0].mxu0 %v513_v48  ;;  %2232 = vmatmul.mubr.f32.vlgmr.msra.gmra.mrb[0].mxu1 %v513_v48  ;;  %v8961_v32 = vmov 0  ;;  %v8650_v33 = vand.u32 4294901760, %v6158_v42  ;;  %v8649_v20 = vand.u32 4294901760, %v6179_v0  ;;  %v4812_v19 = vsel %vm6445_vm3, 1.0, %v8952_v63 }
  0xa3   : > { %8960 = vst [vmem:[#allocation102_spill] sm:$0xff] %v6442_v43  ;;  %v8962_v32 = vsel %vm6445_vm3, 4294967295, %v8961_v32  ;;  %519 = vmatprep.mubr.f32.mxu0 %v8952_v63  ;;  %v712_v45 = vsub.f32 %v6156_v41, %v8653_v17  ;;  %v8651_v26 = vand.u32 4294901760, %v6181_v1  ;;  %v8652_v58 = vand.u32 4294901760, %v6160_v44  ;;  %4978 = vmatpush1.bf16.msra.mxu0 %v4977_v38 }
  0xa4   : > { %8963 = vst [vmem:[#allocation103_spill] sm:$0xff] %v8962_v32  ;;  %5170 = vmatpush1.bf16.msra.mxu1 %v5169_v22  ;;  %v6461_v60 = vand.u32 4294901760, %v6442_v43  ;;  %v6463_v23 = vsub.f32 %v4812_v19, %v4812_v19  ;;  %v724_v48 = vsub.f32 %v6158_v42, %v8650_v33  ;;  %v2430_v25 = vsub.f32 %v6179_v0, %v8649_v20 }
  0xa5   : > { %2237 = vmatprep.mubr.f32.mxu1 %v8952_v63  ;;  %v713_v3 = vand.u32 4294901760, %v712_v45  ;;  %v2442_v38 = vsub.f32 %v6181_v1, %v8651_v26  ;;  %v718_v22 = vsub.f32 %v6160_v44, %v8652_v58  ;;  %v8667_v52 = vand.u32 4294901760, %v6167_v51  ;;  %3804 = vadd.xlane.f32.xlu1 %v4812_v19  ;;  %v9030_v44 = vld [vmem:[#allocation90_spill] sm:$0xff] }
  0xa6   : > { %8964 = vst [vmem:[#allocation104_spill] sm:$0xff] %v6461_v60  ;;  %8965 = vst [vmem:[#allocation105_spill] sm:$0xff] %v6463_v23  ;;  %v523_v36 = vsub.f32 %v6442_v43, %v6461_v60  ;;  %v6482_v31 = vand.u32 4294901760, %v6463_v23  ;;  %v725_v39 = vand.u32 4294901760, %v724_v48  ;;  %v2431_v20 = vand.u32 4294901760, %v2430_v25  ;;  %3802 = vadd.xlane.f32.xlu0 %v4811_v18 }
  0xa7   : > { %v2443_v45 = vand.u32 4294901760, %v2442_v38  ;;  %v719_v33 = vand.u32 4294901760, %v718_v22  ;;  %v730_v26 = vsub.f32 %v6167_v51, %v8667_v52  ;;  %v8665_v58 = vand.u32 4294901760, %v6183_v2 }
  0xa8   : > { %8966 = vst [vmem:[#allocation106_spill] sm:$0xff] %v6482_v31  ;;  %v524_v17 = vand.u32 4294901760, %v523_v36  ;;  %v534_v19 = vsub.f32 %v6463_v23, %v6482_v31  ;;  %v4979_v11 = vpack.c.bf16 %v725_v39, %v713_v3  ;;  %v8663_v60 = vand.u32 4294901760, %v6189_v7 }
  0xa9   : > { %v5171_v43 = vpack.c.bf16 %v2443_v45, %v2431_v20  ;;  %v731_v32 = vand.u32 4294901760, %v730_v26  ;;  %v2436_v18 = vsub.f32 %v6183_v2, %v8665_v58  ;;  %v315_v48 = vadd.s32 24, %v6366_v49 }
  0xaa   : > { %525 = vmatmul.mubr.f32.gmra.mrb[2].mxu0 %v524_v17  ;;  %2243 = vmatmul.mubr.f32.gmra.mrb[2].mxu1 %v524_v17  ;;  %v535_v25 = vand.u32 4294901760, %v534_v19  ;;  %v2448_v38 = vsub.f32 %v6189_v7, %v8663_v60  ;;  %v316_v22 = vadd.s32 32, %v6366_v49  ;;  %v8662_v3 = vand.u32 4294901760, %v6169_v57 }
  0xab   : > { %530 = vmatprep.mubr.f32.mxu0 %v8952_v63  ;;  %2248 = vmatprep.mubr.f32.mxu1 %v8952_v63  ;;  %v4981_v20 = vpack.c.bf16 %v731_v32, %v719_v33  ;;  %v2437_v26 = vand.u32 4294901760, %v2436_v18  ;;  %vm6503_vm4 = vcmp.eq.s32.totalorder %v6358_v34, %v315_v48  ;;  %v8967_v36 = vmov 0 }
  0xac   : > { %v8968_v36 = vsel %vm6503_vm4, 4294967295, %v8967_v36  ;;  %v8664_v17 = vand.u32 4294901760, %v6175_v61  ;;  %4980 = vmatprep.subr.bf16.mxu0 %v4979_v11  ;;  %5172 = vmatprep.subr.bf16.mxu1 %v5171_v43  ;;  %v2449_v39 = vand.u32 4294901760, %v2448_v38  ;;  %v4813_v45 = vsel %vm6503_vm4, 1.0, %v8952_v63 }
  0xad   : > { %8969 = vst [vmem:[#allocation107_spill] sm:$0xff] %v8968_v36  ;;  %vm6512_vm5 = vcmp.eq.s32.totalorder %v6358_v34, %v316_v22  ;;  %v8970_v19 = vmov 0  ;;  %v736_v32 = vsub.f32 %v6169_v57, %v8662_v3  ;;  %4982 = vmatpush1.bf16.msra.mxu0 %v4981_v20  ;;  %v6519_v33 = vsub.f32 %v4813_v45, %v4813_v45 }
  0xae   : > { %v8971_v19 = vsel %vm6512_vm5, 4294967295, %v8970_v19  ;;  %v4814_v11 = vsel %vm6512_vm5, 1.0, %v8952_v63  ;;  %v748_v43 = vsub.f32 %v6175_v61, %v8664_v17  ;;  %v8666_v18 = vand.u32 4294901760, %v6211_v46  ;;  %3806 = vadd.xlane.f32.xlu1 %v4813_v45  ;;  %536 = vmatmul.mubr.f32.gmra.mrb[4].mxu0 %v535_v25 }
  0xaf   : > { %8972 = vst [vmem:[#allocation108_spill] sm:$0xff] %v8971_v19  ;;  %8973 = vst [vmem:[#allocation109_spill] sm:$0xff] %v6519_v33  ;;  %2254 = vmatmul.mubr.f32.gmra.mrb[4].mxu1 %v535_v25  ;;  %v5173_v48 = vpack.c.bf16 %v2449_v39, %v2437_v26  ;;  %v6528_v38 = vsub.f32 %v4814_v11, %v4814_v11  ;;  %v737_v22 = vand.u32 4294901760, %v736_v32  ;;  %v8670_v20 = vand.u32 4294901760, %v6213_v47 }
  0xb0   : > { %541 = vmatprep.mubr.f32.mxu0 %v8952_v63  ;;  %v6533_v3 = vand.u32 4294901760, %v6519_v33  ;;  %2259 = vmatprep.mubr.f32.mxu1 %v8952_v63  ;;  %v749_v60 = vand.u32 4294901760, %v748_v43  ;;  %v2454_v45 = vsub.f32 %v6211_v46, %v8666_v18  ;;  %v8673_v25 = vand.u32 4294901760, %v6192_v9 }
  0xb1   : > { %8974 = vst [vmem:[#allocation110_spill] sm:$0xff] %v6528_v38  ;;  %5174 = vmatpush1.bf16.msra.mxu1 %v5173_v48  ;;  %v6541_v26 = vand.u32 4294901760, %v6528_v38  ;;  %v2466_v39 = vsub.f32 %v6213_v47, %v8670_v20  ;;  %v8685_v32 = vand.u32 4294901760, %v6199_v21  ;;  %v8680_v17 = vand.u32 4294901760, %v6219_v53  ;;  %3808 = vadd.xlane.f32.xlu0 %v4814_v11  ;;  %v9014_v47 = vld [vmem:[#allocation80_spill] sm:$0xff] }
  0xb2   : > { %8975 = vst [vmem:[#allocation111_spill] sm:$0xff] %v6533_v3  ;;  %v545_v43 = vsub.f32 %v6519_v33, %v6533_v3  ;;  %v4983_v58 = vpack.c.bf16 %v749_v60, %v737_v22  ;;  %v2455_v18 = vand.u32 4294901760, %v2454_v45  ;;  %v742_v48 = vsub.f32 %v6192_v9, %v8673_v25 }
  0xb3   : > { %8976 = vst [vmem:[#allocation112_spill] sm:$0xff] %v6541_v26  ;;  %v556_v52 = vsub.f32 %v6528_v38, %v6541_v26  ;;  %v2467_v31 = vand.u32 4294901760, %v2466_v39  ;;  %v754_v20 = vsub.f32 %v6199_v21, %v8685_v32  ;;  %v2460_v11 = vsub.f32 %v6219_v53, %v8680_v17 }
  0xb4   : > { %v546_v23 = vand.u32 4294901760, %v545_v43  ;;  %4984 = vmatprep.subr.bf16.mxu0 %v4983_v58  ;;  %v743_v60 = vand.u32 4294901760, %v742_v48  ;;  %v8683_v22 = vand.u32 4294901760, %v6221_v54  ;;  %v317_v45 = vadd.s32 40, %v6366_v49 }
  0xb5   : > { %v557_v25 = vand.u32 4294901760, %v556_v52  ;;  %v5175_v3 = vpack.c.bf16 %v2467_v31, %v2455_v18  ;;  %v755_v33 = vand.u32 4294901760, %v754_v20  ;;  %v2461_v26 = vand.u32 4294901760, %v2460_v11 }
  0xb6   : > { %547 = vmatmul.mubr.f32.gmra.mrb[6].mxu0 %v546_v23  ;;  %2265 = vmatmul.mubr.f32.gmra.mrb[6].mxu1 %v546_v23  ;;  %v2472_v39 = vsub.f32 %v6221_v54, %v8683_v22  ;;  %vm6567_vm6 = vcmp.eq.s32.totalorder %v6358_v34, %v317_v45  ;;  %v8977_v17 = vmov 0  ;;  %v318_v58 = vadd.s32 48, %v6366_v49 }
  0xb7   : > { %v8978_v17 = vsel %vm6567_vm6, 4294967295, %v8977_v17  ;;  %v8681_v43 = vand.u32 4294901760, %v6205_v35  ;;  %552 = vmatprep.mubr.f32.mxu0 %v8952_v63  ;;  %2270 = vmatprep.mubr.f32.mxu1 %v8952_v63  ;;  %v4985_v52 = vpack.c.bf16 %v755_v33, %v743_v60  ;;  %v4815_v23 = vsel %vm6567_vm6, 1.0, %v8952_v63 }
  0xb8   : > { %8979 = vst [vmem:[#allocation113_spill] sm:$0xff] %v8978_v17  ;;  %v8682_v31 = vand.u32 4294901760, %v6207_v40  ;;  %v8684_v18 = vand.u32 4294901760, %v6243_v55  ;;  %5176 = vmatprep.subr.bf16.mxu1 %v5175_v3  ;;  %v2473_v20 = vand.u32 4294901760, %v2472_v39  ;;  %v6580_v48 = vsub.f32 %v4815_v23, %v4815_v23  ;;  %3810 = vadd.xlane.f32.xlu1 %v4815_v23 }
  0xb9   : > { %vm6583_vm7 = vcmp.eq.s32.totalorder %v6358_v34, %v318_v58  ;;  %v8981_v11 = vmov 0  ;;  %v760_v33 = vsub.f32 %v6205_v35, %v8681_v43  ;;  %4986 = vmatpush1.bf16.msra.mxu0 %v4985_v52  ;;  %v8686_v39 = vand.u32 4294901760, %v6245_v10 }
  0xba   : > { %8980 = vst [vmem:[#allocation114_spill] sm:$0xff] %v6580_v48  ;;  %v8982_v11 = vsel %vm6583_vm7, 4294967295, %v8981_v11  ;;  %v4816_v60 = vsel %vm6583_vm7, 1.0, %v8952_v63  ;;  %v772_v3 = vsub.f32 %v6207_v40, %v8682_v31  ;;  %v2478_v45 = vsub.f32 %v6243_v55, %v8684_v18  ;;  %558 = vmatmul.mubr.f32.gmra.mrb[8].mxu0 %v557_v25  ;;  %2276 = vmatmul.mubr.f32.gmra.mrb[8].mxu1 %v557_v25 }
  0xbb   : > { %8983 = vst [vmem:[#allocation115_spill] sm:$0xff] %v8982_v11  ;;  %v5177_v58 = vpack.c.bf16 %v2473_v20, %v2461_v26  ;;  %v6601_v23 = vand.u32 4294901760, %v6580_v48  ;;  %v6603_v52 = vsub.f32 %v4816_v60, %v4816_v60  ;;  %v761_v43 = vand.u32 4294901760, %v760_v33  ;;  %563 = vmatprep.mubr.f32.mxu0 %v8952_v63  ;;  %2281 = vmatprep.mubr.f32.mxu1 %v8952_v63 }
  0xbc   : > { %v773_v31 = vand.u32 4294901760, %v772_v3  ;;  %v2479_v22 = vand.u32 4294901760, %v2478_v45  ;;  %v2490_v18 = vsub.f32 %v6245_v10, %v8686_v39  ;;  %v8693_v32 = vand.u32 4294901760, %v6224_v56  ;;  %3812 = vadd.xlane.f32.xlu0 %v4816_v60 }
  0xbd   : > { %8984 = vst [vmem:[#allocation116_spill] sm:$0xff] %v6601_v23  ;;  %8985 = vst [vmem:[#allocation117_spill] sm:$0xff] %v6603_v52  ;;  %5178 = vmatpush1.bf16.msra.mxu1 %v5177_v58  ;;  %v567_v25 = vsub.f32 %v6580_v48, %v6601_v23  ;;  %v6614_v26 = vand.u32 4294901760, %v6603_v52  ;;  %v8698_v20 = vand.u32 4294901760, %v6231_v13  ;;  %v8703_v33 = vand.u32 4294901760, %v6251_v16 }
  0xbe   : > { %v4987_v3 = vpack.c.bf16 %v773_v31, %v761_v43  ;;  %v2491_v45 = vand.u32 4294901760, %v2490_v18  ;;  %v766_v39 = vsub.f32 %v6224_v56, %v8693_v32  ;;  %v8699_v38 = vand.u32 4294901760, %v6253_v12 }
  0xbf   : > { %8986 = vst [vmem:[#allocation118_spill] sm:$0xff] %v6614_v26  ;;  %v568_v58 = vand.u32 4294901760, %v567_v25  ;;  %v578_v23 = vsub.f32 %v6603_v52, %v6614_v26  ;;  %v778_v48 = vsub.f32 %v6231_v13, %v8698_v20  ;;  %v2484_v60 = vsub.f32 %v6251_v16, %v8703_v33 }
  0xc0   : > { %4988 = vmatprep.subr.bf16.mxu0 %v4987_v3  ;;  %v5179_v43 = vpack.c.bf16 %v2491_v45, %v2479_v22  ;;  %v767_v31 = vand.u32 4294901760, %v766_v39  ;;  %v2496_v18 = vsub.f32 %v6253_v12, %v8699_v38  ;;  %v319_v25 = vadd.s32 56, %v6366_v49 }
  0xc1   : > { %569 = vmatmul.mubr.f32.gmra.mrb[10].mxu0 %v568_v58  ;;  %2287 = vmatmul.mubr.f32.gmra.mrb[10].mxu1 %v568_v58  ;;  %v579_v32 = vand.u32 4294901760, %v578_v23  ;;  %v779_v26 = vand.u32 4294901760, %v778_v48  ;;  %v2485_v52 = vand.u32 4294901760, %v2484_v60  ;;  %v320_v20 = vadd.s32 64, %v6366_v49 }
  0xc2   : > { %574 = vmatprep.mubr.f32.mxu0 %v8952_v63  ;;  %2292 = vmatprep.mubr.f32.mxu1 %v8952_v63  ;;  %v2497_v3 = vand.u32 4294901760, %v2496_v18  ;;  %vm6638_vm8 = vcmp.eq.s32.totalorder %v6358_v34, %v319_v25  ;;  %v8987_v22 = vmov 0  ;;  %v8700_v39 = vand.u32 4294901760, %v6237_v5 }
  0xc3   : > { %v8988_v22 = vsel %vm6638_vm8, 4294967295, %v8987_v22  ;;  %v8701_v45 = vand.u32 4294901760, %v6239_v15  ;;  %5180 = vmatprep.subr.bf16.mxu1 %v5179_v43  ;;  %v4989_v23 = vpack.c.bf16 %v779_v26, %v767_v31  ;;  %v4817_v48 = vsel %vm6638_vm8, 1.0, %v8952_v63 }
  0xc4   : > { %8989 = vst [vmem:[#allocation119_spill] sm:$0xff] %v8988_v22  ;;  %vm6648_vm9 = vcmp.eq.s32.totalorder %v6358_v34, %v320_v20  ;;  %v8990_v58 = vmov 0  ;;  %v8702_v60 = vand.u32 4294901760, %v6275_v14  ;;  %v5181_v18 = vpack.c.bf16 %v2497_v3, %v2485_v52  ;;  %3814 = vadd.xlane.f32.xlu1 %v4817_v48  ;;  %v8997_v22 = vld [vmem:[#allocation68_spill] sm:$0xff] }
  0xc5   : > { %v8991_v58 = vsel %vm6648_vm9, 4294967295, %v8990_v58  ;;  %v6653_v25 = vsub.f32 %v4817_v48, %v4817_v48  ;;  %v4818_v38 = vsel %vm6648_vm9, 1.0, %v8952_v63  ;;  %v784_v26 = vsub.f32 %v6237_v5, %v8700_v39  ;;  %580 = vmatmul.mubr.f32.gmra.mrb[12].mxu0 %v579_v32  ;;  %2298 = vmatmul.mubr.f32.gmra.mrb[12].mxu1 %v579_v32 }
  0xc6   : > { %8992 = vst [vmem:[#allocation120_spill] sm:$0xff] %v8991_v58  ;;  %v6661_v20 = vsub.f32 %v4818_v38, %v4818_v38  ;;  %v796_v43 = vsub.f32 %v6239_v15, %v8701_v45  ;;  %v2502_v52 = vsub.f32 %v6275_v14, %v8702_v60  ;;  %v8712_v31 = vand.u32 4294901760, %v6277_v4  ;;  %585 = vmatprep.mubr.f32.mxu0 %v8952_v63 }
  0xc7   : > { %8993 = vst [vmem:[#allocation121_spill] sm:$0xff] %v6653_v25  ;;  %4990 = vmatpush1.bf16.msra.mxu0 %v4989_v23  ;;  %v6672_v3 = vand.u32 4294901760, %v6653_v25  ;;  %v785_v48 = vand.u32 4294901760, %v784_v26  ;;  %v8721_v32 = vand.u32 4294901760, %v6256_v24  ;;  %v8724_v39 = vand.u32 4294901760, %v6263_v62  ;;  %5182 = vmatpush1.bf16.msra.mxu1 %v5181_v18 }
  0xc8   : > { %8994 = vst [vmem:[#allocation122_spill] sm:$0xff] %v6661_v20  ;;  %2303 = vmatprep.mubr.f32.mxu1 %v8952_v63  ;;  %v6678_v45 = vand.u32 4294901760, %v6661_v20  ;;  %v797_v60 = vand.u32 4294901760, %v796_v43  ;;  %v2503_v33 = vand.u32 4294901760, %v2502_v52  ;;  %v2514_v23 = vsub.f32 %v6277_v4, %v8712_v31  ;;  %3816 = vadd.xlane.f32.xlu0 %v4818_v38  ;;  %v8998_v31 = vld [vmem:[#allocation69_spill] sm:$0xff] }
  0xc9   : > { %8995 = vst [vmem:[#allocation123_spill] sm:$0xff] %v6672_v3  ;;  %v589_v58 = vsub.f32 %v6653_v25, %v6672_v3  ;;  %v790_v26 = vsub.f32 %v6256_v24, %v8721_v32  ;;  %v802_v18 = vsub.f32 %v6263_v62, %v8724_v39  ;;  %v8728_v11 = vand.u32 4294901760, %v8997_v22 }
  0xca   : > { %8996 = vst [vmem:[#allocation124_spill] sm:$0xff] %v6678_v45  ;;  %v600_v43 = vsub.f32 %v6661_v20, %v6678_v45  ;;  %v4991_v52 = vpack.c.bf16 %v797_v60, %v785_v48  ;;  %v2515_v17 = vand.u32 4294901760, %v2514_v23  ;;  %v8727_v19 = vand.u32 4294901760, %v8998_v31  ;;  %v8999_v23 = vld [vmem:[#allocation62_spill] sm:$0xff]  ;;  %v9012_v20 = vld [vmem:[#allocation72_spill] sm:$0xff] }
  0xcb   : > { %v590_v36 = vand.u32 4294901760, %v589_v58  ;;  %v791_v3 = vand.u32 4294901760, %v790_v26  ;;  %v803_v25 = vand.u32 4294901760, %v802_v18  ;;  %v2508_v32 = vsub.f32 %v8997_v22, %v8728_v11 }
  0xcc   : > { %v601_v28 = vand.u32 4294901760, %v600_v43  ;;  %4992 = vmatprep.subr.bf16.mxu0 %v4991_v52  ;;  %v5183_v39 = vpack.c.bf16 %v2515_v17, %v2503_v33  ;;  %v2520_v38 = vsub.f32 %v8998_v31, %v8727_v19  ;;  %v321_v45 = vadd.s32 72, %v6366_v49  ;;  %v9003_v33 = vld [vmem:[#allocation63_spill] sm:$0xff] }
  0xcd   : > { %591 = vmatmul.mubr.f32.gmra.mrb[14].mxu0 %v590_v36  ;;  %2309 = vmatmul.mubr.f32.gmra.mrb[14].mxu1 %v590_v36  ;;  %v4993_v60 = vpack.c.bf16 %v803_v25, %v791_v3  ;;  %v2509_v48 = vand.u32 4294901760, %v2508_v32  ;;  %v322_v58 = vadd.s32 80, %v6366_v49  ;;  %v8729_v26 = vand.u32 4294901760, %v8999_v23  ;;  %v9007_v32 = vld [vmem:[#allocation78_spill] sm:$0xff] }
  0xce   : > { %596 = vmatprep.mubr.f32.mxu0 %v8952_v63  ;;  %2314 = vmatprep.mubr.f32.mxu1 %v8952_v63  ;;  %v2521_v18 = vand.u32 4294901760, %v2520_v38  ;;  %vm6707_vm10 = vcmp.eq.s32.totalorder %v6358_v34, %v321_v45  ;;  %v9000_v17 = vmov 0  ;;  %v8730_v43 = vand.u32 4294901760, %v9003_v33 }
  0xcf   : > { %v9001_v17 = vsel %vm6707_vm10, 4294967295, %v9000_v17  ;;  %v8735_v36 = vand.u32 4294901760, %v6307_v8  ;;  %5184 = vmatprep.subr.bf16.mxu1 %v5183_v39  ;;  %4994 = vmatpush1.bf16.msra.mxu0 %v4993_v60  ;;  %v4819_v25 = vsel %vm6707_vm10, 1.0, %v8952_v63  ;;  %vm6717_vm11 = vcmp.eq.s32.totalorder %v6358_v34, %v322_v58 }
  0xd0   : > { %9002 = vst [vmem:[#allocation68_spill] sm:$0xff] %v9001_v17  ;;  %v9004_v3 = vmov 0  ;;  %v808_v45 = vsub.f32 %v8999_v23, %v8729_v26  ;;  %v8740_v52 = vand.u32 4294901760, %v9007_v32  ;;  %v5185_v38 = vpack.c.bf16 %v2521_v18, %v2509_v48  ;;  %3818 = vadd.xlane.f32.xlu1 %v4819_v25 }
  0xd1   : > { %v9005_v3 = vsel %vm6717_vm11, 4294967295, %v9004_v3  ;;  %v6725_v19 = vsub.f32 %v4819_v25, %v4819_v25  ;;  %v4820_v39 = vsel %vm6717_vm11, 1.0, %v8952_v63  ;;  %v820_v60 = vsub.f32 %v9003_v33, %v8730_v43  ;;  %602 = vmatmul.mubr.f32.gmra.mrb[16].mxu0 %v601_v28  ;;  %2320 = vmatmul.mubr.f32.gmra.mrb[16].mxu1 %v601_v28  ;;  %v9011_v43 = vld [vmem:[#allocation70_spill] sm:$0xff] }
  0xd2   : > { %9006 = vst [vmem:[#allocation69_spill] sm:$0xff] %v9005_v3  ;;  %v6733_v58 = vsub.f32 %v4820_v39, %v4820_v39  ;;  %v809_v11 = vand.u32 4294901760, %v808_v45  ;;  %v2526_v48 = vsub.f32 %v6307_v8, %v8735_v36  ;;  %v2538_v18 = vsub.f32 %v9007_v32, %v8740_v52  ;;  %607 = vmatprep.mubr.f32.mxu0 %v8952_v63 }
  0xd3   : > { %9008 = vst [vmem:[#allocation62_spill] sm:$0xff] %v6725_v19  ;;  %5186 = vmatpush1.bf16.msra.mxu1 %v5185_v38  ;;  %v6743_v26 = vand.u32 4294901760, %v6725_v19  ;;  %v821_v25 = vand.u32 4294901760, %v820_v60  ;;  %v8751_v28 = vand.u32 4294901760, %v9011_v43  ;;  %v8756_v3 = vand.u32 4294901760, %v9012_v20  ;;  %2325 = vmatprep.mubr.f32.mxu1 %v8952_v63 }
  0xd4   : > { %9009 = vst [vmem:[#allocation63_spill] sm:$0xff] %v6733_v58  ;;  %v6749_v45 = vand.u32 4294901760, %v6733_v58  ;;  %v2527_v36 = vand.u32 4294901760, %v2526_v48  ;;  %v2539_v17 = vand.u32 4294901760, %v2538_v18  ;;  %v8758_v52 = vand.u32 4294901760, %v9014_v47  ;;  %3820 = vadd.xlane.f32.xlu0 %v4820_v39  ;;  %v9015_v18 = vld [vmem:[#allocation81_spill] sm:$0xff] }
  0xd5   : > { %9010 = vst [vmem:[#allocation125_spill] sm:$0xff] %v6743_v26  ;;  %v611_v38 = vsub.f32 %v6725_v19, %v6743_v26  ;;  %v4995_v46 = vpack.c.bf16 %v821_v25, %v809_v11  ;;  %v814_v60 = vsub.f32 %v9011_v43, %v8751_v28  ;;  %v826_v61 = vsub.f32 %v9012_v20, %v8756_v3 }
  0xd6   : > { %9013 = vst [vmem:[#allocation70_spill] sm:$0xff] %v6749_v45  ;;  %v622_v57 = vsub.f32 %v6733_v58, %v6749_v45  ;;  %v5187_v48 = vpack.c.bf16 %v2539_v17, %v2527_v36  ;;  %v2532_v39 = vsub.f32 %v9014_v47, %v8758_v52  ;;  %v8757_v7 = vand.u32 4294901760, %v9015_v18 }
  0xd7   : > { %v612_v26 = vand.u32 4294901760, %v611_v38  ;;  %4996 = vmatprep.subr.bf16.mxu0 %v4995_v46  ;;  %v815_v11 = vand.u32 4294901760, %v814_v60  ;;  %v827_v25 = vand.u32 4294901760, %v826_v61  ;;  %v323_v28 = vadd.s32 88, %v6366_v49  ;;  %v9019_v61 = vld [vmem:[#allocation74_spill] sm:$0xff]  ;;  %v9020_v60 = vld [vmem:[#allocation75_spill] sm:$0xff] }
  0xd8   : > { %v623_v19 = vand.u32 4294901760, %v622_v57  ;;  %5188 = vmatprep.subr.bf16.mxu1 %v5187_v48  ;;  %v2533_v2 = vand.u32 4294901760, %v2532_v39  ;;  %v2544_v3 = vsub.f32 %v9015_v18, %v8757_v7  ;;  %v324_v17 = vadd.s32 96, %v6366_v49 }
  0xd9   : > { %613 = vmatmul.mubr.f32.gmra.mrb[18].mxu0 %v612_v26  ;;  %2331 = vmatmul.mubr.f32.gmra.mrb[18].mxu1 %v612_v26  ;;  %v4997_v36 = vpack.c.bf16 %v827_v25, %v815_v11  ;;  %vm6772_vm12 = vcmp.eq.s32.totalorder %v6358_v34, %v323_v28  ;;  %v9016_v38 = vmov 0  ;;  %v8763_v46 = vand.u32 4294901760, %v9019_v61 }
  0xda   : > { %v9017_v38 = vsel %vm6772_vm12, 4294967295, %v9016_v38  ;;  %v8768_v57 = vand.u32 4294901760, %v9020_v60  ;;  %618 = vmatprep.mubr.f32.mxu0 %v8952_v63  ;;  %2336 = vmatprep.mubr.f32.mxu1 %v8952_v63  ;;  %v2545_v48 = vand.u32 4294901760, %v2544_v3  ;;  %v4821_v39 = vsel %vm6772_vm12, 1.0, %v8952_v63 }
  0xdb   : > { %9018 = vst [vmem:[#allocation72_spill] sm:$0xff] %v9017_v38  ;;  %vm6784_vm13 = vcmp.eq.s32.totalorder %v6358_v34, %v324_v17  ;;  %v9021_v26 = vmov 0  ;;  %v8769_v28 = vand.u32 4294901760, %v6339_v29  ;;  %4998 = vmatpush1.bf16.msra.mxu0 %v4997_v36  ;;  %v6789_v11 = vsub.f32 %v4821_v39, %v4821_v39  ;;  %3822 = vadd.xlane.f32.xlu1 %v4821_v39  ;;  %v9027_v38 = vld [vmem:[#allocation82_spill] sm:$0xff] }
  0xdc   : > { %v9022_v26 = vsel %vm6784_vm13, 4294967295, %v9021_v26  ;;  %v4822_v25 = vsel %vm6784_vm13, 1.0, %v8952_v63  ;;  %v832_v3 = vsub.f32 %v9019_v61, %v8763_v46  ;;  %v844_v17 = vsub.f32 %v9020_v60, %v8768_v57 }
  0xdd   : > { %9023 = vst [vmem:[#allocation80_spill] sm:$0xff] %v9022_v26  ;;  %9024 = vst [vmem:[#allocation81_spill] sm:$0xff] %v6789_v11  ;;  %v5189_v7 = vpack.c.bf16 %v2545_v48, %v2533_v2  ;;  %v6800_v52 = vsub.f32 %v4822_v25, %v4822_v25  ;;  %v2550_v36 = vsub.f32 %v6339_v29, %v8769_v28  ;;  %v8772_v45 = vand.u32 4294901760, %v6341_v50 }
  0xde   : > { %3824 = vadd.xlane.f32.xlu0 %v4822_v25  ;;  %624 = vmatmul.mubr.f32.gmra.mrb[20].mxu0 %v623_v19  ;;  %v6807_v58 = vand.u32 4294901760, %v6789_v11  ;;  %v833_v46 = vand.u32 4294901760, %v832_v3  ;;  %v845_v26 = vand.u32 4294901760, %v844_v17  ;;  %v8781_v57 = vand.u32 4294901760, %v9027_v38  ;;  %v9029_v25 = vld [vmem:[#allocation84_spill] sm:$0xff] }
  0xdf   : > { %9025 = vst [vmem:[#allocation74_spill] sm:$0xff] %v6800_v52  ;;  %2342 = vmatmul.mubr.f32.gmra.mrb[20].mxu1 %v623_v19  ;;  %629 = vmatprep.mubr.f32.mxu0 %v8952_v63  ;;  %v6812_v2 = vand.u32 4294901760, %v6800_v52  ;;  %v2551_v48 = vand.u32 4294901760, %v2550_v36  ;;  %v2562_v39 = vsub.f32 %v6341_v50, %v8772_v45  ;;  %v8786_v19 = vand.u32 4294901760, %v9029_v25 }
  0xe0   : > { %9026 = vst [vmem:[#allocation75_spill] sm:$0xff] %v6807_v58  ;;  %5190 = vmatpush1.bf16.msra.mxu1 %v5189_v7  ;;  %v633_v28 = vsub.f32 %v6789_v11, %v6807_v58  ;;  %2347 = vmatprep.mubr.f32.mxu1 %v8952_v63  ;;  %v4999_v3 = vpack.c.bf16 %v845_v26, %v833_v46  ;;  %v8787_v17 = vand.u32 4294901760, %v6345_v27  ;;  %v8788_v1 = vand.u32 4294901760, %v9030_v44 }
  0xe1   : > { %9028 = vst [vmem:[#allocation82_spill] sm:$0xff] %v6812_v2  ;;  %v838_v7 = vsub.f32 %v9027_v38, %v8781_v57  ;;  %v644_v36 = vsub.f32 %v6800_v52, %v6812_v2  ;;  %v2563_v51 = vand.u32 4294901760, %v2562_v39  ;;  %v850_v45 = vsub.f32 %v9029_v25, %v8786_v19  ;;  %v9042_v52 = vld [vmem:[#allocation93_spill] sm:$0xff] }
  0xe2   : > { %v634_v58 = vand.u32 4294901760, %v633_v28  ;;  %5000 = vmatprep.subr.bf16.mxu0 %v4999_v3  ;;  %v2556_v46 = vsub.f32 %v6345_v27, %v8787_v17  ;;  %v325_v26 = vadd.s32 104, %v6366_v49  ;;  %v2568_v39 = vsub.f32 %v9030_v44, %v8788_v1 }
  0xe3   : > { %v839_v11 = vand.u32 4294901760, %v838_v7  ;;  %v645_v57 = vand.u32 4294901760, %v644_v36  ;;  %v5191_v0 = vpack.c.bf16 %v2563_v51, %v2551_v48  ;;  %v851_v42 = vand.u32 4294901760, %v850_v45  ;;  %v9034_v7 = vld [vmem:[#allocation86_spill] sm:$0xff]  ;;  %v9035_v48 = vld [vmem:[#allocation87_spill] sm:$0xff] }
  0xe4   : > { %635 = vmatmul.mubr.f32.gmra.mrb[22].mxu0 %v634_v58  ;;  %2353 = vmatmul.mubr.f32.gmra.mrb[22].mxu1 %v634_v58  ;;  %v2557_v19 = vand.u32 4294901760, %v2556_v46  ;;  %vm6839_vm14 = vcmp.eq.s32.totalorder %v6358_v34, %v325_v26  ;;  %v9031_v28 = vmov 0  ;;  %v326_v3 = vadd.s32 112, %v6366_v49 }
  0xe5   : > { %v9032_v28 = vsel %vm6839_vm14, 4294967295, %v9031_v28  ;;  %v8791_v17 = vand.u32 4294901760, %v9034_v7  ;;  %640 = vmatprep.mubr.f32.mxu0 %v8952_v63  ;;  %2358 = vmatprep.mubr.f32.mxu1 %v8952_v63  ;;  %v5001_v51 = vpack.c.bf16 %v851_v42, %v839_v11  ;;  %v2569_v45 = vand.u32 4294901760, %v2568_v39 }
  0xe6   : > { %9033 = vst [vmem:[#allocation84_spill] sm:$0xff] %v9032_v28  ;;  %v4823_v58 = vsel %vm6839_vm14, 1.0, %v8952_v63  ;;  %v8792_v36 = vand.u32 4294901760, %v9035_v48  ;;  %5192 = vmatprep.subr.bf16.mxu1 %v5191_v0  ;;  %vm6854_vm15 = vcmp.eq.s32.totalorder %v6358_v34, %v326_v3  ;;  %v9037_v26 = vmov 0 }
  0xe7   : > { %v6851_v46 = vsub.f32 %v4823_v58, %v4823_v58  ;;  %v9038_v26 = vsel %vm6854_vm15, 4294967295, %v9037_v26  ;;  %v856_v1 = vsub.f32 %v9034_v7, %v8791_v17  ;;  %v8799_v42 = vand.u32 4294901760, %v6383_v30  ;;  %3826 = vadd.xlane.f32.xlu1 %v4823_v58  ;;  %5002 = vmatpush1.bf16.msra.mxu0 %v5001_v51 }
  0xe8   : > { %9039 = vst [vmem:[#allocation86_spill] sm:$0xff] %v9038_v26  ;;  %v5193_v11 = vpack.c.bf16 %v2569_v45, %v2557_v19  ;;  %v4824_v0 = vsel %vm6854_vm15, 1.0, %v8952_v63  ;;  %v868_v39 = vsub.f32 %v9035_v48, %v8792_v36  ;;  %v8802_v3 = vand.u32 4294901760, %v6385_v6  ;;  %646 = vmatmul.mubr.f32.gmra.mrb[24].mxu0 %v645_v57  ;;  %2364 = vmatmul.mubr.f32.gmra.mrb[24].mxu1 %v645_v57  ;;  %v9041_v36 = vld [vmem:[#allocation91_spill] sm:$0xff] }
  0xe9   : > { %9036 = vst [vmem:[#allocation90_spill] sm:$0xff] %v6851_v46  ;;  %v6870_v2 = vand.u32 4294901760, %v6851_v46  ;;  %v6872_v17 = vsub.f32 %v4824_v0, %v4824_v0  ;;  %v857_v58 = vand.u32 4294901760, %v856_v1  ;;  %v2574_v19 = vsub.f32 %v6383_v30, %v8799_v42  ;;  %651 = vmatprep.mubr.f32.mxu0 %v8952_v63  ;;  %2369 = vmatprep.mubr.f32.mxu1 %v8952_v63 }
  0xea   : > { %5194 = vmatpush1.bf16.msra.mxu1 %v5193_v11  ;;  %v869_v51 = vand.u32 4294901760, %v868_v39  ;;  %v2586_v45 = vsub.f32 %v6385_v6, %v8802_v3  ;;  %v8811_v57 = vand.u32 4294901760, %v9041_v36  ;;  %v8813_v26 = vand.u32 4294901760, %v9042_v52  ;;  %3828 = vadd.xlane.f32.xlu0 %v4824_v0  ;;  %v9044_v6 = vld [vmem:[#allocation98_spill] sm:$0xff] }
  0xeb   : > { %9040 = vst [vmem:[#allocation87_spill] sm:$0xff] %v6870_v2  ;;  %v655_v28 = vsub.f32 %v6851_v46, %v6870_v2  ;;  %v6887_v1 = vand.u32 4294901760, %v6872_v17  ;;  %v2575_v42 = vand.u32 4294901760, %v2574_v19  ;;  %v8814_v11 = vand.u32 4294901760, %v6389_v59 }
  0xec   : > { %v5003_v39 = vpack.c.bf16 %v869_v51, %v857_v58  ;;  %v2587_v41 = vand.u32 4294901760, %v2586_v45  ;;  %v862_v3 = vsub.f32 %v9041_v36, %v8811_v57  ;;  %v874_v37 = vsub.f32 %v9042_v52, %v8813_v26 }
  0xed   : > { %9043 = vst [vmem:[#allocation93_spill] sm:$0xff] %v6887_v1  ;;  %v656_v2 = vand.u32 4294901760, %v655_v28  ;;  %v666_v46 = vsub.f32 %v6872_v17, %v6887_v1  ;;  %v2580_v19 = vsub.f32 %v6389_v59, %v8814_v11  ;;  %v8815_v0 = vand.u32 4294901760, %v9044_v6  ;;  %v9055_v1 = vld [vmem:[#allocation12_spill] sm:$0xff] }
  0xee   : > { %5004 = vmatprep.subr.bf16.mxu0 %v5003_v39  ;;  %v5195_v58 = vpack.c.bf16 %v2587_v41, %v2575_v42  ;;  %v863_v51 = vand.u32 4294901760, %v862_v3  ;;  %v875_v45 = vand.u32 4294901760, %v874_v37  ;;  %v327_v57 = vadd.s32 120, %v6366_v49  ;;  %v9050_v39 = vld [vmem:[#allocation16_spill] sm:$0xff] }
  0xef   : > { %657 = vmatmul.mubr.f32.gmra.mrb[26].mxu0 %v656_v2  ;;  %2375 = vmatmul.mubr.f32.gmra.mrb[26].mxu1 %v656_v2  ;;  %v667_v36 = vand.u32 4294901760, %v666_v46  ;;  %v2581_v26 = vand.u32 4294901760, %v2580_v19  ;;  %v2592_v28 = vsub.f32 %v9044_v6, %v8815_v0  ;;  %v9045_v41 = vmov 0  ;;  %v9048_v2 = vld [vmem:[#allocation10_spill] sm:$0xff]  ;;  %v9049_v46 = vld [vmem:[#allocation11_spill] sm:$0xff]  ;;  %v9051_v19 = vld [vmem:[#allocation17_spill] sm:$0xff] }
  0xf0   : > { %662 = vmatprep.mubr.f32.mxu0 %v8952_v63  ;;  %2380 = vmatprep.mubr.f32.mxu1 %v8952_v63  ;;  %v5005_v11 = vpack.c.bf16 %v875_v45, %v863_v51  ;;  %vm6909_vm0 = vcmp.eq.s32.totalorder %v6358_v34, %v327_v57  ;;  %v5007_v42 = vpack.c.bf16 %v9049_v46, %v9048_v2  ;;  %v8839_v0 = vmov 1.0  }
  0xf1   : > { %v9046_v41 = vsel %vm6909_vm0, 4294967295, %v9045_v41  ;;  %5196 = vmatprep.subr.bf16.mxu1 %v5195_v58  ;;  %v2593_v37 = vand.u32 4294901760, %v2592_v28  ;;  %v4825_v49 = vsel %vm6909_vm0, 1.0, %v8952_v63  ;;  %v5199_v51 = vpack.c.bf16 %v9051_v19, %v9050_v39 }
  0xf2   : > { %9047 = vst [vmem:[#allocation98_spill] sm:$0xff] %v9046_v41  ;;  %5006 = vmatpush1.bf16.msra.mxu0 %v5005_v11  ;;  %v6918_v3 = vsub.f32 %v4825_v49, %v4825_v49  ;;  %v5017_v58 = vpack.c.bf16 %v6199_v21, %v6192_v9  ;;  %v5209_v11 = vpack.c.bf16 %v6221_v54, %v6219_v53  ;;  %v9066_v54 = vld [vmem:[#allocation33_spill] sm:$0xff]  ;;  %v9067_v53 = vld [vmem:[#allocation35_spill] sm:$0xff]  ;;  %v9106_v41 = vld [vmem:[#allocation30_spill] sm:$0xff] }
  0xf3   : > { %668 = vmatmul.mubr.f32.gmra.mrb[28].mxu0 %v667_v36  ;;  %2386 = vmatmul.mubr.f32.gmra.mrb[28].mxu1 %v667_v36  ;;  %v5197_v34 = vpack.c.bf16 %v2593_v37, %v2581_v26  ;;  %v5019_v45 = vpack.c.bf16 %v6207_v40, %v6205_v35  ;;  %v5211_v36 = vpack.c.bf16 %v6245_v10, %v6243_v55  ;;  %v9065_v40 = vld [vmem:[#allocation26_spill] sm:$0xff]  ;;  %v9068_v9 = vld [vmem:[#allocation27_spill] sm:$0xff]  ;;  %v9071_v55 = vld [vmem:[#allocation44_spill] sm:$0xff] }
  0xf4   : > { %673 = vmatprep.mubr.f32.mxu0 %v8952_v63  ;;  %v6924_v57 = vand.u32 4294901760, %v6918_v3  ;;  %2391 = vmatprep.mubr.f32.mxu1 %v8952_v63  ;;  %v5021_v28 = vpack.c.bf16 %v6231_v13, %v6224_v56  ;;  %v5213_v37 = vpack.c.bf16 %v6253_v12, %v6251_v16  ;;  %v5219_v12 = vpack.c.bf16 %v9007_v32, %v6307_v8  ;;  %v9054_v32 = vld [vmem:[#allocation91_spill] sm:$0xff]  ;;  %v9062_v56 = vld [vmem:[#allocation32_spill] sm:$0xff] }
  0xf5   : > { %5198 = vmatpush1.bf16.msra.mxu1 %v5197_v34  ;;  %5008 = vmatprep.subr.bf16.mxu0 %v5007_v42  ;;  %v5023_v42 = vpack.c.bf16 %v6239_v15, %v6237_v5  ;;  %v5215_v34 = vpack.c.bf16 %v6277_v4, %v6275_v14  ;;  %v9053_v15 = vld [vmem:[#allocation96_spill] sm:$0xff]  ;;  %v9060_v16 = vld [vmem:[#allocation23_spill] sm:$0xff]  ;;  %v5205_v21 = vpack.c.bf16 %v9067_v53, %v9066_v54 }
  0xf6   : > { %9052 = vst [vmem:[#allocation10_spill] sm:$0xff] %v6924_v57  ;;  %v677_v26 = vsub.f32 %v6918_v3, %v6924_v57  ;;  %5200 = vmatprep.subr.bf16.mxu1 %v5199_v51  ;;  %3830 = vadd.xlane.f32.xlu1 %v4825_v49  ;;  %v9056_v51 = vld [vmem:[#allocation14_spill] sm:$0xff]  ;;  %v9058_v14 = vld [vmem:[#allocation20_spill] sm:$0xff]  ;;  %v9061_v4 = vld [vmem:[#allocation31_spill] sm:$0xff] }
  0xf7   : > { %v5009_v8 = vpack.c.bf16 %v9056_v51, %v9055_v1  ;;  %v5203_v10 = vpack.c.bf16 %v9062_v56, %v9061_v4  ;;  %v9064_v49 = vld [vmem:[#allocation24_spill] sm:$0xff]  ;;  %v9069_v56 = vld [vmem:[#allocation29_spill] sm:$0xff] }
  0xf8   : > { %v678_v57 = vand.u32 4294901760, %v677_v26  ;;  %v9059_v26 = vld [vmem:[#allocation22_spill] sm:$0xff]  ;;  %v5013_v35 = vpack.c.bf16 %v9065_v40, %v9064_v49  ;;  %v5015_v4 = vpack.c.bf16 %v9069_v56, %v9068_v9 }
  0xf9   : > { %v5011_v13 = vpack.c.bf16 %v9060_v16, %v9059_v26  ;;  %v9070_v16 = vld [vmem:[#allocation43_spill] sm:$0xff]  ;;  %v9072_v26 = vmov 1.0  }
  0xfa   : > { %679 = vmatmul.mubr.f32.gmra.mrb[30].mxu0 %v678_v57  ;;  %2397 = vmatmul.mubr.f32.gmra.mrb[30].mxu1 %v678_v57  ;;  %v9057_v57 = vld [vmem:[#allocation19_spill] sm:$0xff] }
  0xfb   : > { %909 = vmatprep.mubr.f32.mxu0 %v8952_v63  ;;  %2627 = vmatprep.mubr.f32.mxu1 %v8952_v63  ;;  %v5201_v5 = vpack.c.bf16 %v9058_v14, %v9057_v57  ;;  %v3786_v14 = vld [vmem:[#allocation4 + $0x10] sm:$0xff] }
  0xfe   : > { %4826 = vmatmul.mubr.msk.f32.vlgmr.msra.gmra.mrb[0].mxu0 %vm6372_vm1, %v8839_v0  ;;  %4874 = vmatmul.mubr.msk.f32.vlgmr.msra.gmra.mrb[0].mxu1 %vm6372_vm1, %v8839_v0  ;;  %v5207_v0 = vpack.c.bf16 %v9071_v55, %v9070_v16 }
  0xff   : > { %916 = vmatprep.mubr.f32.mxu0 %v8952_v63  ;;  %5010 = vmatpush1.bf16.msra.mxu0 %v5009_v8  ;;  %v9116_v8 = vld [vmem:[#allocation54_spill] sm:$0xff] }
 0x100   : > { %5202 = vmatpush1.bf16.msra.mxu1 %v5201_v5  ;;  %2634 = vmatprep.mubr.f32.mxu1 %v8952_v63  ;;  %v9079_v5 = vpack.c.bf16 %v9003_v33, %v8999_v23 }
 0x101   : > { %5012 = vmatprep.subr.bf16.mxu0 %v5011_v13  ;;  %5204 = vmatprep.subr.bf16.mxu1 %v5203_v10  ;;  %v9078_v13 = vpack.c.bf16 %v8998_v31, %v8997_v22  ;;  %v9120_v10 = vld [vmem:[#allocation51_spill] sm:$0xff] }
 0x102   : > { %4827 = vmatmul.mubr.msk.f32.gmra.mrb[2].mxu0 %vm6433_vm2, %v9072_v26  ;;  %4875 = vmatmul.mubr.msk.f32.gmra.mrb[2].mxu1 %vm6433_vm2, %v9072_v26 }
 0x103   : > { %923 = vmatprep.mubr.f32.mxu0 %v8952_v63  ;;  %2641 = vmatprep.mubr.f32.mxu1 %v8952_v63 }
 0x104   : > { %5014 = vmatpush1.bf16.msra.mxu0 %v5013_v35  ;;  %5206 = vmatpush1.bf16.msra.mxu1 %v5205_v21  ;;  %v9077_v35 = vpack.c.bf16 %v6263_v62, %v6256_v24  ;;  %v9119_v21 = vld [vmem:[#allocation57_spill] sm:$0xff] }
 0x105   : > { %5016 = vmatprep.subr.bf16.mxu0 %v5015_v4  ;;  %5208 = vmatprep.subr.bf16.mxu1 %v5207_v0  ;;  %v9081_v0 = vpack.c.bf16 %v9012_v20, %v9011_v43  ;;  %v9117_v4 = vld [vmem:[#allocation109_spill] sm:$0xff] }
 0x106   : > { %4828 = vmatmul.mubr.msk.f32.gmra.mrb[4].mxu0 %vm6445_vm3, %v9072_v26  ;;  %4876 = vmatmul.mubr.msk.f32.gmra.mrb[4].mxu1 %vm6445_vm3, %v9072_v26 }
 0x107   : > { %930 = vmatprep.mubr.f32.mxu0 %v8952_v63  ;;  %2648 = vmatprep.mubr.f32.mxu1 %v8952_v63 }
 0x108   : > { %5018 = vmatpush1.bf16.msra.mxu0 %v5017_v58  ;;  %5210 = vmatpush1.bf16.msra.mxu1 %v5209_v11  ;;  %v9082_v58 = vpack.c.bf16 %v9015_v18, %v9014_v47  ;;  %v9084_v11 = vpack.c.bf16 %v6341_v50, %v6339_v29 }
 0x109   : > { %5020 = vmatprep.subr.bf16.mxu0 %v5019_v45  ;;  %5212 = vmatprep.subr.bf16.mxu1 %v5211_v36  ;;  %v9086_v36 = vpack.c.bf16 %v9029_v25, %v9027_v38  ;;  %v9115_v45 = vld [vmem:[#allocation39_spill] sm:$0xff] }
 0x10a   : > { %4829 = vmatmul.mubr.msk.f32.gmra.mrb[6].mxu0 %vm6503_vm4, %v9072_v26  ;;  %4877 = vmatmul.mubr.msk.f32.gmra.mrb[6].mxu1 %vm6503_vm4, %v9072_v26 }
 0x10b   : > { %937 = vmatprep.mubr.f32.mxu0 %v8952_v63  ;;  %2655 = vmatprep.mubr.f32.mxu1 %v8952_v63 }
 0x10c   : > { %5022 = vmatpush1.bf16.msra.mxu0 %v5021_v28  ;;  %5214 = vmatpush1.bf16.msra.mxu1 %v5213_v37  ;;  %v9087_v28 = vpack.c.bf16 %v9030_v44, %v6345_v27  ;;  %v9088_v37 = vpack.c.bf16 %v9035_v48, %v9034_v7 }
 0x10d   : > { %5024 = vmatprep.subr.bf16.mxu0 %v5023_v42  ;;  %5216 = vmatprep.subr.bf16.mxu1 %v5215_v34  ;;  %v9089_v42 = vpack.c.bf16 %v9053_v15, %v6383_v30  ;;  %v9114_v34 = vld [vmem:[#allocation45_spill] sm:$0xff] }
 0x10e   : > { %4830 = vmatmul.mubr.msk.f32.gmra.mrb[8].mxu0 %vm6512_vm5, %v9072_v26  ;;  %4878 = vmatmul.mubr.msk.f32.gmra.mrb[8].mxu1 %vm6512_vm5, %v9072_v26 }
 0x10f   : > { %944 = vmatprep.mubr.f32.mxu0 %v8952_v63  ;;  %2662 = vmatprep.mubr.f32.mxu1 %v8952_v63 }
 0x110   : > { %5026 = vmatpush1.bf16.msra.mxu0 %v9077_v35  ;;  %5218 = vmatpush1.bf16.msra.mxu1 %v9078_v13  ;;  %v9091_v35 = vpack.c.bf16 %v9042_v52, %v9054_v32  ;;  %v9092_v13 = vpack.c.bf16 %v9044_v6, %v6389_v59 }
 0x111   : > { %5028 = vmatprep.subr.bf16.mxu0 %v9079_v5  ;;  %5220 = vmatprep.subr.bf16.mxu1 %v5219_v12  ;;  %v9083_v12 = vpack.c.bf16 %v9020_v60, %v9019_v61  ;;  %v9093_v5 = vld [vmem:[#allocation9_spill] sm:$0xff] }
 0x112   : > { %4831 = vmatmul.mubr.msk.f32.gmra.mrb[10].mxu0 %vm6567_vm6, %v9072_v26  ;;  %4879 = vmatmul.mubr.msk.f32.gmra.mrb[10].mxu1 %vm6567_vm6, %v9072_v26 }
 0x113   : > { %951 = vmatprep.mubr.f32.mxu0 %v8952_v63  ;;  %2669 = vmatprep.mubr.f32.mxu1 %v8952_v63 }
 0x114   : > { %5030 = vmatpush1.bf16.msra.mxu0 %v9081_v0  ;;  %5222 = vmatpush1.bf16.msra.mxu1 %v9082_v58  ;;  %v9094_v0 = vld [vmem:[#allocation15_spill] sm:$0xff]  ;;  %v9112_v58 = vld [vmem:[#allocation105_spill] sm:$0xff] }
 0x115   : > { %5032 = vmatprep.subr.bf16.mxu0 %v9083_v12  ;;  %5224 = vmatprep.subr.bf16.mxu1 %v9084_v11  ;;  %v9110_v11 = vld [vmem:[#allocation28_spill] sm:$0xff]  ;;  %v9111_v12 = vld [vmem:[#allocation42_spill] sm:$0xff] }
 0x116   : > { %4832 = vmatmul.mubr.msk.f32.gmra.mrb[12].mxu0 %vm6583_vm7, %v9072_v26  ;;  %4880 = vmatmul.mubr.msk.f32.gmra.mrb[12].mxu1 %vm6583_vm7, %v9072_v26 }
 0x117   : > { %958 = vmatprep.mubr.f32.mxu0 %v8952_v63  ;;  %2676 = vmatprep.mubr.f32.mxu1 %v8952_v63 }
 0x118   : > { %5034 = vmatpush1.bf16.msra.mxu0 %v9086_v36  ;;  %5226 = vmatpush1.bf16.msra.mxu1 %v9087_v28  ;;  %v9107_v28 = vld [vmem:[#allocation102_spill] sm:$0xff] }
 0x119   : > { %5036 = vmatprep.subr.bf16.mxu0 %v9088_v37  ;;  %5228 = vmatprep.subr.bf16.mxu1 %v9089_v42  ;;  %v9104_v42 = vld [vmem:[#allocation18_spill] sm:$0xff]  ;;  %v9105_v37 = vld [vmem:[#allocation21_spill] sm:$0xff] }
 0x11a   : > { %4833 = vmatmul.mubr.msk.f32.gmra.mrb[14].mxu0 %vm6638_vm8, %v9072_v26  ;;  %4881 = vmatmul.mubr.msk.f32.gmra.mrb[14].mxu1 %vm6638_vm8, %v9072_v26  ;;  %v9109_v36 = vld [vmem:[#allocation34_spill] sm:$0xff] }
 0x11b   : > { %965 = vmatprep.mubr.f32.mxu0 %v8952_v63  ;;  %2683 = vmatprep.mubr.f32.mxu1 %v8952_v63 }
 0x11c   : > { %5038 = vmatpush1.bf16.msra.mxu0 %v9091_v35  ;;  %5230 = vmatpush1.bf16.msra.mxu1 %v9092_v13  ;;  %v9102_v35 = vld [vmem:[#allocation99_spill] sm:$0xff]  ;;  %v9103_v13 = vld [vmem:[#allocation13_spill] sm:$0xff] }
 0x11d   : > { %5040 = vmatprep.subr.bf16.mxu0 %v9093_v5  ;;  %5232 = vmatprep.subr.bf16.mxu1 %v9094_v0 }
 0x11e   : > { %4834 = vmatmul.mubr.msk.f32.gmra.mrb[16].mxu0 %vm6648_vm9, %v9072_v26  ;;  %4882 = vmatmul.mubr.msk.f32.gmra.mrb[16].mxu1 %vm6648_vm9, %v9072_v26 }
 0x11f   : > { %972 = vmatprep.mubr.f32.mxu0 %v8952_v63  ;;  %2690 = vmatprep.mubr.f32.mxu1 %v8952_v63 }
 0x122   : > { %4835 = vmatmul.mubr.msk.f32.gmra.mrb[18].mxu0 %vm6707_vm10, %v9072_v26  ;;  %4883 = vmatmul.mubr.msk.f32.gmra.mrb[18].mxu1 %vm6707_vm10, %v9072_v26 }
 0x123   : > { %979 = vmatprep.mubr.f32.mxu0 %v8952_v63  ;;  %2697 = vmatprep.mubr.f32.mxu1 %v8952_v63 }
 0x126   : > { %4836 = vmatmul.mubr.msk.f32.gmra.mrb[20].mxu0 %vm6717_vm11, %v9072_v26  ;;  %4884 = vmatmul.mubr.msk.f32.gmra.mrb[20].mxu1 %vm6717_vm11, %v9072_v26 }
 0x127   : > { %986 = vmatprep.mubr.f32.mxu0 %v8952_v63  ;;  %2704 = vmatprep.mubr.f32.mxu1 %v8952_v63 }
 0x12a   : > { %4837 = vmatmul.mubr.msk.f32.gmra.mrb[22].mxu0 %vm6772_vm12, %v9072_v26  ;;  %4885 = vmatmul.mubr.msk.f32.gmra.mrb[22].mxu1 %vm6772_vm12, %v9072_v26 }
 0x12b   : > { %993 = vmatprep.mubr.f32.mxu0 %v8952_v63  ;;  %2711 = vmatprep.mubr.f32.mxu1 %v8952_v63 }
 0x12e   : > { %4838 = vmatmul.mubr.msk.f32.gmra.mrb[24].mxu0 %vm6784_vm13, %v9072_v26  ;;  %4886 = vmatmul.mubr.msk.f32.gmra.mrb[24].mxu1 %vm6784_vm13, %v9072_v26 }
 0x12f   : > { %1000 = vmatprep.mubr.f32.mxu0 %v8952_v63  ;;  %2718 = vmatprep.mubr.f32.mxu1 %v8952_v63 }
 0x132   : > { %4839 = vmatmul.mubr.msk.f32.gmra.mrb[26].mxu0 %vm6839_vm14, %v9072_v26  ;;  %4887 = vmatmul.mubr.msk.f32.gmra.mrb[26].mxu1 %vm6839_vm14, %v9072_v26 }
 0x133   : > { %1007 = vmatprep.mubr.f32.mxu0 %v8952_v63  ;;  %2725 = vmatprep.mubr.f32.mxu1 %v8952_v63 }
 0x136   : > { %4840 = vmatmul.mubr.msk.f32.gmra.mrb[28].mxu0 %vm6854_vm15, %v9072_v26  ;;  %4888 = vmatmul.mubr.msk.f32.gmra.mrb[28].mxu1 %vm6854_vm15, %v9072_v26 }
 0x137   : > { %1014 = vmatprep.mubr.f32.mxu0 %v8952_v63  ;;  %2732 = vmatprep.mubr.f32.mxu1 %v8952_v63 }
 0x13a   : > { %4841 = vmatmul.mubr.msk.f32.gmra.mrb[30].mxu0 %vm6909_vm0, %v9072_v26  ;;  %4889 = vmatmul.mubr.msk.f32.gmra.mrb[30].mxu1 %vm6909_vm0, %v9072_v26 }
 0x13b   : > { %1150 = vmatprep.mubr.f32.mxu0 %v8952_v63  ;;  %2868 = vmatprep.mubr.f32.mxu1 %v8952_v63 }
 0x13e   : > { %1153 = vmatmul.mubr.f32.vlgmr.msra.gmra.mrb[0].mxu0 %v9102_v35  ;;  %2871 = vmatmul.mubr.f32.vlgmr.msra.gmra.mrb[0].mxu1 %v9102_v35  ;;  %v9108_v35 = vld [vmem:[#allocation25_spill] sm:$0xff] }
 0x13f   : > { %1158 = vmatprep.mubr.f32.mxu0 %v8952_v63  ;;  %5042 = vmatpush1.bf16.msra.mxu0 %v9103_v13 }
 0x140   : > { %5234 = vmatpush1.bf16.msra.mxu1 %v9104_v42  ;;  %2876 = vmatprep.mubr.f32.mxu1 %v8952_v63 }
 0x141   : > { %5044 = vmatprep.subr.bf16.mxu0 %v9105_v37  ;;  %5236 = vmatprep.subr.bf16.mxu1 %v9106_v41 }
 0x142   : > { %1161 = vmatmul.mubr.f32.gmra.mrb[2].mxu0 %v9107_v28  ;;  %2879 = vmatmul.mubr.f32.gmra.mrb[2].mxu1 %v9107_v28  ;;  %v9113_v28 = vld [vmem:[#allocation37_spill] sm:$0xff] }
 0x143   : > { %1166 = vmatprep.mubr.f32.mxu0 %v8952_v63  ;;  %2884 = vmatprep.mubr.f32.mxu1 %v8952_v63 }
 0x144   : > { %5046 = vmatpush1.bf16.msra.mxu0 %v9108_v35  ;;  %5238 = vmatpush1.bf16.msra.mxu1 %v9109_v36  ;;  %v9141_v36 = vld [vmem:[#allocation121_spill] sm:$0xff]  ;;  %v9163_v35 = vld [vmem:[#allocation100_spill] sm:$0xff] }
 0x145   : > { %5048 = vmatprep.subr.bf16.mxu0 %v9110_v11  ;;  %5240 = vmatprep.subr.bf16.mxu1 %v9111_v12  ;;  %v9139_v12 = vand.u32 4294901760, %v9050_v39  ;;  %v9146_v39 = vld [vmem:[#allocation63_spill] sm:$0xff] }
 0x146   : > { %1169 = vmatmul.mubr.f32.gmra.mrb[4].mxu0 %v9112_v58  ;;  %2887 = vmatmul.mubr.f32.gmra.mrb[4].mxu1 %v9112_v58  ;;  %v9118_v58 = vld [vmem:[#allocation49_spill] sm:$0xff] }
 0x147   : > { %1174 = vmatprep.mubr.f32.mxu0 %v8952_v63  ;;  %2892 = vmatprep.mubr.f32.mxu1 %v8952_v63 }
 0x148   : > { %5050 = vmatpush1.bf16.msra.mxu0 %v9113_v28  ;;  %5242 = vmatpush1.bf16.msra.mxu1 %v9114_v34  ;;  %v9121_v28 = vld [vmem:[#allocation64_spill] sm:$0xff]  ;;  %v9122_v34 = vld [vmem:[#allocation110_spill] sm:$0xff] }
 0x149   : > { %5052 = vmatprep.subr.bf16.mxu0 %v9115_v45  ;;  %5244 = vmatprep.subr.bf16.mxu1 %v9116_v8  ;;  %v9124_v8 = vld [vmem:[#allocation67_spill] sm:$0xff]  ;;  %v9125_v45 = vld [vmem:[#allocation61_spill] sm:$0xff] }
 0x14a   : > { %1177 = vmatmul.mubr.f32.gmra.mrb[6].mxu0 %v9117_v4  ;;  %2895 = vmatmul.mubr.f32.gmra.mrb[6].mxu1 %v9117_v4  ;;  %v9123_v4 = vld [vmem:[#allocation60_spill] sm:$0xff] }
 0x14b   : > { %1182 = vmatprep.mubr.f32.mxu0 %v8952_v63  ;;  %2900 = vmatprep.mubr.f32.mxu1 %v8952_v63 }
 0x14c   : > { %5054 = vmatpush1.bf16.msra.mxu0 %v9118_v58  ;;  %5246 = vmatpush1.bf16.msra.mxu1 %v9119_v21  ;;  %v9126_v58 = vld [vmem:[#allocation76_spill] sm:$0xff]  ;;  %v9127_v21 = vld [vmem:[#allocation114_spill] sm:$0xff] }
 0x14d   : > { %5056 = vmatprep.subr.bf16.mxu0 %v9120_v10  ;;  %5248 = vmatprep.subr.bf16.mxu1 %v9121_v28  ;;  %v9129_v28 = vld [vmem:[#allocation79_spill] sm:$0xff]  ;;  %v9130_v10 = vld [vmem:[#allocation73_spill] sm:$0xff] }
 0x14e   : > { %1185 = vmatmul.mubr.f32.gmra.mrb[8].mxu0 %v9122_v34  ;;  %2903 = vmatmul.mubr.f32.gmra.mrb[8].mxu1 %v9122_v34  ;;  %v9128_v34 = vld [vmem:[#allocation71_spill] sm:$0xff] }
 0x14f   : > { %1190 = vmatprep.mubr.f32.mxu0 %v8952_v63  ;;  %2908 = vmatprep.mubr.f32.mxu1 %v8952_v63 }
 0x150   : > { %5058 = vmatpush1.bf16.msra.mxu0 %v9123_v4  ;;  %5250 = vmatpush1.bf16.msra.mxu1 %v9124_v8  ;;  %v9131_v4 = vld [vmem:[#allocation88_spill] sm:$0xff]  ;;  %v9132_v8 = vld [vmem:[#allocation117_spill] sm:$0xff] }
 0x151   : > { %5060 = vmatprep.subr.bf16.mxu0 %v9125_v45  ;;  %5252 = vmatprep.subr.bf16.mxu1 %v9126_v58  ;;  %v9134_v58 = vld [vmem:[#allocation89_spill] sm:$0xff] }
 0x152   : > { %1193 = vmatmul.mubr.f32.gmra.mrb[10].mxu0 %v9127_v21  ;;  %2911 = vmatmul.mubr.f32.gmra.mrb[10].mxu1 %v9127_v21  ;;  %v9133_v21 = vld [vmem:[#allocation83_spill] sm:$0xff]  ;;  %v9135_v45 = vld [vmem:[#allocation85_spill] sm:$0xff] }
 0x153   : > { %1198 = vmatprep.mubr.f32.mxu0 %v8952_v63  ;;  %2916 = vmatprep.mubr.f32.mxu1 %v8952_v63 }
 0x154   : > { %5062 = vmatpush1.bf16.msra.mxu0 %v9128_v34  ;;  %5254 = vmatpush1.bf16.msra.mxu1 %v9129_v28  ;;  %v9136_v34 = vld [vmem:[#allocation95_spill] sm:$0xff] }
 0x155   : > { %5064 = vmatprep.subr.bf16.mxu0 %v9130_v10  ;;  %5256 = vmatprep.subr.bf16.mxu1 %v9131_v4  ;;  %v9137_v10 = vand.u32 4294901760, %v9048_v2  ;;  %v9138_v4 = vand.u32 4294901760, %v9049_v46  ;;  %v9144_v2 = vld [vmem:[#allocation122_spill] sm:$0xff] }
 0x156   : > { %1201 = vmatmul.mubr.f32.gmra.mrb[12].mxu0 %v9132_v8  ;;  %2919 = vmatmul.mubr.f32.gmra.mrb[12].mxu1 %v9132_v8  ;;  %v9140_v8 = vand.u32 4294901760, %v9051_v19  ;;  %v9145_v46 = vld [vmem:[#allocation62_spill] sm:$0xff]  ;;  %v9147_v19 = vld [vmem:[#allocation81_spill] sm:$0xff] }
 0x157   : > { %1206 = vmatprep.mubr.f32.mxu0 %v8952_v63  ;;  %2924 = vmatprep.mubr.f32.mxu1 %v8952_v63  ;;  %v5071_v28 = vpack.c.bf16 %v9138_v4, %v9137_v10  ;;  %v9148_v10 = vld [vmem:[#allocation74_spill] sm:$0xff]  ;;  %v9152_v4 = vand.u32 4294901760, %v9057_v57 }
 0x158   : > { %5066 = vmatpush1.bf16.msra.mxu0 %v9133_v21  ;;  %5258 = vmatpush1.bf16.msra.mxu1 %v9134_v58  ;;  %v5263_v11 = vpack.c.bf16 %v9140_v8, %v9139_v12  ;;  %v9149_v12 = vld [vmem:[#allocation90_spill] sm:$0xff] }
 0x159   : > { %5068 = vmatprep.subr.bf16.mxu0 %v9135_v45  ;;  %5260 = vmatprep.subr.bf16.mxu1 %v9136_v34  ;;  %v9142_v45 = vld [vmem:[#allocation92_spill] sm:$0xff]  ;;  %v9143_v34 = vld [vmem:[#allocation97_spill] sm:$0xff] }
 0x15a   : > { %1209 = vmatmul.mubr.f32.gmra.mrb[14].mxu0 %v9141_v36  ;;  %2927 = vmatmul.mubr.f32.gmra.mrb[14].mxu1 %v9141_v36  ;;  %v9151_v36 = vand.u32 4294901760, %v9056_v51  ;;  %v9165_v51 = vand.u32 4294901760, %v9065_v40  ;;  %v9173_v40 = vld [vmem:[#allocation36_spill] sm:$0xff] }
 0x15b   : > { %1214 = vmatprep.mubr.f32.mxu0 %v8952_v63  ;;  %2932 = vmatprep.mubr.f32.mxu1 %v8952_v63 }
 0x15c   : > { %5070 = vmatpush1.bf16.msra.mxu0 %v9142_v45  ;;  %5262 = vmatpush1.bf16.msra.mxu1 %v9143_v34  ;;  %v9161_v45 = vld [vmem:[#allocation32_spill] sm:$0xff] }
 0x15d   : > { %5072 = vmatprep.subr.bf16.mxu0 %v5071_v28  ;;  %5264 = vmatprep.subr.bf16.mxu1 %v5263_v11  ;;  %v9150_v11 = vand.u32 4294901760, %v9055_v1  ;;  %v9162_v58 = vand.u32 4294901760, %v9161_v45  ;;  %v9164_v1 = vand.u32 4294901760, %v9064_v49  ;;  %v9167_v45 = vand.u32 4294901760, %v9067_v53  ;;  %v9175_v53 = vld [vmem:[#allocation38_spill] sm:$0xff] }
 0x15e   : > { %1217 = vmatmul.mubr.f32.gmra.mrb[16].mxu0 %v9144_v2  ;;  %2935 = vmatmul.mubr.f32.gmra.mrb[16].mxu1 %v9144_v2 }
 0x15f   : > { %1222 = vmatprep.mubr.f32.mxu0 %v8952_v63  ;;  %2940 = vmatprep.mubr.f32.mxu1 %v8952_v63  ;;  %v5073_v28 = vpack.c.bf16 %v9151_v36, %v9150_v11  ;;  %v5077_v57 = vpack.c.bf16 %v9165_v51, %v9164_v1  ;;  %v9166_v11 = vand.u32 4294901760, %v9066_v54  ;;  %v9176_v54 = vand.u32 4294901760, %v9175_v53  ;;  %v9187_v51 = vld [vmem:[#allocation56_spill] sm:$0xff] }
 0x160   : > { %v9198_v53 = vld [vmem:[#allocation52_spill] sm:$0xff] }
 0x162   : > { %1225 = vmatmul.mubr.f32.gmra.mrb[18].mxu0 %v9145_v46  ;;  %2943 = vmatmul.mubr.f32.gmra.mrb[18].mxu1 %v9145_v46  ;;  %v9155_v46 = vld [vmem:[#allocation22_spill] sm:$0xff] }
 0x163   : > { %1230 = vmatprep.mubr.f32.mxu0 %v8952_v63  ;;  %2948 = vmatprep.mubr.f32.mxu1 %v8952_v63 }
 0x166   : > { %1233 = vmatmul.mubr.f32.gmra.mrb[20].mxu0 %v9146_v39  ;;  %2951 = vmatmul.mubr.f32.gmra.mrb[20].mxu1 %v9146_v39  ;;  %v9156_v39 = vand.u32 4294901760, %v9155_v46  ;;  %v9181_v46 = vld [vmem:[#allocation40_spill] sm:$0xff] }
 0x167   : > { %1238 = vmatprep.mubr.f32.mxu0 %v8952_v63  ;;  %2956 = vmatprep.mubr.f32.mxu1 %v8952_v63 }
 0x16a   : > { %1241 = vmatmul.mubr.f32.gmra.mrb[22].mxu0 %v9147_v19  ;;  %2959 = vmatmul.mubr.f32.gmra.mrb[22].mxu1 %v9147_v19  ;;  %v9157_v19 = vld [vmem:[#allocation23_spill] sm:$0xff] }
 0x16b   : > { %1246 = vmatprep.mubr.f32.mxu0 %v8952_v63  ;;  %2964 = vmatprep.mubr.f32.mxu1 %v8952_v63 }
 0x16e   : > { %1249 = vmatmul.mubr.f32.gmra.mrb[24].mxu0 %v9148_v10  ;;  %2967 = vmatmul.mubr.f32.gmra.mrb[24].mxu1 %v9148_v10  ;;  %v9158_v10 = vand.u32 4294901760, %v9157_v19  ;;  %v9183_v19 = vld [vmem:[#allocation41_spill] sm:$0xff] }
 0x16f   : > { %1254 = vmatprep.mubr.f32.mxu0 %v8952_v63  ;;  %2972 = vmatprep.mubr.f32.mxu1 %v8952_v63 }
 0x172   : > { %1257 = vmatmul.mubr.f32.gmra.mrb[26].mxu0 %v9149_v12  ;;  %2975 = vmatmul.mubr.f32.gmra.mrb[26].mxu1 %v9149_v12  ;;  %v5075_v12 = vpack.c.bf16 %v9158_v10, %v9156_v39  ;;  %v9182_v39 = vand.u32 4294901760, %v9181_v46  ;;  %v9184_v10 = vand.u32 4294901760, %v9183_v19  ;;  %v9206_v19 = vld [vmem:[#allocation111_spill] sm:$0xff] }
 0x173   : > { %1262 = vmatprep.mubr.f32.mxu0 %v8952_v63  ;;  %2980 = vmatprep.mubr.f32.mxu1 %v8952_v63 }
 0x176   : > { %1265 = vmatmul.mubr.f32.gmra.mrb[28].mxu0 %v6872_v17  ;;  %2983 = vmatmul.mubr.f32.gmra.mrb[28].mxu1 %v6872_v17  ;;  %v9153_v17 = vld [vmem:[#allocation20_spill] sm:$0xff] }
 0x177   : > { %1270 = vmatprep.mubr.f32.mxu0 %v8952_v63  ;;  %2988 = vmatprep.mubr.f32.mxu1 %v8952_v63  ;;  %v9154_v8 = vand.u32 4294901760, %v9153_v17  ;;  %v9172_v17 = vld [vmem:[#allocation104_spill] sm:$0xff] }
 0x179   : > { %v5265_v2 = vpack.c.bf16 %v9154_v8, %v9152_v4  ;;  %v9171_v4 = vand.u32 4294901760, %v9071_v55  ;;  %v9179_v8 = vld [vmem:[#allocation47_spill] sm:$0xff] }
 0x17a   : > { %1273 = vmatmul.mubr.f32.gmra.mrb[30].mxu0 %v6918_v3  ;;  %2991 = vmatmul.mubr.f32.gmra.mrb[30].mxu1 %v6918_v3  ;;  %v9159_v3 = vld [vmem:[#allocation31_spill] sm:$0xff]  ;;  %v9180_v55 = vand.u32 4294901760, %v9179_v8 }
 0x17b   : > { %1375 = vmatprep.mubr.f32.mxu0 %v8952_v63  ;;  %3093 = vmatprep.mubr.f32.mxu1 %v8952_v63  ;;  %v9160_v34 = vand.u32 4294901760, %v9159_v3  ;;  %v9185_v3 = vld [vmem:[#allocation55_spill] sm:$0xff] }
 0x17c   : > { %v9186_v1 = vand.u32 4294901760, %v9185_v3 }
 0x17d   : > { %v5267_v21 = vpack.c.bf16 %v9162_v58, %v9160_v34  ;;  %v5269_v58 = vpack.c.bf16 %v9167_v45, %v9166_v11  ;;  %v9169_v34 = vand.u32 4294901760, %v9069_v56  ;;  %v9189_v45 = vld [vmem:[#allocation106_spill] sm:$0xff] }
 0x17e   : > { %1379 = vmatmul.mubr.f32.vlgmr.msra.gmra.mrb[0].mxu0 %v9163_v35  ;;  %3097 = vmatmul.mubr.f32.vlgmr.msra.gmra.mrb[0].mxu1 %v9163_v35  ;;  %v9168_v35 = vand.u32 4294901760, %v9068_v9  ;;  %v9174_v9 = vand.u32 4294901760, %v9173_v40 }
 0x17f   : > { %1384 = vmatprep.mubr.f32.mxu0 %v8952_v63  ;;  %5074 = vmatpush1.bf16.msra.mxu0 %v5073_v28  ;;  %v9170_v28 = vand.u32 4294901760, %v9070_v16 }
 0x180   : > { %5266 = vmatpush1.bf16.msra.mxu1 %v5265_v2  ;;  %3102 = vmatprep.mubr.f32.mxu1 %v8952_v63  ;;  %v5079_v36 = vpack.c.bf16 %v9169_v34, %v9168_v35  ;;  %v5081_v56 = vpack.c.bf16 %v9176_v54, %v9174_v9  ;;  %v9192_v34 = vld [vmem:[#allocation50_spill] sm:$0xff]  ;;  %v9199_v54 = vand.u32 4294901760, %v9198_v53  ;;  %v9224_v53 = vand.u32 4294901760, %v6339_v29 }
 0x181   : > { %5076 = vmatprep.subr.bf16.mxu0 %v5075_v12  ;;  %5268 = vmatprep.subr.bf16.mxu1 %v5267_v21  ;;  %v5271_v49 = vpack.c.bf16 %v9171_v4, %v9170_v28  ;;  %v9177_v21 = vld [vmem:[#allocation46_spill] sm:$0xff]  ;;  %v5083_v12 = vpack.c.bf16 %v9184_v10, %v9182_v39  ;;  %v9207_v10 = vand.u32 4294901760, %v6256_v24  ;;  %v9229_v29 = vand.u32 4294901760, %v6345_v27 }
 0x182   : > { %1388 = vmatmul.mubr.f32.gmra.mrb[2].mxu0 %v9172_v17  ;;  %3106 = vmatmul.mubr.f32.gmra.mrb[2].mxu1 %v9172_v17  ;;  %v9178_v16 = vand.u32 4294901760, %v9177_v21  ;;  %v9194_v4 = vld [vmem:[#allocation58_spill] sm:$0xff]  ;;  %v9196_v17 = vld [vmem:[#allocation59_spill] sm:$0xff]  ;;  %v9200_v21 = vld [vmem:[#allocation53_spill] sm:$0xff]  ;;  %v9237_v27 = vand.u32 4294901760, %v9042_v52 }
 0x183   : > { %1393 = vmatprep.mubr.f32.mxu0 %v8952_v63  ;;  %3111 = vmatprep.mubr.f32.mxu1 %v8952_v63  ;;  %v9197_v40 = vand.u32 4294901760, %v9196_v17  ;;  %v9222_v17 = vand.u32 4294901760, %v9019_v61  ;;  %v9244_v52 = vld [vmem:[#allocation75_spill] sm:$0xff] }
 0x184   : > { %5078 = vmatpush1.bf16.msra.mxu0 %v5077_v57  ;;  %5270 = vmatpush1.bf16.msra.mxu1 %v5269_v58  ;;  %v5273_v2 = vpack.c.bf16 %v9180_v55, %v9178_v16  ;;  %v9188_v57 = vand.u32 4294901760, %v9187_v51  ;;  %v9190_v58 = vld [vmem:[#allocation48_spill] sm:$0xff]  ;;  %v9201_v16 = vand.u32 4294901760, %v9200_v21  ;;  %v9202_v55 = vld [vmem:[#allocation65_spill] sm:$0xff]  ;;  %v9210_v51 = vand.u32 4294901760, %v8998_v31 }
 0x185   : > { %5080 = vmatprep.subr.bf16.mxu0 %v5079_v36  ;;  %5272 = vmatprep.subr.bf16.mxu1 %v5271_v49  ;;  %v9191_v35 = vand.u32 4294901760, %v9190_v58  ;;  %v9193_v36 = vand.u32 4294901760, %v9192_v34  ;;  %v9195_v49 = vand.u32 4294901760, %v9194_v4  ;;  %v9217_v4 = vld [vmem:[#allocation112_spill] sm:$0xff] }
 0x186   : > { %v5275_v11 = vpack.c.bf16 %v9188_v57, %v9186_v1  ;;  %1397 = vmatmul.mubr.f32.gmra.mrb[4].mxu0 %v9189_v45  ;;  %3115 = vmatmul.mubr.f32.gmra.mrb[4].mxu1 %v9189_v45  ;;  %v5087_v8 = vpack.c.bf16 %v9201_v16, %v9199_v54  ;;  %v9209_v1 = vand.u32 4294901760, %v8997_v22  ;;  %v9212_v45 = vand.u32 4294901760, %v9003_v33  ;;  %v9226_v21 = vld [vmem:[#allocation116_spill] sm:$0xff] }
 0x187   : > { %1402 = vmatprep.mubr.f32.mxu0 %v8952_v63  ;;  %3120 = vmatprep.mubr.f32.mxu1 %v8952_v63  ;;  %v5085_v28 = vpack.c.bf16 %v9193_v36, %v9191_v35  ;;  %v5277_v9 = vpack.c.bf16 %v9197_v40, %v9195_v49  ;;  %v9213_v35 = vld [vmem:[#allocation77_spill] sm:$0xff]  ;;  %v9215_v36 = vld [vmem:[#allocation78_spill] sm:$0xff]  ;;  %v9219_v22 = vand.u32 4294901760, %v9012_v20  ;;  %v9221_v33 = vand.u32 4294901760, %v9015_v18 }
 0x188   : > { %5082 = vmatpush1.bf16.msra.mxu0 %v5081_v56  ;;  %5274 = vmatpush1.bf16.msra.mxu1 %v5273_v2  ;;  %v9203_v56 = vand.u32 4294901760, %v9202_v55  ;;  %v9204_v2 = vld [vmem:[#allocation66_spill] sm:$0xff]  ;;  %v5281_v57 = vpack.c.bf16 %v9210_v51, %v9209_v1  ;;  %v9214_v34 = vand.u32 4294901760, %v9213_v35  ;;  %v9223_v40 = vand.u32 4294901760, %v9020_v60  ;;  %v9257_v1 = vld [vmem:[#allocation39_spill] sm:$0xff]  ;;  %v9263_v35 = vld [vmem:[#allocation64_spill] sm:$0xff] }
 0x189   : > { %5084 = vmatprep.subr.bf16.mxu0 %v5083_v12  ;;  %5276 = vmatprep.subr.bf16.mxu1 %v5275_v11  ;;  %v9205_v46 = vand.u32 4294901760, %v9204_v2  ;;  %v9208_v12 = vand.u32 4294901760, %v6263_v62  ;;  %v9211_v11 = vand.u32 4294901760, %v8999_v23  ;;  %v9218_v62 = vand.u32 4294901760, %v9011_v43  ;;  %v9235_v2 = vld [vmem:[#allocation118_spill] sm:$0xff] }
 0x18a   : > { %1406 = vmatmul.mubr.f32.gmra.mrb[6].mxu0 %v9206_v19  ;;  %3124 = vmatmul.mubr.f32.gmra.mrb[6].mxu1 %v9206_v19  ;;  %v9220_v23 = vand.u32 4294901760, %v9014_v47  ;;  %v9225_v54 = vand.u32 4294901760, %v6341_v50  ;;  %v9227_v47 = vand.u32 4294901760, %v9027_v38  ;;  %v9228_v20 = vand.u32 4294901760, %v9029_v25  ;;  %v9258_v51 = vld [vmem:[#allocation54_spill] sm:$0xff] }
 0x18b   : > { %v5279_v39 = vpack.c.bf16 %v9205_v46, %v9203_v56  ;;  %1411 = vmatprep.mubr.f32.mxu0 %v8952_v63  ;;  %3129 = vmatprep.mubr.f32.mxu1 %v8952_v63  ;;  %v5089_v3 = vpack.c.bf16 %v9208_v12, %v9207_v10  ;;  %v5091_v58 = vpack.c.bf16 %v9212_v45, %v9211_v11  ;;  %v9230_v50 = vand.u32 4294901760, %v9030_v44  ;;  %v9247_v46 = vld [vmem:[#allocation93_spill] sm:$0xff]  ;;  %v9252_v10 = vld [vmem:[#allocation28_spill] sm:$0xff] }
 0x18c   : > { %5086 = vmatpush1.bf16.msra.mxu0 %v5085_v28  ;;  %5278 = vmatpush1.bf16.msra.mxu1 %v5277_v9  ;;  %v9216_v28 = vand.u32 4294901760, %v9215_v36  ;;  %v5093_v31 = vpack.c.bf16 %v9219_v22, %v9218_v62  ;;  %v5285_v49 = vpack.c.bf16 %v9221_v33, %v9220_v23  ;;  %v5095_v9 = vpack.c.bf16 %v9223_v40, %v9222_v17  ;;  %v9255_v12 = vld [vmem:[#allocation37_spill] sm:$0xff]  ;;  %v9265_v36 = vld [vmem:[#allocation60_spill] sm:$0xff]  ;;  %v9270_v22 = vld [vmem:[#allocation71_spill] sm:$0xff] }
 0x18d   : > { %5088 = vmatprep.subr.bf16.mxu0 %v5087_v8  ;;  %5280 = vmatprep.subr.bf16.mxu1 %v5279_v39  ;;  %v5287_v43 = vpack.c.bf16 %v9225_v54, %v9224_v53  ;;  %v5097_v18 = vpack.c.bf16 %v9228_v20, %v9227_v47  ;;  %v5289_v61 = vpack.c.bf16 %v9230_v50, %v9229_v29  ;;  %v9231_v60 = vand.u32 4294901760, %v9034_v7  ;;  %v9248_v39 = vld [vmem:[#allocation10_spill] sm:$0xff]  ;;  %v9260_v11 = vld [vmem:[#allocation49_spill] sm:$0xff]  ;;  %v9273_v33 = vld [vmem:[#allocation88_spill] sm:$0xff] }
 0x18e   : > { %v5283_v24 = vpack.c.bf16 %v9216_v28, %v9214_v34  ;;  %1415 = vmatmul.mubr.f32.gmra.mrb[8].mxu0 %v9217_v4  ;;  %3133 = vmatmul.mubr.f32.gmra.mrb[8].mxu1 %v9217_v4  ;;  %v9232_v16 = vand.u32 4294901760, %v9035_v48  ;;  %v9233_v55 = vand.u32 4294901760, %v6383_v30  ;;  %v9234_v56 = vand.u32 4294901760, %v9053_v15  ;;  %v9240_v48 = vld [vmem:[#allocation123_spill] sm:$0xff]  ;;  %v9261_v45 = vld [vmem:[#allocation57_spill] sm:$0xff]  ;;  %v9268_v4 = vld [vmem:[#allocation76_spill] sm:$0xff] }
 0x18f   : > { %1420 = vmatprep.mubr.f32.mxu0 %v8952_v63  ;;  %3138 = vmatprep.mubr.f32.mxu1 %v8952_v63  ;;  %v9236_v44 = vand.u32 4294901760, %v9054_v32  ;;  %v9238_v30 = vand.u32 4294901760, %v6389_v59  ;;  %v9239_v15 = vand.u32 4294901760, %v9044_v6  ;;  %v9241_v59 = vld [vmem:[#allocation124_spill] sm:$0xff]  ;;  %v9242_v6 = vld [vmem:[#allocation125_spill] sm:$0xff]  ;;  %v9243_v32 = vld [vmem:[#allocation70_spill] sm:$0xff] }
 0x190   : > { %5090 = vmatpush1.bf16.msra.mxu0 %v5089_v3  ;;  %5282 = vmatpush1.bf16.msra.mxu1 %v5281_v57  ;;  %v5099_v8 = vpack.c.bf16 %v9232_v16, %v9231_v60  ;;  %v5291_v38 = vpack.c.bf16 %v9234_v56, %v9233_v55  ;;  %v9256_v3 = vld [vmem:[#allocation45_spill] sm:$0xff]  ;;  %v9266_v28 = vld [vmem:[#allocation67_spill] sm:$0xff]  ;;  %v3801_v56 = vpop.xlane.xlu0 %3800  ;;  %v383_v60 = vld [vmem:[#allocation2 + $0x18] sm:$0xff] }
 0x191   : > { %5092 = vmatprep.subr.bf16.mxu0 %v5091_v58  ;;  %5284 = vmatprep.subr.bf16.mxu1 %v5283_v24  ;;  %v5101_v25 = vpack.c.bf16 %v9237_v27, %v9236_v44  ;;  %v5293_v7 = vpack.c.bf16 %v9239_v15, %v9238_v30  ;;  %v9262_v58 = vld [vmem:[#allocation51_spill] sm:$0xff]  ;;  %v9267_v24 = vld [vmem:[#allocation61_spill] sm:$0xff]  ;;  %v3785_v27 = vld [vmem:[#allocation4 + $0x8] sm:$0xff] }
 0x192   : > { %1424 = vmatmul.mubr.f32.gmra.mrb[10].mxu0 %v9226_v21  ;;  %3142 = vmatmul.mubr.f32.gmra.mrb[10].mxu1 %v9226_v21  ;;  %v9272_v23 = vld [vmem:[#allocation73_spill] sm:$0xff]  ;;  %v9275_v17 = vld [vmem:[#allocation83_spill] sm:$0xff]  ;;  %v2069_v16 = vld [vmem:[#allocation3 + $0x18] sm:$0xff] }
 0x193   : > { %1429 = vmatprep.mubr.f32.mxu0 %v8952_v63  ;;  %3147 = vmatprep.mubr.f32.mxu1 %v8952_v63  ;;  %v9276_v40 = vld [vmem:[#allocation89_spill] sm:$0xff]  ;;  %v9278_v53 = vld [vmem:[#allocation95_spill] sm:$0xff] }
 0x194   : > { %5094 = vmatpush1.bf16.msra.mxu0 %v5093_v31  ;;  %5286 = vmatpush1.bf16.msra.mxu1 %v5285_v49  ;;  %v9271_v31 = vld [vmem:[#allocation79_spill] sm:$0xff]  ;;  %v9281_v21 = vld [vmem:[#allocation97_spill] sm:$0xff] }
 0x195   : > { %5096 = vmatprep.subr.bf16.mxu0 %v5095_v9  ;;  %5288 = vmatprep.subr.bf16.mxu1 %v5287_v43  ;;  %v9277_v9 = vld [vmem:[#allocation85_spill] sm:$0xff]  ;;  %v9280_v43 = vld [vmem:[#allocation92_spill] sm:$0xff]  ;;  %v382_v50 = vld [vmem:[#allocation2 + $0x10] sm:$0xff] }
 0x196   : > { %1433 = vmatmul.mubr.f32.gmra.mrb[12].mxu0 %v9235_v2  ;;  %3151 = vmatmul.mubr.f32.gmra.mrb[12].mxu1 %v9235_v2  ;;  %v3784_v55 = vld [vmem:[#allocation4] sm:$0xff] }
 0x197   : > { %1438 = vmatprep.mubr.f32.mxu0 %v8952_v63  ;;  %3156 = vmatprep.mubr.f32.mxu1 %v8952_v63  ;;  %v3832_v2 = vadd.f32 %v3801_v56, %v3784_v55  ;;  %v3796_v34 = vld [vmem:[#allocation4 + $0x60] sm:$0xff] }
 0x198   : > { %5098 = vmatpush1.bf16.msra.mxu0 %v5097_v18  ;;  %5290 = vmatpush1.bf16.msra.mxu1 %v5289_v61  ;;  %v380_v49 = vld [vmem:[#allocation2] sm:$0xff]  ;;  %v2068_v61 = vld [vmem:[#allocation3 + $0x10] sm:$0xff] }
 0x199   : > { %5100 = vmatprep.subr.bf16.mxu0 %v5099_v8  ;;  %5292 = vmatprep.subr.bf16.mxu1 %v5291_v38  ;;  %v3805_v8 = vpop.xlane.xlu1 %3804 }
 0x19a   : > { %1442 = vmatmul.mubr.f32.gmra.mrb[14].mxu0 %v9240_v48  ;;  %3160 = vmatmul.mubr.f32.gmra.mrb[14].mxu1 %v9240_v48  ;;  %v3834_v38 = vadd.f32 %v3805_v8, %v3786_v14  ;;  %v3788_v48 = vld [vmem:[#allocation4 + $0x20] sm:$0xff] }
 0x19b   : > { %1447 = vmatprep.mubr.f32.mxu0 %v8952_v63  ;;  %3165 = vmatprep.mubr.f32.mxu1 %v8952_v63 }
 0x19c   : > { %5102 = vmatpush1.bf16.msra.mxu0 %v5101_v25  ;;  %5294 = vmatpush1.bf16.msra.mxu1 %v5293_v7  ;;  %v3803_v25 = vpop.xlane.xlu0 %3802 }
 0x19d   : > { %5104 = vmatprep.subr.bf16.mxu0 %v9093_v5  ;;  %5296 = vmatprep.subr.bf16.mxu1 %v9094_v0  ;;  %v9245_v5 = vld [vmem:[#allocation82_spill] sm:$0xff]  ;;  %v9246_v0 = vld [vmem:[#allocation87_spill] sm:$0xff]  ;;  %v3807_v44 = vpop.xlane.xlu1 %3806  ;;  %v3833_v15 = vadd.f32 %v3803_v25, %v3785_v27  ;;  %v384_v27 = vld [vmem:[#allocation2 + $0x20] sm:$0xff] }
 0x19e   : > { %1451 = vmatmul.mubr.f32.gmra.mrb[16].mxu0 %v9241_v59  ;;  %3169 = vmatmul.mubr.f32.gmra.mrb[16].mxu1 %v9241_v59  ;;  %v2070_v25 = vld [vmem:[#allocation3 + $0x20] sm:$0xff] }
 0x19f   : > { %1456 = vmatprep.mubr.f32.mxu0 %v8952_v63  ;;  %3174 = vmatprep.mubr.f32.mxu1 %v8952_v63 }
 0x1a0   : > { %v3809_v59 = vpop.xlane.xlu0 %3808 }
 0x1a1   : > { %v3811_v7 = vpop.xlane.xlu1 %3810 }
 0x1a2   : > { %1460 = vmatmul.mubr.f32.gmra.mrb[18].mxu0 %v9242_v6  ;;  %3178 = vmatmul.mubr.f32.gmra.mrb[18].mxu1 %v9242_v6 }
 0x1a3   : > { %1465 = vmatprep.mubr.f32.mxu0 %v8952_v63  ;;  %3183 = vmatprep.mubr.f32.mxu1 %v8952_v63 }
 0x1a6   : > { %1469 = vmatmul.mubr.f32.gmra.mrb[20].mxu0 %v9243_v32  ;;  %3187 = vmatmul.mubr.f32.gmra.mrb[20].mxu1 %v9243_v32  ;;  %v3836_v32 = vadd.f32 %v3809_v59, %v3788_v48 }
 0x1a7   : > { %1474 = vmatprep.mubr.f32.mxu0 %v8952_v63  ;;  %3192 = vmatprep.mubr.f32.mxu1 %v8952_v63 }
 0x1aa   : > { %1478 = vmatmul.mubr.f32.gmra.mrb[22].mxu0 %v9244_v52  ;;  %3196 = vmatmul.mubr.f32.gmra.mrb[22].mxu1 %v9244_v52  ;;  %v3791_v52 = vld [vmem:[#allocation4 + $0x38] sm:$0xff] }
 0x1ab   : > { %1483 = vmatprep.mubr.f32.mxu0 %v8952_v63  ;;  %3201 = vmatprep.mubr.f32.mxu1 %v8952_v63 }
 0x1ae   : > { %1487 = vmatmul.mubr.f32.gmra.mrb[24].mxu0 %v9245_v5  ;;  %3205 = vmatmul.mubr.f32.gmra.mrb[24].mxu1 %v9245_v5  ;;  %v3815_v5 = vpop.xlane.xlu1 %3814 }
 0x1af   : > { %1492 = vmatprep.mubr.f32.mxu0 %v8952_v63  ;;  %3210 = vmatprep.mubr.f32.mxu1 %v8952_v63 }
 0x1b2   : > { %1496 = vmatmul.mubr.f32.gmra.mrb[26].mxu0 %v9246_v0  ;;  %3214 = vmatmul.mubr.f32.gmra.mrb[26].mxu1 %v9246_v0  ;;  %v3790_v0 = vld [vmem:[#allocation4 + $0x30] sm:$0xff] }
 0x1b3   : > { %1501 = vmatprep.mubr.f32.mxu0 %v8952_v63  ;;  %3219 = vmatprep.mubr.f32.mxu1 %v8952_v63 }
 0x1b6   : > { %1505 = vmatmul.mubr.f32.gmra.mrb[28].mxu0 %v9247_v46  ;;  %3223 = vmatmul.mubr.f32.gmra.mrb[28].mxu1 %v9247_v46  ;;  %v3813_v46 = vpop.xlane.xlu0 %3812 }
 0x1b7   : > { %1510 = vmatprep.mubr.f32.mxu0 %v8952_v63  ;;  %3228 = vmatprep.mubr.f32.mxu1 %v8952_v63  ;;  %v3838_v19 = vadd.f32 %v3813_v46, %v3790_v0  ;;  %v386_v0 = vld [vmem:[#allocation2 + $0x30] sm:$0xff] }
 0x1b8   : > { %v2072_v46 = vld [vmem:[#allocation3 + $0x30] sm:$0xff] }
 0x1ba   : > { %1514 = vmatmul.mubr.f32.gmra.mrb[30].mxu0 %v9248_v39  ;;  %3232 = vmatmul.mubr.f32.gmra.mrb[30].mxu1 %v9248_v39  ;;  %v3839_v39 = vadd.f32 %v3815_v5, %v3791_v52 }
 0x1bb   : > { %1680 = vmatprep.mubr.f32.mxu0 %v8952_v63  ;;  %3398 = vmatprep.mubr.f32.mxu1 %v8952_v63 }
 0x1be   : > { %4842 = vmatmul.mubr.msk.f32.vlgmr.msra.gmra.mrb[0].mxu0 %vm6372_vm1, %v9072_v26  ;;  %4890 = vmatmul.mubr.msk.f32.vlgmr.msra.gmra.mrb[0].mxu1 %vm6372_vm1, %v9072_v26 }
 0x1bf   : > { %1687 = vmatprep.mubr.f32.mxu0 %v8952_v63  ;;  %5106 = vmatpush1.bf16.msra.mxu0 %v9103_v13  ;;  %v9250_v13 = vld [vmem:[#allocation25_spill] sm:$0xff] }
 0x1c0   : > { %5298 = vmatpush1.bf16.msra.mxu1 %v9104_v42  ;;  %3405 = vmatprep.mubr.f32.mxu1 %v8952_v63  ;;  %v9251_v42 = vld [vmem:[#allocation34_spill] sm:$0xff] }
 0x1c1   : > { %5108 = vmatprep.subr.bf16.mxu0 %v9105_v37  ;;  %5300 = vmatprep.subr.bf16.mxu1 %v9106_v41  ;;  %v9253_v37 = vld [vmem:[#allocation42_spill] sm:$0xff] }
 0x1c2   : > { %4843 = vmatmul.mubr.msk.f32.gmra.mrb[2].mxu0 %vm6433_vm2, %v9072_v26  ;;  %4891 = vmatmul.mubr.msk.f32.gmra.mrb[2].mxu1 %vm6433_vm2, %v9072_v26 }
 0x1c3   : > { %1694 = vmatprep.mubr.f32.mxu0 %v8952_v63  ;;  %3412 = vmatprep.mubr.f32.mxu1 %v8952_v63 }
 0x1c4   : > { %5110 = vmatpush1.bf16.msra.mxu0 %v9250_v13  ;;  %5302 = vmatpush1.bf16.msra.mxu1 %v9251_v42  ;;  %v3793_v13 = vld [vmem:[#allocation4 + $0x48] sm:$0xff]  ;;  %v3819_v42 = vpop.xlane.xlu1 %3818 }
 0x1c5   : > { %5112 = vmatprep.subr.bf16.mxu0 %v9252_v10  ;;  %5304 = vmatprep.subr.bf16.mxu1 %v9253_v37  ;;  %v3792_v10 = vld [vmem:[#allocation4 + $0x40] sm:$0xff]  ;;  %v3817_v37 = vpop.xlane.xlu0 %3816  ;;  %v3841_v41 = vadd.f32 %v3819_v42, %v3793_v13 }
 0x1c6   : > { %4844 = vmatmul.mubr.msk.f32.gmra.mrb[4].mxu0 %vm6445_vm3, %v9072_v26  ;;  %4892 = vmatmul.mubr.msk.f32.gmra.mrb[4].mxu1 %vm6445_vm3, %v9072_v26 }
 0x1c7   : > { %1701 = vmatprep.mubr.f32.mxu0 %v8952_v63  ;;  %3419 = vmatprep.mubr.f32.mxu1 %v8952_v63 }
 0x1c8   : > { %5114 = vmatpush1.bf16.msra.mxu0 %v9255_v12  ;;  %5306 = vmatpush1.bf16.msra.mxu1 %v9256_v3  ;;  %v3840_v12 = vadd.f32 %v3817_v37, %v3792_v10  ;;  %v3795_v3 = vld [vmem:[#allocation4 + $0x58] sm:$0xff] }
 0x1c9   : > { %5116 = vmatprep.subr.bf16.mxu0 %v9257_v1  ;;  %5308 = vmatprep.subr.bf16.mxu1 %v9258_v51  ;;  %v3823_v1 = vpop.xlane.xlu1 %3822  ;;  %v3794_v51 = vld [vmem:[#allocation4 + $0x50] sm:$0xff]  ;;  %v3821_v57 = vpop.xlane.xlu0 %3820 }
 0x1ca   : > { %4845 = vmatmul.mubr.msk.f32.gmra.mrb[6].mxu0 %vm6503_vm4, %v9072_v26  ;;  %4893 = vmatmul.mubr.msk.f32.gmra.mrb[6].mxu1 %vm6503_vm4, %v9072_v26 }
 0x1cb   : > { %1708 = vmatprep.mubr.f32.mxu0 %v8952_v63  ;;  %3426 = vmatprep.mubr.f32.mxu1 %v8952_v63 }
 0x1cc   : > { %5118 = vmatpush1.bf16.msra.mxu0 %v9260_v11  ;;  %5310 = vmatpush1.bf16.msra.mxu1 %v9261_v45  ;;  %v3843_v11 = vadd.f32 %v3823_v1, %v3795_v3  ;;  %v3842_v45 = vadd.f32 %v3821_v57, %v3794_v51  ;;  %v388_v51 = vld [vmem:[#allocation2 + $0x40] sm:$0xff] }
 0x1cd   : > { %5120 = vmatprep.subr.bf16.mxu0 %v9262_v58  ;;  %5312 = vmatprep.subr.bf16.mxu1 %v9263_v35  ;;  %v3797_v58 = vld [vmem:[#allocation4 + $0x68] sm:$0xff]  ;;  %v3827_v35 = vpop.xlane.xlu1 %3826  ;;  %v2074_v57 = vld [vmem:[#allocation3 + $0x40] sm:$0xff] }
 0x1ce   : > { %4846 = vmatmul.mubr.msk.f32.gmra.mrb[8].mxu0 %vm6512_vm5, %v9072_v26  ;;  %4894 = vmatmul.mubr.msk.f32.gmra.mrb[8].mxu1 %vm6512_vm5, %v9072_v26 }
 0x1cf   : > { %1715 = vmatprep.mubr.f32.mxu0 %v8952_v63  ;;  %3433 = vmatprep.mubr.f32.mxu1 %v8952_v63 }
 0x1d0   : > { %5122 = vmatpush1.bf16.msra.mxu0 %v9265_v36  ;;  %5314 = vmatpush1.bf16.msra.mxu1 %v9266_v28  ;;  %v3825_v36 = vpop.xlane.xlu0 %3824  ;;  %v3845_v28 = vadd.f32 %v3827_v35, %v3797_v58 }
 0x1d1   : > { %5124 = vmatprep.subr.bf16.mxu0 %v9267_v24  ;;  %5316 = vmatprep.subr.bf16.mxu1 %v9268_v4  ;;  %v3844_v24 = vadd.f32 %v3825_v36, %v3796_v34  ;;  %v3799_v4 = vld [vmem:[#allocation4 + $0x78] sm:$0xff]  ;;  %v3831_v62 = vpop.xlane.xlu1 %3830 }
 0x1d2   : > { %4847 = vmatmul.mubr.msk.f32.gmra.mrb[10].mxu0 %vm6567_vm6, %v9072_v26  ;;  %4895 = vmatmul.mubr.msk.f32.gmra.mrb[10].mxu1 %vm6567_vm6, %v9072_v26 }
 0x1d3   : > { %1722 = vmatprep.mubr.f32.mxu0 %v8952_v63  ;;  %3440 = vmatprep.mubr.f32.mxu1 %v8952_v63 }
 0x1d4   : > { %5126 = vmatpush1.bf16.msra.mxu0 %v9270_v22  ;;  %5318 = vmatpush1.bf16.msra.mxu1 %v9271_v31  ;;  %v3798_v22 = vld [vmem:[#allocation4 + $0x70] sm:$0xff]  ;;  %v3829_v31 = vpop.xlane.xlu0 %3828 }
 0x1d5   : > { %5128 = vmatprep.subr.bf16.mxu0 %v9272_v23  ;;  %5320 = vmatprep.subr.bf16.mxu1 %v9273_v33  ;;  %v3847_v23 = vadd.f32 %v3831_v62, %v3799_v4  ;;  %v3846_v33 = vadd.f32 %v3829_v31, %v3798_v22  ;;  %v390_v22 = vld [vmem:[#allocation2 + $0x50] sm:$0xff] }
 0x1d6   : > { %4848 = vmatmul.mubr.msk.f32.gmra.mrb[12].mxu0 %vm6583_vm7, %v9072_v26  ;;  %4896 = vmatmul.mubr.msk.f32.gmra.mrb[12].mxu1 %vm6583_vm7, %v9072_v26  ;;  %v2076_v31 = vld [vmem:[#allocation3 + $0x50] sm:$0xff] }
 0x1d7   : > { %1729 = vmatprep.mubr.f32.mxu0 %v8952_v63  ;;  %3447 = vmatprep.mubr.f32.mxu1 %v8952_v63 }
 0x1d8   : > { %5130 = vmatpush1.bf16.msra.mxu0 %v9275_v17  ;;  %5322 = vmatpush1.bf16.msra.mxu1 %v9276_v40  ;;  %v2066_v17 = vld [vmem:[#allocation3] sm:$0xff]  ;;  %v381_v40 = vld [vmem:[#allocation2 + $0x8] sm:$0xff] }
 0x1d9   : > { %5132 = vmatprep.subr.bf16.mxu0 %v9277_v9  ;;  %5324 = vmatprep.subr.bf16.mxu1 %v9278_v53  ;;  %v2067_v9 = vld [vmem:[#allocation3 + $0x8] sm:$0xff] }
 0x1da   : > { %4849 = vmatmul.mubr.msk.f32.gmra.mrb[14].mxu0 %vm6638_vm8, %v9072_v26  ;;  %4897 = vmatmul.mubr.msk.f32.gmra.mrb[14].mxu1 %vm6638_vm8, %v9072_v26 }
 0x1db   : > { %1736 = vmatprep.mubr.f32.mxu0 %v8952_v63  ;;  %3454 = vmatprep.mubr.f32.mxu1 %v8952_v63 }
 0x1dc   : > { %5134 = vmatpush1.bf16.msra.mxu0 %v9280_v43  ;;  %5326 = vmatpush1.bf16.msra.mxu1 %v9281_v21 }
 0x1de   : > { %4850 = vmatmul.mubr.msk.f32.gmra.mrb[16].mxu0 %vm6648_vm9, %v9072_v26  ;;  %4898 = vmatmul.mubr.msk.f32.gmra.mrb[16].mxu1 %vm6648_vm9, %v9072_v26 }
 0x1df   : > { %1743 = vmatprep.mubr.f32.mxu0 %v8952_v63  ;;  %3461 = vmatprep.mubr.f32.mxu1 %v8952_v63 }
 0x1e2   : > { %4851 = vmatmul.mubr.msk.f32.gmra.mrb[18].mxu0 %vm6707_vm10, %v9072_v26  ;;  %4899 = vmatmul.mubr.msk.f32.gmra.mrb[18].mxu1 %vm6707_vm10, %v9072_v26 }
 0x1e3   : > { %1750 = vmatprep.mubr.f32.mxu0 %v8952_v63  ;;  %3468 = vmatprep.mubr.f32.mxu1 %v8952_v63 }
 0x1e6   : > { %4852 = vmatmul.mubr.msk.f32.gmra.mrb[20].mxu0 %vm6717_vm11, %v9072_v26  ;;  %4900 = vmatmul.mubr.msk.f32.gmra.mrb[20].mxu1 %vm6717_vm11, %v9072_v26 }
 0x1e7   : > { %1757 = vmatprep.mubr.f32.mxu0 %v8952_v63  ;;  %3475 = vmatprep.mubr.f32.mxu1 %v8952_v63 }
 0x1ea   : > { %4853 = vmatmul.mubr.msk.f32.gmra.mrb[22].mxu0 %vm6772_vm12, %v9072_v26  ;;  %4901 = vmatmul.mubr.msk.f32.gmra.mrb[22].mxu1 %vm6772_vm12, %v9072_v26 }
 0x1eb   : > { %1764 = vmatprep.mubr.f32.mxu0 %v8952_v63  ;;  %3482 = vmatprep.mubr.f32.mxu1 %v8952_v63 }
 0x1ee   : > { %4854 = vmatmul.mubr.msk.f32.gmra.mrb[24].mxu0 %vm6784_vm13, %v9072_v26  ;;  %4902 = vmatmul.mubr.msk.f32.gmra.mrb[24].mxu1 %vm6784_vm13, %v9072_v26 }
 0x1ef   : > { %1771 = vmatprep.mubr.f32.mxu0 %v8952_v63  ;;  %3489 = vmatprep.mubr.f32.mxu1 %v8952_v63 }
 0x1f2   : > { %4855 = vmatmul.mubr.msk.f32.gmra.mrb[26].mxu0 %vm6839_vm14, %v9072_v26  ;;  %4903 = vmatmul.mubr.msk.f32.gmra.mrb[26].mxu1 %vm6839_vm14, %v9072_v26 }
 0x1f3   : > { %1778 = vmatprep.mubr.f32.mxu0 %v8952_v63  ;;  %3496 = vmatprep.mubr.f32.mxu1 %v8952_v63 }
 0x1f6   : > { %4856 = vmatmul.mubr.msk.f32.gmra.mrb[28].mxu0 %vm6854_vm15, %v9072_v26  ;;  %4904 = vmatmul.mubr.msk.f32.gmra.mrb[28].mxu1 %vm6854_vm15, %v9072_v26 }
 0x1f7   : > { %1785 = vmatprep.mubr.f32.mxu0 %v8952_v63  ;;  %3503 = vmatprep.mubr.f32.mxu1 %v8952_v63 }
 0x1fa   : > { %4857 = vmatmul.mubr.msk.f32.gmra.mrb[30].mxu0 %vm6909_vm0, %v9072_v26  ;;  %4905 = vmatmul.mubr.msk.f32.gmra.mrb[30].mxu1 %vm6909_vm0, %v9072_v26 }
 0x1fb   : > { %1889 = vmatprep.mubr.f32.mxu0 %v8952_v63  ;;  %3607 = vmatprep.mubr.f32.mxu1 %v8952_v63 }
 0x1fe   : > { %4858 = vmatmul.mubr.msk.f32.vlgmr.msra.gmra.mrb[0].mxu0 %vm6372_vm1, %v9072_v26  ;;  %4906 = vmatmul.mubr.msk.f32.vlgmr.msra.gmra.mrb[0].mxu1 %vm6372_vm1, %v9072_v26  ;;  %vm3848_vm1 = vcmask 7168  }
 0x1ff   : > { %1896 = vmatprep.mubr.f32.mxu0 %v8952_v63  ;;  %3614 = vmatprep.mubr.f32.mxu1 %v8952_v63  ;;  %3851 = vst.msk [vmem:[#allocation4 + $0x10] sm:$0xff] %vm3848_vm1, %v3834_v38  ;;  %3849 = vst.msk [vmem:[#allocation4] sm:$0xff] %vm3848_vm1, %v3832_v2 }
 0x200   : > { %3850 = vst.msk [vmem:[#allocation4 + $0x8] sm:$0xff] %vm3848_vm1, %v3833_v15  ;;  %3853 = vst.msk [vmem:[#allocation4 + $0x20] sm:$0xff] %vm3848_vm1, %v3836_v32  ;;  %v2071_v15 = vld [vmem:[#allocation3 + $0x28] sm:$0xff] }
 0x201   : > { %3856 = vst.msk [vmem:[#allocation4 + $0x38] sm:$0xff] %vm3848_vm1, %v3839_v39  ;;  %3855 = vst.msk [vmem:[#allocation4 + $0x30] sm:$0xff] %vm3848_vm1, %v3838_v19  ;;  %v387_v39 = vld [vmem:[#allocation2 + $0x38] sm:$0xff] }
 0x202   : > { %4859 = vmatmul.mubr.msk.f32.gmra.mrb[2].mxu0 %vm6433_vm2, %v9072_v26  ;;  %4907 = vmatmul.mubr.msk.f32.gmra.mrb[2].mxu1 %vm6433_vm2, %v9072_v26  ;;  %3858 = vst.msk [vmem:[#allocation4 + $0x48] sm:$0xff] %vm3848_vm1, %v3841_v41  ;;  %3857 = vst.msk [vmem:[#allocation4 + $0x40] sm:$0xff] %vm3848_vm1, %v3840_v12  ;;  %v2073_v19 = vld [vmem:[#allocation3 + $0x38] sm:$0xff] }
 0x203   : > { %1903 = vmatprep.mubr.f32.mxu0 %v8952_v63  ;;  %3621 = vmatprep.mubr.f32.mxu1 %v8952_v63  ;;  %3860 = vst.msk [vmem:[#allocation4 + $0x58] sm:$0xff] %vm3848_vm1, %v3843_v11  ;;  %3859 = vst.msk [vmem:[#allocation4 + $0x50] sm:$0xff] %vm3848_vm1, %v3842_v45  ;;  %v389_v11 = vld [vmem:[#allocation2 + $0x48] sm:$0xff] }
 0x204   : > { %3862 = vst.msk [vmem:[#allocation4 + $0x68] sm:$0xff] %vm3848_vm1, %v3845_v28  ;;  %3861 = vst.msk [vmem:[#allocation4 + $0x60] sm:$0xff] %vm3848_vm1, %v3844_v24  ;;  %v2075_v45 = vld [vmem:[#allocation3 + $0x48] sm:$0xff] }
 0x205   : > { %3864 = vst.msk [vmem:[#allocation4 + $0x78] sm:$0xff] %vm3848_vm1, %v3847_v23  ;;  %3863 = vst.msk [vmem:[#allocation4 + $0x70] sm:$0xff] %vm3848_vm1, %v3846_v33  ;;  %v391_v23 = vld [vmem:[#allocation2 + $0x58] sm:$0xff] }
 0x206   : > { %4860 = vmatmul.mubr.msk.f32.gmra.mrb[4].mxu0 %vm6445_vm3, %v9072_v26  ;;  %4908 = vmatmul.mubr.msk.f32.gmra.mrb[4].mxu1 %vm6445_vm3, %v9072_v26  ;;  %v2077_v33 = vld [vmem:[#allocation3 + $0x58] sm:$0xff] }
 0x207   : > { %1910 = vmatprep.mubr.f32.mxu0 %v8952_v63  ;;  %3628 = vmatprep.mubr.f32.mxu1 %v8952_v63 }
 0x20a   : > { %4861 = vmatmul.mubr.msk.f32.gmra.mrb[6].mxu0 %vm6503_vm4, %v9072_v26  ;;  %4909 = vmatmul.mubr.msk.f32.gmra.mrb[6].mxu1 %vm6503_vm4, %v9072_v26 }
 0x20b   : > { %1917 = vmatprep.mubr.f32.mxu0 %v8952_v63  ;;  %3635 = vmatprep.mubr.f32.mxu1 %v8952_v63 }
 0x20e   : > { %4862 = vmatmul.mubr.msk.f32.gmra.mrb[8].mxu0 %vm6512_vm5, %v9072_v26  ;;  %4910 = vmatmul.mubr.msk.f32.gmra.mrb[8].mxu1 %vm6512_vm5, %v9072_v26 }
 0x20f   : > { %1924 = vmatprep.mubr.f32.mxu0 %v8952_v63  ;;  %3642 = vmatprep.mubr.f32.mxu1 %v8952_v63 }
 0x212   : > { %4863 = vmatmul.mubr.msk.f32.gmra.mrb[10].mxu0 %vm6567_vm6, %v9072_v26  ;;  %4911 = vmatmul.mubr.msk.f32.gmra.mrb[10].mxu1 %vm6567_vm6, %v9072_v26 }
 0x213   : > { %1931 = vmatprep.mubr.f32.mxu0 %v8952_v63  ;;  %3649 = vmatprep.mubr.f32.mxu1 %v8952_v63 }
 0x216   : > { %4864 = vmatmul.mubr.msk.f32.gmra.mrb[12].mxu0 %vm6583_vm7, %v9072_v26  ;;  %4912 = vmatmul.mubr.msk.f32.gmra.mrb[12].mxu1 %vm6583_vm7, %v9072_v26 }
 0x217   : > { %1938 = vmatprep.mubr.f32.mxu0 %v8952_v63  ;;  %3656 = vmatprep.mubr.f32.mxu1 %v8952_v63 }
 0x21a   : > { %4865 = vmatmul.mubr.msk.f32.gmra.mrb[14].mxu0 %vm6638_vm8, %v9072_v26  ;;  %4913 = vmatmul.mubr.msk.f32.gmra.mrb[14].mxu1 %vm6638_vm8, %v9072_v26 }
 0x21b   : > { %1945 = vmatprep.mubr.f32.mxu0 %v8952_v63  ;;  %3663 = vmatprep.mubr.f32.mxu1 %v8952_v63 }
 0x21e   : > { %4866 = vmatmul.mubr.msk.f32.gmra.mrb[16].mxu0 %vm6648_vm9, %v9072_v26  ;;  %4914 = vmatmul.mubr.msk.f32.gmra.mrb[16].mxu1 %vm6648_vm9, %v9072_v26 }
 0x21f   : > { %1952 = vmatprep.mubr.f32.mxu0 %v8952_v63  ;;  %3670 = vmatprep.mubr.f32.mxu1 %v8952_v63 }
 0x222   : > { %4867 = vmatmul.mubr.msk.f32.gmra.mrb[18].mxu0 %vm6707_vm10, %v9072_v26  ;;  %4915 = vmatmul.mubr.msk.f32.gmra.mrb[18].mxu1 %vm6707_vm10, %v9072_v26 }
 0x223   : > { %1959 = vmatprep.mubr.f32.mxu0 %v8952_v63  ;;  %3677 = vmatprep.mubr.f32.mxu1 %v8952_v63 }
 0x226   : > { %4868 = vmatmul.mubr.msk.f32.gmra.mrb[20].mxu0 %vm6717_vm11, %v9072_v26  ;;  %4916 = vmatmul.mubr.msk.f32.gmra.mrb[20].mxu1 %vm6717_vm11, %v9072_v26 }
 0x227   : > { %1966 = vmatprep.mubr.f32.mxu0 %v8952_v63  ;;  %3684 = vmatprep.mubr.f32.mxu1 %v8952_v63 }
 0x22a   : > { %4869 = vmatmul.mubr.msk.f32.gmra.mrb[22].mxu0 %vm6772_vm12, %v9072_v26  ;;  %4917 = vmatmul.mubr.msk.f32.gmra.mrb[22].mxu1 %vm6772_vm12, %v9072_v26 }
 0x22b   : > { %1973 = vmatprep.mubr.f32.mxu0 %v8952_v63  ;;  %3691 = vmatprep.mubr.f32.mxu1 %v8952_v63 }
 0x22e   : > { %4870 = vmatmul.mubr.msk.f32.gmra.mrb[24].mxu0 %vm6784_vm13, %v9072_v26  ;;  %4918 = vmatmul.mubr.msk.f32.gmra.mrb[24].mxu1 %vm6784_vm13, %v9072_v26 }
 0x22f   : > { %1980 = vmatprep.mubr.f32.mxu0 %v8952_v63  ;;  %3698 = vmatprep.mubr.f32.mxu1 %v8952_v63 }
 0x232   : > { %4871 = vmatmul.mubr.msk.f32.gmra.mrb[26].mxu0 %vm6839_vm14, %v9072_v26  ;;  %4919 = vmatmul.mubr.msk.f32.gmra.mrb[26].mxu1 %vm6839_vm14, %v9072_v26 }
 0x233   : > { %1987 = vmatprep.mubr.f32.mxu0 %v8952_v63  ;;  %3705 = vmatprep.mubr.f32.mxu1 %v8952_v63 }
 0x236   : > { %4872 = vmatmul.mubr.msk.f32.gmra.mrb[28].mxu0 %vm6854_vm15, %v9072_v26  ;;  %4920 = vmatmul.mubr.msk.f32.gmra.mrb[28].mxu1 %vm6854_vm15, %v9072_v26 }
 0x237   : > { %1994 = vmatprep.mubr.f32.mxu0 %v8952_v63  ;;  %3712 = vmatprep.mubr.f32.mxu1 %v8952_v63  ;;  %v3787_v63 = vld [vmem:[#allocation4 + $0x18] sm:$0xff] }
 0x238   : > { %v3835_v30 = vadd.f32 %v3807_v44, %v3787_v63 }
 0x23a   : > { %4873 = vmatmul.mubr.msk.f32.gmra.mrb[30].mxu0 %vm6909_vm0, %v9072_v26  ;;  %4921 = vmatmul.mubr.msk.f32.gmra.mrb[30].mxu1 %vm6909_vm0, %v9072_v26  ;;  %3852 = vst.msk [vmem:[#allocation4 + $0x18] sm:$0xff] %vm3848_vm1, %v3835_v30  ;;  %v3789_v26 = vld [vmem:[#allocation4 + $0x28] sm:$0xff] }
 0x23b   : > { %v3837_v6 = vadd.f32 %v3811_v7, %v3789_v26  ;;  %v385_v30 = vld [vmem:[#allocation2 + $0x28] sm:$0xff] }
 0x23d   : > { %3854 = vst.msk [vmem:[#allocation4 + $0x28] sm:$0xff] %vm3848_vm1, %v3837_v6 }
 0x2d1   : > { %v1892_v53 = vpop.f32.mrb[0].mxu0  ;;  %v3610_v54 = vpop.f32.mrb[0].mxu1 }
 0x2d2   : > { %v2002_v43 = vadd.f32 %v1892_v53, %v380_v49  ;;  %v1894_v21 = vpop.f32.mrb[1].mxu0  ;;  %v3720_v47 = vadd.f32 %v3610_v54, %v2066_v17  ;;  %v3612_v20 = vpop.f32.mrb[1].mxu1 }
 0x2d3   : > { %v2003_v18 = vadd.f32 %v1894_v21, %v381_v40  ;;  %v3721_v29 = vadd.f32 %v3612_v20, %v2067_v9  ;;  %v2078_v20 = vld [vmem:[#allocation3 + $0x60] sm:$0xff] }
 0x2d4   : > { %2034 = vst [vmem:[#allocation2] sm:$0xff] %v2002_v43  ;;  %3752 = vst [vmem:[#allocation3] sm:$0xff] %v3720_v47  ;;  %v392_v47 = vld [vmem:[#allocation2 + $0x60] sm:$0xff] }
 0x2d5   : > { %2035 = vst [vmem:[#allocation2 + $0x8] sm:$0xff] %v2003_v18  ;;  %3753 = vst [vmem:[#allocation3 + $0x8] sm:$0xff] %v3721_v29  ;;  %v1899_v14 = vpop.f32.mrb[2].mxu0  ;;  %v3617_v8 = vpop.f32.mrb[2].mxu1  ;;  %v393_v18 = vld [vmem:[#allocation2 + $0x68] sm:$0xff] }
 0x2d6   : > { %v2004_v55 = vadd.f32 %v1899_v14, %v382_v50  ;;  %v1901_v56 = vpop.f32.mrb[3].mxu0  ;;  %v3722_v38 = vadd.f32 %v3617_v8, %v2068_v61  ;;  %v3619_v2 = vpop.f32.mrb[3].mxu1  ;;  %v2079_v29 = vld [vmem:[#allocation3 + $0x68] sm:$0xff] }
 0x2d7   : > { %v2005_v63 = vadd.f32 %v1901_v56, %v383_v60  ;;  %v3723_v44 = vadd.f32 %v3619_v2, %v2069_v16  ;;  %v2080_v2 = vld [vmem:[#allocation3 + $0x70] sm:$0xff] }
 0x2d8   : > { %2036 = vst [vmem:[#allocation2 + $0x10] sm:$0xff] %v2004_v55  ;;  %3754 = vst [vmem:[#allocation3 + $0x10] sm:$0xff] %v3722_v38  ;;  %v394_v38 = vld [vmem:[#allocation2 + $0x70] sm:$0xff] }
 0x2d9   : > { %2037 = vst [vmem:[#allocation2 + $0x18] sm:$0xff] %v2005_v63  ;;  %3755 = vst [vmem:[#allocation3 + $0x18] sm:$0xff] %v3723_v44  ;;  %v1906_v26 = vpop.f32.mrb[4].mxu0  ;;  %v3624_v7 = vpop.f32.mrb[4].mxu1  ;;  %v395_v63 = vld [vmem:[#allocation2 + $0x78] sm:$0xff] }
 0x2da   : > { %v2006_v48 = vadd.f32 %v1906_v26, %v384_v27  ;;  %v1908_v59 = vpop.f32.mrb[5].mxu0  ;;  %v3724_v6 = vadd.f32 %v3624_v7, %v2070_v25  ;;  %v3626_v32 = vpop.f32.mrb[5].mxu1  ;;  %v2081_v44 = vld [vmem:[#allocation3 + $0x78] sm:$0xff] }
 0x2db   : > { %v2007_v52 = vadd.f32 %v1908_v59, %v385_v30  ;;  %v3725_v5 = vadd.f32 %v3626_v32, %v2071_v15  ;;  %v2082_v32 = vld [vmem:[#allocation3 + $0x80] sm:$0xff] }
 0x2dc   : > { %2038 = vst [vmem:[#allocation2 + $0x20] sm:$0xff] %v2006_v48  ;;  %3756 = vst [vmem:[#allocation3 + $0x20] sm:$0xff] %v3724_v6  ;;  %v396_v6 = vld [vmem:[#allocation2 + $0x80] sm:$0xff] }
 0x2dd   : > { %2039 = vst [vmem:[#allocation2 + $0x28] sm:$0xff] %v2007_v52  ;;  %3757 = vst [vmem:[#allocation3 + $0x28] sm:$0xff] %v3725_v5  ;;  %v1913_v13 = vpop.f32.mrb[6].mxu0  ;;  %v3631_v42 = vpop.f32.mrb[6].mxu1  ;;  %v397_v52 = vld [vmem:[#allocation2 + $0x88] sm:$0xff] }
 0x2de   : > { %v2008_v10 = vadd.f32 %v1913_v13, %v386_v0  ;;  %v1915_v37 = vpop.f32.mrb[7].mxu0  ;;  %v3726_v41 = vadd.f32 %v3631_v42, %v2072_v46  ;;  %v3633_v12 = vpop.f32.mrb[7].mxu1  ;;  %v2083_v5 = vld [vmem:[#allocation3 + $0x88] sm:$0xff] }
 0x2df   : > { %v2009_v3 = vadd.f32 %v1915_v37, %v387_v39  ;;  %v3727_v1 = vadd.f32 %v3633_v12, %v2073_v19  ;;  %v2084_v12 = vld [vmem:[#allocation3 + $0x90] sm:$0xff] }
 0x2e0   : > { %2040 = vst [vmem:[#allocation2 + $0x30] sm:$0xff] %v2008_v10  ;;  %3758 = vst [vmem:[#allocation3 + $0x30] sm:$0xff] %v3726_v41  ;;  %v398_v41 = vld [vmem:[#allocation2 + $0x90] sm:$0xff] }
 0x2e1   : > { %2041 = vst [vmem:[#allocation2 + $0x38] sm:$0xff] %v2009_v3  ;;  %3759 = vst [vmem:[#allocation3 + $0x38] sm:$0xff] %v3727_v1  ;;  %v1920_v58 = vpop.f32.mrb[8].mxu0  ;;  %v3638_v35 = vpop.f32.mrb[8].mxu1  ;;  %v399_v3 = vld [vmem:[#allocation2 + $0x98] sm:$0xff] }
 0x2e2   : > { %v2010_v34 = vadd.f32 %v1920_v58, %v388_v51  ;;  %v1922_v36 = vpop.f32.mrb[9].mxu0  ;;  %v3728_v28 = vadd.f32 %v3638_v35, %v2074_v57  ;;  %v3640_v24 = vpop.f32.mrb[9].mxu1  ;;  %v2085_v1 = vld [vmem:[#allocation3 + $0x98] sm:$0xff] }
 0x2e3   : > { %v2011_v4 = vadd.f32 %v1922_v36, %v389_v11  ;;  %v3729_v62 = vadd.f32 %v3640_v24, %v2075_v45  ;;  %v2086_v24 = vld [vmem:[#allocation3 + $0xa0] sm:$0xff] }
 0x2e4   : > { %2042 = vst [vmem:[#allocation2 + $0x40] sm:$0xff] %v2010_v34  ;;  %3760 = vst [vmem:[#allocation3 + $0x40] sm:$0xff] %v3728_v28  ;;  %v400_v28 = vld [vmem:[#allocation2 + $0xa0] sm:$0xff] }
 0x2e5   : > { %2043 = vst [vmem:[#allocation2 + $0x48] sm:$0xff] %v2011_v4  ;;  %3761 = vst [vmem:[#allocation3 + $0x48] sm:$0xff] %v3729_v62  ;;  %v1927_v49 = vpop.f32.mrb[10].mxu0  ;;  %v3645_v17 = vpop.f32.mrb[10].mxu1  ;;  %v401_v4 = vld [vmem:[#allocation2 + $0xa8] sm:$0xff] }
 0x2e6   : > { %v2012_v40 = vadd.f32 %v1927_v49, %v390_v22  ;;  %v1929_v9 = vpop.f32.mrb[11].mxu0  ;;  %v3730_v53 = vadd.f32 %v3645_v17, %v2076_v31  ;;  %v3647_v54 = vpop.f32.mrb[11].mxu1  ;;  %v2087_v62 = vld [vmem:[#allocation3 + $0xa8] sm:$0xff] }
 0x2e7   : > { %v2013_v43 = vadd.f32 %v1929_v9, %v391_v23  ;;  %v3731_v21 = vadd.f32 %v3647_v54, %v2077_v33  ;;  %v2088_v54 = vld [vmem:[#allocation3 + $0xb0] sm:$0xff] }
 0x2e8   : > { %2044 = vst [vmem:[#allocation2 + $0x50] sm:$0xff] %v2012_v40  ;;  %3762 = vst [vmem:[#allocation3 + $0x50] sm:$0xff] %v3730_v53  ;;  %v402_v53 = vld [vmem:[#allocation2 + $0xb0] sm:$0xff] }
 0x2e9   : > { %2045 = vst [vmem:[#allocation2 + $0x58] sm:$0xff] %v2013_v43  ;;  %3763 = vst [vmem:[#allocation3 + $0x58] sm:$0xff] %v3731_v21  ;;  %v1934_v50 = vpop.f32.mrb[12].mxu0  ;;  %v3652_v61 = vpop.f32.mrb[12].mxu1  ;;  %v403_v43 = vld [vmem:[#allocation2 + $0xb8] sm:$0xff] }
 0x2ea   : > { %v2014_v60 = vadd.f32 %v1934_v50, %v392_v47  ;;  %v1936_v16 = vpop.f32.mrb[13].mxu0  ;;  %v3732_v14 = vadd.f32 %v3652_v61, %v2078_v20  ;;  %v3654_v8 = vpop.f32.mrb[13].mxu1  ;;  %v2089_v21 = vld [vmem:[#allocation3 + $0xb8] sm:$0xff] }
 0x2eb   : > { %v2015_v55 = vadd.f32 %v1936_v16, %v393_v18  ;;  %v3733_v56 = vadd.f32 %v3654_v8, %v2079_v29  ;;  %v2090_v8 = vld [vmem:[#allocation3 + $0xc0] sm:$0xff] }
 0x2ec   : > { %2046 = vst [vmem:[#allocation2 + $0x60] sm:$0xff] %v2014_v60  ;;  %3764 = vst [vmem:[#allocation3 + $0x60] sm:$0xff] %v3732_v14  ;;  %v404_v14 = vld [vmem:[#allocation2 + $0xc0] sm:$0xff] }
 0x2ed   : > { %2047 = vst [vmem:[#allocation2 + $0x68] sm:$0xff] %v2015_v55  ;;  %3765 = vst [vmem:[#allocation3 + $0x68] sm:$0xff] %v3733_v56  ;;  %v1941_v27 = vpop.f32.mrb[14].mxu0  ;;  %v3659_v25 = vpop.f32.mrb[14].mxu1  ;;  %v405_v55 = vld [vmem:[#allocation2 + $0xc8] sm:$0xff] }
 0x2ee   : > { %v2016_v30 = vadd.f32 %v1941_v27, %v394_v38  ;;  %v1943_v15 = vpop.f32.mrb[15].mxu0  ;;  %v3734_v26 = vadd.f32 %v3659_v25, %v2080_v2  ;;  %v3661_v7 = vpop.f32.mrb[15].mxu1  ;;  %v2091_v56 = vld [vmem:[#allocation3 + $0xc8] sm:$0xff] }
 0x2ef   : > { %v2017_v48 = vadd.f32 %v1943_v15, %v395_v63  ;;  %v3735_v59 = vadd.f32 %v3661_v7, %v2081_v44  ;;  %v2092_v7 = vld [vmem:[#allocation3 + $0xd0] sm:$0xff] }
 0x2f0   : > { %2048 = vst [vmem:[#allocation2 + $0x70] sm:$0xff] %v2016_v30  ;;  %3766 = vst [vmem:[#allocation3 + $0x70] sm:$0xff] %v3734_v26  ;;  %v406_v26 = vld [vmem:[#allocation2 + $0xd0] sm:$0xff] }
 0x2f1   : > { %2049 = vst [vmem:[#allocation2 + $0x78] sm:$0xff] %v2017_v48  ;;  %3767 = vst [vmem:[#allocation3 + $0x78] sm:$0xff] %v3735_v59  ;;  %v1948_v0 = vpop.f32.mrb[16].mxu0  ;;  %v3666_v46 = vpop.f32.mrb[16].mxu1  ;;  %v407_v48 = vld [vmem:[#allocation2 + $0xd8] sm:$0xff] }
 0x2f2   : > { %v2018_v39 = vadd.f32 %v1948_v0, %v396_v6  ;;  %v1950_v19 = vpop.f32.mrb[17].mxu0  ;;  %v3736_v13 = vadd.f32 %v3666_v46, %v2082_v32  ;;  %v3668_v42 = vpop.f32.mrb[17].mxu1  ;;  %v2093_v59 = vld [vmem:[#allocation3 + $0xd8] sm:$0xff] }
 0x2f3   : > { %v2019_v10 = vadd.f32 %v1950_v19, %v397_v52  ;;  %v3737_v37 = vadd.f32 %v3668_v42, %v2083_v5  ;;  %v2094_v42 = vld [vmem:[#allocation3 + $0xe0] sm:$0xff] }
 0x2f4   : > { %2050 = vst [vmem:[#allocation2 + $0x80] sm:$0xff] %v2018_v39  ;;  %3768 = vst [vmem:[#allocation3 + $0x80] sm:$0xff] %v3736_v13  ;;  %v408_v13 = vld [vmem:[#allocation2 + $0xe0] sm:$0xff] }
 0x2f5   : > { %2051 = vst [vmem:[#allocation2 + $0x88] sm:$0xff] %v2019_v10  ;;  %3769 = vst [vmem:[#allocation3 + $0x88] sm:$0xff] %v3737_v37  ;;  %v1955_v51 = vpop.f32.mrb[18].mxu0  ;;  %v3673_v57 = vpop.f32.mrb[18].mxu1  ;;  %v409_v10 = vld [vmem:[#allocation2 + $0xe8] sm:$0xff] }
 0x2f6   : > { %v2020_v11 = vadd.f32 %v1955_v51, %v398_v41  ;;  %v1957_v45 = vpop.f32.mrb[19].mxu0  ;;  %v3738_v58 = vadd.f32 %v3673_v57, %v2084_v12  ;;  %v3675_v35 = vpop.f32.mrb[19].mxu1  ;;  %v2095_v37 = vld [vmem:[#allocation3 + $0xe8] sm:$0xff] }
 0x2f7   : > { %v2021_v34 = vadd.f32 %v1957_v45, %v399_v3  ;;  %v3739_v36 = vadd.f32 %v3675_v35, %v2085_v1  ;;  %v2096_v35 = vld [vmem:[#allocation3 + $0xf0] sm:$0xff] }
 0x2f8   : > { %2052 = vst [vmem:[#allocation2 + $0x90] sm:$0xff] %v2020_v11  ;;  %3770 = vst [vmem:[#allocation3 + $0x90] sm:$0xff] %v3738_v58  ;;  %v410_v58 = vld [vmem:[#allocation2 + $0xf0] sm:$0xff] }
 0x2f9   : > { %2053 = vst [vmem:[#allocation2 + $0x98] sm:$0xff] %v2021_v34  ;;  %3771 = vst [vmem:[#allocation3 + $0x98] sm:$0xff] %v3739_v36  ;;  %v1962_v22 = vpop.f32.mrb[20].mxu0  ;;  %v3680_v31 = vpop.f32.mrb[20].mxu1  ;;  %v411_v34 = vld [vmem:[#allocation2 + $0xf8] sm:$0xff] }
 0x2fa   : > { %v2022_v23 = vadd.f32 %v1962_v22, %v400_v28  ;;  %v1964_v33 = vpop.f32.mrb[21].mxu0  ;;  %v3740_v49 = vadd.f32 %v3680_v31, %v2086_v24  ;;  %v3682_v17 = vpop.f32.mrb[21].mxu1  ;;  %v2097_v36 = vld [vmem:[#allocation3 + $0xf8] sm:$0xff] }
 0x2fb   : > { %v2023_v40 = vadd.f32 %v1964_v33, %v401_v4  ;;  %v3741_v9 = vadd.f32 %v3682_v17, %v2087_v62  ;;  %v3869_v17 = vld [vmem:[#allocation4] sm:$0xff] (!%p4922_p7) }
 0x2fc   : > { %2054 = vst [vmem:[#allocation2 + $0xa0] sm:$0xff] %v2022_v23  ;;  %3772 = vst [vmem:[#allocation3 + $0xa0] sm:$0xff] %v3740_v49  ;;  %v7749_v49 = vld [vmem:[#allocation4 + $0x10] sm:$0xff] (!%p4922_p7) }
 0x2fd   : > { %2055 = vst [vmem:[#allocation2 + $0xa8] sm:$0xff] %v2023_v40  ;;  %3773 = vst [vmem:[#allocation3 + $0xa8] sm:$0xff] %v3741_v9  ;;  %v1969_v47 = vpop.f32.mrb[22].mxu0  ;;  %v3687_v20 = vpop.f32.mrb[22].mxu1  ;;  %v3872_v40 = vld [vmem:[#allocation4 + $0x18] sm:$0xff] (!%p4922_p7)  ;;  %v5894_v9 = vmov (!%p4922_p7), 0  }
 0x2fe   : > { %v2024_v18 = vadd.f32 %v1969_v47, %v402_v53  ;;  %v1971_v29 = vpop.f32.mrb[23].mxu0  ;;  %v3742_v50 = vadd.f32 %v3687_v20, %v2088_v54  ;;  %v3689_v61 = vpop.f32.mrb[23].mxu1  ;;  %5693 = vset.pattern.permute.xlu1 (!%p4922_p7), %v5894_v9  ;;  %5692 = vset.pattern.permute.xlu0 (!%p4922_p7), %v5894_v9  ;;  %v3919_v53 = vmax.f32 (!%p4922_p7), %v7749_v49, 1.0  ;;  %v3917_v54 = vmax.f32 (!%p4922_p7), %v3869_v17, 1.0  ;;  %v3874_v20 = vld [vmem:[#allocation4 + $0x28] sm:$0xff] (!%p4922_p7) }
 0x2ff   : > { %v2025_v60 = vadd.f32 %v1971_v29, %v403_v43  ;;  %v3743_v16 = vadd.f32 %v3689_v61, %v2089_v21  ;;  %v3870_v43 = vld [vmem:[#allocation4 + $0x8] sm:$0xff] (!%p4922_p7)  ;;  %v3920_v21 = vmax.f32 (!%p4922_p7), %v3872_v40, 1.0  ;;  %v3922_v29 = vmax.f32 (!%p4922_p7), %v3874_v20, 1.0  ;;  %v3876_v61 = vld [vmem:[#allocation4 + $0x38] sm:$0xff] (!%p4922_p7) }
 0x300   : > { %2056 = vst [vmem:[#allocation2 + $0xb0] sm:$0xff] %v2024_v18  ;;  %3774 = vst [vmem:[#allocation3 + $0xb0] sm:$0xff] %v3742_v50  ;;  %3945 = vperm.xlu1 (!%p4922_p7), %5693, %v3919_v53   ;;  %3935 = vperm.xlu0 (!%p4922_p7), %5692, %v3917_v54   ;;  %v3918_v47 = vmax.f32 (!%p4922_p7), %v3870_v43, 1.0  ;;  %v3873_v18 = vld [vmem:[#allocation4 + $0x20] sm:$0xff] (!%p4922_p7) }
 0x301   : > { %2057 = vst [vmem:[#allocation2 + $0xb8] sm:$0xff] %v2025_v60  ;;  %3775 = vst [vmem:[#allocation3 + $0xb8] sm:$0xff] %v3743_v16  ;;  %v1976_v38 = vpop.f32.mrb[24].mxu0  ;;  %v3694_v2 = vpop.f32.mrb[24].mxu1  ;;  %v3921_v50 = vmax.f32 (!%p4922_p7), %v3873_v18, 1.0  ;;  %v3875_v60 = vld [vmem:[#allocation4 + $0x30] sm:$0xff] (!%p4922_p7) }
 0x302   : > { %v2026_v63 = vadd.f32 %v1976_v38, %v404_v14  ;;  %v1978_v44 = vpop.f32.mrb[25].mxu0  ;;  %v3744_v27 = vadd.f32 %v3694_v2, %v2090_v8  ;;  %v3696_v25 = vpop.f32.mrb[25].mxu1  ;;  %v3924_v16 = vmax.f32 (!%p4922_p7), %v3876_v61, 1.0  ;;  %v3923_v14 = vmax.f32 (!%p4922_p7), %v3875_v60, 1.0  ;;  %v7752_v8 = vld [vmem:[#allocation4 + $0x48] sm:$0xff] (!%p4922_p7)  ;;  %v7758_v2 = vld [vmem:[#allocation4 + $0x58] sm:$0xff] (!%p4922_p7) }
 0x303   : > { %v2027_v30 = vadd.f32 %v1978_v44, %v405_v55  ;;  %v3745_v15 = vadd.f32 %v3696_v25, %v2091_v56  ;;  %v7754_v55 = vld [vmem:[#allocation4 + $0x40] sm:$0xff] (!%p4922_p7)  ;;  %v3926_v56 = vmax.f32 (!%p4922_p7), %v7752_v8, 1.0  ;;  %v3928_v44 = vmax.f32 (!%p4922_p7), %v7758_v2, 1.0  ;;  %v7764_v25 = vld [vmem:[#allocation4 + $0x68] sm:$0xff] (!%p4922_p7) }
 0x304   : > { %2058 = vst [vmem:[#allocation2 + $0xc0] sm:$0xff] %v2026_v63  ;;  %3776 = vst [vmem:[#allocation3 + $0xc0] sm:$0xff] %v3744_v27  ;;  %3950 = vperm.xlu1 (!%p4922_p7), %5693, %v3920_v21   ;;  %3940 = vperm.xlu0 (!%p4922_p7), %5692, %v3918_v47   ;;  %v3925_v38 = vmax.f32 (!%p4922_p7), %v7754_v55, 1.0  ;;  %v7760_v63 = vld [vmem:[#allocation4 + $0x50] sm:$0xff] (!%p4922_p7) }
 0x305   : > { %2059 = vst [vmem:[#allocation2 + $0xc8] sm:$0xff] %v2027_v30  ;;  %3777 = vst [vmem:[#allocation3 + $0xc8] sm:$0xff] %v3745_v15  ;;  %v1983_v6 = vpop.f32.mrb[26].mxu0  ;;  %v3701_v32 = vpop.f32.mrb[26].mxu1  ;;  %v3927_v27 = vmax.f32 (!%p4922_p7), %v7760_v63, 1.0  ;;  %v7766_v30 = vld [vmem:[#allocation4 + $0x60] sm:$0xff] (!%p4922_p7) }
 0x306   : > { %v2028_v52 = vadd.f32 %v1983_v6, %v406_v26  ;;  %v1985_v5 = vpop.f32.mrb[27].mxu0  ;;  %v3746_v0 = vadd.f32 %v3701_v32, %v2092_v7  ;;  %v3703_v46 = vpop.f32.mrb[27].mxu1  ;;  %v3930_v15 = vmax.f32 (!%p4922_p7), %v7764_v25, 1.0  ;;  %v3929_v26 = vmax.f32 (!%p4922_p7), %v7766_v30, 1.0  ;;  %v7770_v7 = vld [vmem:[#allocation4 + $0x78] sm:$0xff] (!%p4922_p7) }
 0x307   : > { %v2029_v39 = vadd.f32 %v1985_v5, %v407_v48  ;;  %v3747_v19 = vadd.f32 %v3703_v46, %v2093_v59  ;;  %v7772_v48 = vld [vmem:[#allocation4 + $0x70] sm:$0xff] (!%p4922_p7)  ;;  %v3932_v59 = vmax.f32 (!%p4922_p7), %v7770_v7, 1.0  ;;  %v4924_v32 = vadd.f32 (!%p4922_p7), -1.0, %v3870_v43 }
 0x308   : > { %2060 = vst [vmem:[#allocation2 + $0xd0] sm:$0xff] %v2028_v52  ;;  %3778 = vst [vmem:[#allocation3 + $0xd0] sm:$0xff] %v3746_v0  ;;  %3960 = vperm.xlu1 (!%p4922_p7), %5693, %v3922_v29   ;;  %3955 = vperm.xlu0 (!%p4922_p7), %5692, %v3921_v50   ;;  %v3931_v6 = vmax.f32 (!%p4922_p7), %v7772_v48, 1.0  ;;  %v4923_v52 = vadd.f32 (!%p4922_p7), -1.0, %v3869_v17  ;;  %v4926_v46 = vadd.f32 (!%p4922_p7), -1.0, %v3872_v40 }
 0x309   : > { %2061 = vst [vmem:[#allocation2 + $0xd8] sm:$0xff] %v2029_v39  ;;  %3779 = vst [vmem:[#allocation3 + $0xd8] sm:$0xff] %v3747_v19  ;;  %v1990_v41 = vpop.f32.mrb[28].mxu0  ;;  %v3708_v12 = vpop.f32.mrb[28].mxu1  ;;  %v4286_v5 = vmax.f32 (!%p4922_p7), %v4924_v32, 1.0  ;;  %v4925_v39 = vadd.f32 (!%p4922_p7), -1.0, %v7749_v49 }
 0x30a   : > { %v2030_v3 = vadd.f32 %v1990_v41, %v408_v13  ;;  %v1992_v1 = vpop.f32.mrb[29].mxu0  ;;  %v3748_v51 = vadd.f32 %v3708_v12, %v2094_v42  ;;  %v3710_v57 = vpop.f32.mrb[29].mxu1  ;;  %v4285_v0 = vmax.f32 (!%p4922_p7), %v4923_v52, 1.0  ;;  %v4288_v19 = vmax.f32 (!%p4922_p7), %v4926_v46, 1.0  ;;  %v3888_v32 = vld [vmem:[#allocation2 + $0x18] sm:$0xff] (!%p4922_p7)  ;;  %v3891_v52 = vld [vmem:[#allocation2 + $0x30] sm:$0xff] (!%p4922_p7) }
 0x30b   : > { %v2031_v11 = vadd.f32 %v1992_v1, %v409_v10  ;;  %v3749_v45 = vadd.f32 %v3710_v57, %v2095_v37  ;;  %3868 = sbr.rel (%p4922_p7) target bundleno = 1062 (0x426), region = 44  ;;  %v4287_v13 = vmax.f32 (!%p4922_p7), %v4925_v39, 1.0  ;;  %v4928_v42 = vadd.f32 (!%p4922_p7), -1.0, %v3874_v20  ;;  %v3895_v46 = vld [vmem:[#allocation2 + $0x50] sm:$0xff] (!%p4922_p7)  ;;  %v3896_v39 = vld [vmem:[#allocation2 + $0x58] sm:$0xff] (!%p4922_p7) }
 0x30c   : > { %2062 = vst [vmem:[#allocation2 + $0xe0] sm:$0xff] %v2030_v3  ;;  %3780 = vst [vmem:[#allocation3 + $0xe0] sm:$0xff] %v3748_v51  ;;  %3970 = vperm.xlu1 (!%p4922_p7), %5693, %v3924_v16   ;;  %3965 = vperm.xlu0 (!%p4922_p7), %5692, %v3923_v14   ;;  %v4927_v10 = vadd.f32 (!%p4922_p7), -1.0, %v3873_v18  ;;  %v4930_v12 = vadd.f32 (!%p4922_p7), -1.0, %v3876_v61  ;;  %v4929_v3 = vadd.f32 (!%p4922_p7), -1.0, %v3875_v60  ;;  %v4932_v57 = vadd.f32 (!%p4922_p7), -1.0, %v7752_v8 }
 0x30d   : > { %2063 = vst [vmem:[#allocation2 + $0xe8] sm:$0xff] %v2031_v11  ;;  %3781 = vst [vmem:[#allocation3 + $0xe8] sm:$0xff] %v3749_v45  ;;  %v1997_v28 = vpop.f32.mrb[30].mxu0  ;;  %v3715_v24 = vpop.f32.mrb[30].mxu1  ;;  %v4290_v37 = vmax.f32 (!%p4922_p7), %v4928_v42, 1.0  ;;  %v4931_v11 = vadd.f32 (!%p4922_p7), -1.0, %v7754_v55 }
 0x30e   : > { %v2032_v4 = vadd.f32 %v1997_v28, %v410_v58  ;;  %v1999_v62 = vpop.f32.mrb[31].mxu0  ;;  %v3750_v22 = vadd.f32 %v3715_v24, %v2096_v35  ;;  %v3717_v31 = vpop.f32.mrb[31].mxu1  ;;  %v4289_v41 = vmax.f32 (!%p4922_p7), %v4927_v10, 1.0  ;;  %v4292_v1 = vmax.f32 (!%p4922_p7), %v4930_v12, 1.0  ;;  %v3893_v10 = vld [vmem:[#allocation2 + $0x40] sm:$0xff] (!%p4922_p7) }
 0x30f   : > { %v2033_v23 = vadd.f32 %v1999_v62, %v411_v34  ;;  %v3751_v33 = vadd.f32 %v3717_v31, %v2097_v36  ;;  %v4291_v51 = vmax.f32 (!%p4922_p7), %v4929_v3, 1.0  ;;  %v4294_v45 = vmax.f32 (!%p4922_p7), %v4932_v57, 1.0 }
 0x310   : > { %2064 = vst [vmem:[#allocation2 + $0xf0] sm:$0xff] %v2032_v4  ;;  %3782 = vst [vmem:[#allocation3 + $0xf0] sm:$0xff] %v3750_v22  ;;  %3980 = vperm.xlu1 (!%p4922_p7), %5693, %v3926_v56   ;;  %3975 = vperm.xlu0 (!%p4922_p7), %5692, %v3925_v38   ;;  %v4293_v58 = vmax.f32 (!%p4922_p7), %v4931_v11, 1.0  ;;  %v4934_v35 = vadd.f32 (!%p4922_p7), -1.0, %v7758_v2  ;;  %v4933_v34 = vadd.f32 (!%p4922_p7), -1.0, %v7760_v63  ;;  %v4936_v24 = vadd.f32 (!%p4922_p7), -1.0, %v7764_v25 }
 0x311   : > { %2065 = vst [vmem:[#allocation2 + $0xf8] sm:$0xff] %v2033_v23  ;;  %3783 = vst [vmem:[#allocation3 + $0xf8] sm:$0xff] %v3751_v33  ;;  %v4935_v4 = vadd.f32 (!%p4922_p7), -1.0, %v7766_v30  ;;  %v4938_v31 = vadd.f32 (!%p4922_p7), -1.0, %v7770_v7  ;;  %v4937_v23 = vadd.f32 (!%p4922_p7), -1.0, %v7772_v48  ;;  %v7817_v12 = vstv (!%p4922_p7), %s7802_s2  ;;  %v3900_v11 = vld [vmem:[#allocation2 + $0x78] sm:$0xff] (!%p4922_p7) }
 0x312   : > { %v4296_v36 = vmax.f32 %v4934_v35, 1.0  ;;  %v4295_v28 = vmax.f32 %v4933_v34, 1.0  ;;  %v4298_v62 = vmax.f32 %v4936_v24, 1.0  ;;  %v3898_v35 = vld [vmem:[#allocation2 + $0x68] sm:$0xff] }
 0x313   : > { %v4297_v22 = vmax.f32 %v4935_v4, 1.0  ;;  %v4300_v33 = vmax.f32 %v4938_v31, 1.0 }
 0x314   : > { %3990 = vperm.xlu1 %5693, %v3928_v44   ;;  %3985 = vperm.xlu0 %5692, %v3927_v27   ;;  %v3885_v27 = vld [vmem:[#allocation2] sm:$0xff] }
 0x318   : > { %4000 = vperm.xlu1 %5693, %v3930_v15   ;;  %3995 = vperm.xlu0 %5692, %v3929_v26   ;;  %v3889_v15 = vld [vmem:[#allocation2 + $0x20] sm:$0xff]  ;;  %v3890_v26 = vld [vmem:[#allocation2 + $0x28] sm:$0xff] }
 0x31c   : > { %4010 = vperm.xlu1 %5693, %v3932_v59   ;;  %4005 = vperm.xlu0 %5692, %v3931_v6   ;;  %v3887_v6 = vld [vmem:[#allocation2 + $0x10] sm:$0xff] }
 0x320   : > { %4100 = vperm.xlu1 %5693, %v3870_v43   ;;  %4095 = vperm.xlu0 %5692, %v3869_v17  }
 0x324   : > { %4110 = vperm.xlu1 %5693, %v3872_v40   ;;  %4105 = vperm.xlu0 %5692, %v7749_v49   ;;  %v4299_v49 = vmax.f32 %v4937_v23, 1.0 }
 0x328   : > { %4120 = vperm.xlu1 %5693, %v3874_v20   ;;  %4115 = vperm.xlu0 %5692, %v3873_v18  }
 0x32c   : > { %4130 = vperm.xlu1 %5693, %v3876_v61   ;;  %4125 = vperm.xlu0 %5692, %v3875_v60  }
 0x330   : > { %4308 = vperm.xlu1 %5693, %v4286_v5   ;;  %4303 = vperm.xlu0 %5692, %v4285_v0   ;;  %v3892_v0 = vld [vmem:[#allocation2 + $0x38] sm:$0xff] }
 0x334   : > { %4318 = vperm.xlu1 %5693, %v4288_v19   ;;  %4313 = vperm.xlu0 %5692, %v4287_v13  }
 0x338   : > { %4328 = vperm.xlu1 %5693, %v4290_v37   ;;  %4323 = vperm.xlu0 %5692, %v4289_v41   ;;  %v3894_v37 = vld [vmem:[#allocation2 + $0x48] sm:$0xff]  ;;  %v3899_v41 = vld [vmem:[#allocation2 + $0x70] sm:$0xff] }
 0x33c   : > { %4338 = vperm.xlu1 %5693, %v4292_v1   ;;  %4333 = vperm.xlu0 %5692, %v4291_v51  }
 0x340   : > { %4348 = vperm.xlu1 %5693, %v4294_v45   ;;  %4343 = vperm.xlu0 %5692, %v4293_v58   ;;  %v3897_v58 = vld [vmem:[#allocation2 + $0x60] sm:$0xff] }
 0x344   : > { %4358 = vperm.xlu1 %5693, %v4296_v36   ;;  %4353 = vperm.xlu0 %5692, %v4295_v28  }
 0x348   : > { %4368 = vperm.xlu1 %5693, %v4298_v62   ;;  %4363 = vperm.xlu0 %5692, %v4297_v22  }
 0x34c   : > { %4378 = vperm.xlu1 %5693, %v4300_v33   ;;  %4373 = vperm.xlu0 %5692, %v4299_v49  }
 0x350   : > { %4140 = vperm.xlu1 %5693, %v7752_v8   ;;  %4135 = vperm.xlu0 %5692, %v7754_v55  }
 0x354   : > { %4150 = vperm.xlu1 %5693, %v7758_v2   ;;  %4145 = vperm.xlu0 %5692, %v7760_v63  }
 0x358   : > { %4160 = vperm.xlu1 %5693, %v7764_v25   ;;  %4155 = vperm.xlu0 %5692, %v7766_v30   ;;  %v3886_v30 = vld [vmem:[#allocation2 + $0x8] sm:$0xff] }
 0x35c   : > { %4170 = vperm.xlu1 %5693, %v7770_v7   ;;  %4165 = vperm.xlu0 %5692, %v7772_v48  }
 0x37f   : > { %v3946_v17 = vpop.permute.xlu1 %3945  ;;  %v3936_v40 = vpop.permute.xlu0 %3935 }
 0x380   : > { %5694 = vrcp.f32 %v3946_v17  ;;  %v3903_v17 = vld [vmem:[#allocation2 + $0x90] sm:$0xff] }
 0x381   : > { %5696 = vrcp.f32 %v3936_v40  ;;  %v3904_v40 = vld [vmem:[#allocation2 + $0x98] sm:$0xff] }
 0x383   : > { %v3951_v9 = vpop.permute.xlu1 %3950  ;;  %v3941_v53 = vpop.permute.xlu0 %3940 }
 0x384   : > { %5698 = vrcp.f32 %v3951_v9  ;;  %v3901_v9 = vld [vmem:[#allocation2 + $0x80] sm:$0xff] }
 0x385   : > { %5700 = vrcp.f32 %v3941_v53 }
 0x387   : > { %v3961_v54 = vpop.permute.xlu1 %3960  ;;  %v3956_v43 = vpop.permute.xlu0 %3955 }
 0x388   : > { %5702 = vrcp.f32 %v3961_v54 }
 0x389   : > { %5704 = vrcp.f32 %v3956_v43 }
 0x38a   : > { %v5695_v2 = vpop.eup %5694 }
 0x38b   : > { %v3971_v21 = vpop.permute.xlu1 %3970  ;;  %v3966_v47 = vpop.permute.xlu0 %3965  ;;  %v7812_v13 = vmul.f32 %v5695_v2, %v3889_v15  ;;  %v7814_v42 = vmul.f32 %v5695_v2, %v3890_v26  ;;  %v3907_v2 = vld [vmem:[#allocation2 + $0xb0] sm:$0xff]  ;;  %v3905_v15 = vld [vmem:[#allocation2 + $0xa0] sm:$0xff]  ;;  %v3906_v26 = vld [vmem:[#allocation2 + $0xa8] sm:$0xff] }
 0x38c   : > { %5706 = vrcp.f32 %v3971_v21  ;;  %v5697_v63 = vpop.eup %5696 }
 0x38d   : > { %5708 = vrcp.f32 %v3966_v47  ;;  %v4014_v1 = vmul.f32 %v5697_v63, %v3885_v27  ;;  %v4015_v51 = vmul.f32 %v5697_v63, %v3886_v30  ;;  %v3908_v30 = vld [vmem:[#allocation2 + $0xb8] sm:$0xff] }
 0x38e   : > { %v5699_v44 = vpop.eup %5698 }
 0x38f   : > { %v3981_v20 = vpop.permute.xlu1 %3980  ;;  %v3976_v18 = vpop.permute.xlu0 %3975  ;;  %v7819_v57 = vmul.f32 %v5699_v44, %v3891_v52  ;;  %v4024_v4 = vmul.f32 %v5699_v44, %v3892_v0  ;;  %v4063_v52 = vld [vmem:[#allocation3 + $0x10] sm:$0xff] }
 0x390   : > { %5710 = vrcp.f32 %v3981_v20  ;;  %v5701_v25 = vpop.eup %5700 }
 0x391   : > { %5712 = vrcp.f32 %v3976_v18  ;;  %v4017_v28 = vmul.f32 %v5701_v25, %v3887_v6  ;;  %v4018_v24 = vmul.f32 %v5701_v25, %v3888_v32 }
 0x392   : > { %v5703_v59 = vpop.eup %5702 }
 0x393   : > { %v3991_v29 = vpop.permute.xlu1 %3990  ;;  %v3986_v50 = vpop.permute.xlu0 %3985  ;;  %v7825_v62 = vmul.f32 %v5703_v59, %v3895_v46  ;;  %v7827_v31 = vmul.f32 %v5703_v59, %v3896_v39 }
 0x394   : > { %5714 = vrcp.f32 %v3991_v29  ;;  %v5705_v5 = vpop.eup %5704 }
 0x395   : > { %5716 = vrcp.f32 %v3986_v50  ;;  %v7829_v23 = vmul.f32 %v5705_v5, %v3893_v10  ;;  %v7831_v33 = vmul.f32 %v5705_v5, %v3894_v37  ;;  %v3911_v10 = vld [vmem:[#allocation2 + $0xd0] sm:$0xff]  ;;  %v3912_v37 = vld [vmem:[#allocation2 + $0xd8] sm:$0xff] }
 0x396   : > { %v5707_v19 = vpop.eup %5706 }
 0x397   : > { %v4001_v61 = vpop.permute.xlu1 %4000  ;;  %v3996_v60 = vpop.permute.xlu0 %3995  ;;  %v7833_v49 = vmul.f32 %v5707_v19, %v3899_v41  ;;  %v7836_v53 = vmul.f32 %v5707_v19, %v3900_v11  ;;  %v4064_v41 = vld [vmem:[#allocation3 + $0x18] sm:$0xff] }
 0x398   : > { %5718 = vrcp.f32 %v4001_v61  ;;  %v5709_v3 = vpop.eup %5708 }
 0x399   : > { %5720 = vrcp.f32 %v3996_v60  ;;  %v7838_v54 = vmul.f32 %v5709_v3, %v3897_v58  ;;  %v7840_v43 = vmul.f32 %v5709_v3, %v3898_v35  ;;  %v3902_v60 = vld [vmem:[#allocation2 + $0x88] sm:$0xff]  ;;  %v4061_v3 = vld [vmem:[#allocation3] sm:$0xff] }
 0x39a   : > { %v5711_v36 = vpop.eup %5710 }
 0x39b   : > { %v7794_v16 = vpop.permute.xlu1 %4010  ;;  %v7796_v14 = vpop.permute.xlu0 %4005  ;;  %v7848_v63 = vmul.f32 %v5711_v36, %v3904_v40  ;;  %v7884_v40 = vld [vmem:[#allocation3 + $0x38] sm:$0xff] }
 0x39c   : > { %v5713_v22 = vpop.eup %5712  ;;  %5722 = vrcp.f32 %v7794_v16  ;;  %v7846_v16 = vmul.f32 %v5711_v36, %v3903_v17  ;;  %v7882_v17 = vld [vmem:[#allocation3 + $0x30] sm:$0xff] }
 0x39d   : > { %v7850_v44 = vmul.f32 %v5713_v22, %v3901_v9  ;;  %v7860_v6 = vmul.f32 %v5713_v22, %v3902_v60  ;;  %v3910_v22 = vld [vmem:[#allocation2 + $0xc8] sm:$0xff]  ;;  %v7886_v9 = vld [vmem:[#allocation3 + $0x20] sm:$0xff] }
 0x39e   : > { %v5715_v21 = vpop.eup %5714 }
 0x39f   : > { %v7798_v8 = vpop.permute.xlu1 %4100  ;;  %v7800_v55 = vpop.permute.xlu0 %4095  ;;  %v7862_v32 = vmul.f32 %v5715_v21, %v3907_v2  ;;  %v7868_v11 = vmul.f32 %v5715_v21, %v3908_v30 }
 0x3a0   : > { %v4175_v47 = vmul.f32 %v7798_v8, %v4017_v28  ;;  %v4176_v20 = vmul.f32 %v7798_v8, %v4018_v24  ;;  %v4173_v18 = vmul.f32 %v7800_v55, %v4014_v1  ;;  %v4174_v29 = vmul.f32 %v7800_v55, %v4015_v51  ;;  %v5717_v27 = vpop.eup %5716 }
 0x3a1   : > { %v7870_v58 = vmul.f32 %v5717_v27, %v3905_v15  ;;  %v7872_v35 = vmul.f32 %v5717_v27, %v3906_v26 }
 0x3a2   : > { %v4207_v5 = vmul.f32 %v4175_v47, %v4017_v28  ;;  %v4208_v0 = vmul.f32 %v4176_v20, %v4018_v24  ;;  %v7864_v46 = vmul.f32 %v4173_v18, %v4014_v1  ;;  %v3909_v24 = vld [vmem:[#allocation2 + $0xc0] sm:$0xff] }
 0x3a3   : > { %v7804_v56 = vpop.permute.xlu1 %4110  ;;  %v7806_v38 = vpop.permute.xlu0 %4105 }
 0x3a4   : > { %v4179_v8 = vmul.f32 %v7804_v56, %v7819_v57  ;;  %v4180_v25 = vmul.f32 %v7804_v56, %v4024_v4  ;;  %v4177_v55 = vmul.f32 %v7806_v38, %v7812_v13  ;;  %v4178_v59 = vmul.f32 %v7806_v38, %v7814_v42  ;;  %v4062_v38 = vld [vmem:[#allocation3 + $0x8] sm:$0xff] }
 0x3a5   : > { %v7866_v56 = vmul.f32 %v4174_v29, %v4015_v51  ;;  %v4240_v20 = vsub.f32 %v4064_v41, %v4208_v0  ;;  %v4237_v18 = vsub.f32 %v4061_v3, %v7864_v46  ;;  %v7928_v0 = vld [vmem:[#allocation3 + $0x50] sm:$0xff] }
 0x3a6   : > { %v7875_v1 = vmul.f32 %v4179_v8, %v7819_v57  ;;  %v7877_v51 = vmul.f32 %v4180_v25, %v4024_v4  ;;  %v7880_v28 = vmul.f32 %v4177_v55, %v7812_v13  ;;  %v7889_v21 = vmul.f32 %v4178_v59, %v7814_v42 }
 0x3a7   : > { %v7808_v7 = vpop.permute.xlu1 %4120  ;;  %v7810_v48 = vpop.permute.xlu0 %4115  ;;  %v4239_v13 = vsub.f32 %v4063_v52, %v4207_v5  ;;  %v4238_v29 = vsub.f32 %v4062_v38, %v7866_v56  ;;  %v4072_v38 = vld [vmem:[#allocation3 + $0x58] sm:$0xff] }
 0x3a8   : > { %v4183_v57 = vmul.f32 %v7808_v7, %v7825_v62  ;;  %v4184_v42 = vmul.f32 %v7808_v7, %v7827_v31  ;;  %v4181_v2 = vmul.f32 %v7810_v48, %v7829_v23  ;;  %v4243_v25 = vsub.f32 %v7882_v17, %v7875_v1  ;;  %v4070_v17 = vld [vmem:[#allocation3 + $0x48] sm:$0xff] }
 0x3a9   : > { %v4244_v55 = vsub.f32 %v7884_v40, %v7877_v51  ;;  %v4241_v30 = vsub.f32 %v7886_v9, %v7880_v28  ;;  %v4182_v15 = vmul.f32 %v7810_v48, %v7831_v33 }
 0x3aa   : > { %v7936_v41 = vmul.f32 %v4181_v2, %v7829_v23 }
 0x3ab   : > { %v7821_v45 = vpop.permute.xlu1 %4130  ;;  %v7823_v34 = vpop.permute.xlu0 %4125  ;;  %v7949_v23 = vmul.f32 %v4182_v15, %v7831_v33 }
 0x3ac   : > { %v4187_v52 = vmul.f32 %v7821_v45, %v7833_v49  ;;  %v4188_v46 = vmul.f32 %v7821_v45, %v7836_v53  ;;  %v4185_v48 = vmul.f32 %v7823_v34, %v7838_v54  ;;  %v4186_v3 = vmul.f32 %v7823_v34, %v7840_v43 }
 0x3ad   : > { %v4246_v2 = vsub.f32 %v4070_v17, %v7949_v23 }
 0x3ae   : > { %v7955_v40 = vmul.f32 %v4187_v52, %v7833_v49  ;;  %v7958_v9 = vmul.f32 %v4188_v46, %v7836_v53  ;;  %v7973_v49 = vmul.f32 %v4186_v3, %v7840_v43  ;;  %v7976_v53 = vld [vmem:[#allocation3 + $0x68] sm:$0xff] }
 0x3af   : > { %v4309_v50 = vpop.permute.xlu1 %4308  ;;  %v4304_v61 = vpop.permute.xlu0 %4303 }
 0x3b0   : > { %5724 = vrcp.f32 %v4309_v50  ;;  %v7899_v50 = vld [vmem:[#allocation3 + $0x28] sm:$0xff] }
 0x3b1   : > { %5726 = vrcp.f32 %v7796_v14  ;;  %v5719_v14 = vpop.eup %5718  ;;  %v4242_v59 = vsub.f32 %v7899_v50, %v7889_v21  ;;  %v7961_v21 = vmul.f32 %v4185_v48, %v7838_v54 }
 0x3b2   : > { %5728 = vrcp.f32 %v4304_v61  ;;  %v5721_v36 = vpop.eup %5720  ;;  %v7893_v4 = vmul.f32 %v5719_v14, %v3911_v10  ;;  %v7895_v47 = vmul.f32 %v5719_v14, %v3912_v37  ;;  %v7922_v14 = vmul.f32 %v4183_v57, %v7825_v62  ;;  %v3915_v10 = vld [vmem:[#allocation2 + $0xf0] sm:$0xff] }
 0x3b3   : > { %v4319_v39 = vpop.permute.xlu1 %4318  ;;  %v4314_v19 = vpop.permute.xlu0 %4313  ;;  %v7907_v27 = vmul.f32 %v5721_v36, %v3909_v24  ;;  %v7909_v8 = vmul.f32 %v5721_v36, %v3910_v22  ;;  %v4216_v37 = vmul.f32 %v4184_v42, %v7827_v31  ;;  %v7940_v36 = vld [vmem:[#allocation3 + $0x40] sm:$0xff] }
 0x3b4   : > { %5730 = vrcp.f32 %v4319_v39  ;;  %v7901_v60 = vpop.eup %5722  ;;  %v4247_v31 = vsub.f32 %v7928_v0, %v7922_v14 }
 0x3b5   : > { %5732 = vrcp.f32 %v4314_v19  ;;  %v7952_v34 = vmul.f32 %v7901_v60, %v3915_v10  ;;  %v4248_v33 = vsub.f32 %v4072_v38, %v4216_v37 }
 0x3b7   : > { %v4329_v61 = vpop.permute.xlu1 %4328  ;;  %v4324_v7 = vpop.permute.xlu0 %4323 }
 0x3b8   : > { %5734 = vrcp.f32 %v4329_v61 }
 0x3b9   : > { %5736 = vrcp.f32 %v4324_v7 }
 0x3ba   : > { %v5725_v26 = vpop.eup %5724 }
 0x3bb   : > { %v7926_v5 = vpop.eup %5726  ;;  %v4385_v56 = vmul.f32 %v5725_v26, %v4239_v13  ;;  %v4386_v39 = vmul.f32 %v5725_v26, %v4240_v20  ;;  %v4339_v19 = vpop.permute.xlu1 %4338  ;;  %v4245_v13 = vsub.f32 %v7940_v36, %v7936_v41  ;;  %v7966_v20 = vld [vmem:[#allocation3 + $0x70] sm:$0xff] }
 0x3bc   : > { %v5729_v62 = vpop.eup %5728  ;;  %5738 = vrcp.f32 %v4339_v19  ;;  %v4334_v57 = vpop.permute.xlu0 %4333  ;;  %v4251_v26 = vsub.f32 %v7966_v20, %v7955_v40 }
 0x3bd   : > { %v7942_v45 = vmax.f32 %v4385_v56, 0.0  ;;  %v7944_v1 = vmax.f32 %v4386_v39, 0.0  ;;  %v4382_v51 = vmul.f32 %v5729_v62, %v4237_v18  ;;  %v4383_v28 = vmul.f32 %v5729_v62, %v4238_v29  ;;  %v7968_v18 = vld [vmem:[#allocation3 + $0x78] sm:$0xff]  ;;  %v7970_v29 = vld [vmem:[#allocation3 + $0x60] sm:$0xff] }
 0x3be   : > { %v5731_v24 = vpop.eup %5730  ;;  %v4252_v43 = vsub.f32 %v7968_v18, %v7958_v9  ;;  %v4249_v14 = vsub.f32 %v7970_v29, %v7961_v21 }
 0x3bf   : > { %v5733_v22 = vpop.eup %5732  ;;  %5740 = vrsqrt.f32 %v7942_v45  ;;  %v7978_v54 = vmax.f32 %v4382_v51, 0.0  ;;  %v7980_v50 = vmax.f32 %v4383_v28, 0.0  ;;  %v4391_v61 = vmul.f32 %v5731_v24, %v4243_v25  ;;  %v4349_v52 = vpop.permute.xlu1 %4348 }
 0x3c0   : > { %5742 = vrsqrt.f32 %v7944_v1  ;;  %v4392_v42 = vmul.f32 %v5731_v24, %v4244_v55  ;;  %v4388_v15 = vmul.f32 %v5733_v22, %v4241_v30  ;;  %v4389_v7 = vmul.f32 %v5733_v22, %v4242_v59  ;;  %v8014_v41 = vpop.permute.xlu0 %4343 }
 0x3c1   : > { %5744 = vrcp.f32 %v4334_v57  ;;  %v4250_v25 = vsub.f32 %v7976_v53, %v7973_v49  ;;  %vm4478_vm2 = vcmp.eq.f32.partialorder %v7942_v45, inf  ;;  %vm4480_vm3 = vcmp.eq.f32.partialorder %v7942_v45, 0.0 }
 0x3c2   : > { %5746 = vrsqrt.f32 %v7978_v54  ;;  %v5735_v0 = vpop.eup %5734  ;;  %v4481_v55 = vand.u32 2147483648, %v7942_v45  ;;  %v7996_v30 = vmax.f32 %v4391_v61, 0.0  ;;  %v7998_v59 = vmax.f32 %v4392_v42, 0.0 }
 0x3c3   : > { %5748 = vrsqrt.f32 %v7980_v50  ;;  %v8000_v46 = vmax.f32 %v4388_v15, 0.0  ;;  %v5737_v48 = vpop.eup %5736  ;;  %vm4485_vm4 = vcmp.eq.f32.partialorder %v7944_v1, inf  ;;  %vm4487_vm5 = vcmp.eq.f32.partialorder %v7944_v1, 0.0 }
 0x3c4   : > { %v8004_v56 = vmax.f32 %v4389_v7, 0.0  ;;  %5750 = vrcp.f32 %v4349_v52  ;;  %v4488_v39 = vand.u32 2147483648, %v7944_v1  ;;  %v4397_v19 = vmul.f32 %v5735_v0, %v4247_v31  ;;  %v8022_v31 = vpop.permute.xlu1 %4358 }
 0x3c5   : > { %5752 = vrsqrt.f32 %v7996_v30  ;;  %v4398_v10 = vmul.f32 %v5735_v0, %v4248_v33  ;;  %vm4464_vm6 = vcmp.eq.f32.partialorder %v7978_v54, inf  ;;  %vm4466_vm7 = vcmp.eq.f32.partialorder %v7978_v54, 0.0 }
 0x3c6   : > { %v8008_v62 = vpop.eup %5738  ;;  %v4467_v37 = vand.u32 2147483648, %v7978_v54  ;;  %5754 = vrsqrt.f32 %v7998_v59  ;;  %vm4471_vm8 = vcmp.eq.f32.partialorder %v7980_v50, inf  ;;  %vm4473_vm9 = vcmp.eq.f32.partialorder %v7980_v50, 0.0 }
 0x3c7   : > { %5756 = vrsqrt.f32 %v8000_v46  ;;  %v4394_v38 = vmul.f32 %v5737_v48, %v4245_v13  ;;  %v4474_v28 = vand.u32 2147483648, %v7980_v50  ;;  %v4395_v24 = vmul.f32 %v5737_v48, %v4246_v2 }
 0x3c8   : > { %5758 = vrsqrt.f32 %v8004_v56  ;;  %vm4506_vm10 = vcmp.eq.f32.partialorder %v7996_v30, inf  ;;  %v8026_v22 = vmax.f32 %v4397_v19, 0.0  ;;  %v8028_v17 = vmax.f32 %v4398_v10, 0.0 }
 0x3c9   : > { %v5741_v3 = vpop.eup %5740  ;;  %vm4508_vm11 = vcmp.eq.f32.partialorder %v7996_v30, 0.0  ;;  %v4509_v13 = vand.u32 2147483648, %v7996_v30  ;;  %vm4513_vm12 = vcmp.eq.f32.partialorder %v7998_v59, inf  ;;  %v4516_v61 = vand.u32 2147483648, %v7998_v59 }
 0x3ca   : > { %v5743_v36 = vpop.eup %5742  ;;  %v4477_v51 = vmul.f32 %v5741_v3, %v7942_v45  ;;  %vm4515_vm13 = vcmp.eq.f32.partialorder %v7998_v59, 0.0  ;;  %vm4492_vm14 = vcmp.eq.f32.partialorder %v8000_v46, inf  ;;  %5760 = vrsqrt.f32 %v8026_v22 }
 0x3cb   : > { %v4484_v23 = vmul.f32 %v5743_v36, %v7944_v1  ;;  %v8030_v57 = vpop.eup %5744  ;;  %v8047_v7 = vmax.f32 %v4394_v38, 0.0  ;;  %vm4494_vm15 = vcmp.eq.f32.partialorder %v8000_v46, 0.0  ;;  %5762 = vrsqrt.f32 %v8028_v17  ;;  %v8072_v36 = vpop.permute.xlu1 %4368 }
 0x3cc   : > { %v4479_v33 = vsel %vm4478_vm2, %v7942_v45, %v4477_v51  ;;  %v5747_v42 = vpop.eup %5746  ;;  %v8059_v3 = vmax.f32 %v4395_v24, 0.0  ;;  %vm4499_vm0 = vcmp.eq.f32.partialorder %v8004_v56, inf  ;;  %vm4501_vm1 = vcmp.eq.f32.partialorder %v8004_v56, 0.0 }
 0x3cd   : > { %v4482_v2 = vsel %vm4480_vm3, %v4481_v55, %v4479_v33  ;;  %v4486_v15 = vsel %vm4485_vm4, %v7944_v1, %v4484_v23  ;;  %v5749_v52 = vpop.eup %5748  ;;  %v4463_v45 = vmul.f32 %v5747_v42, %v7978_v54  ;;  %v8054_v55 = vpop.permute.xlu0 %4353  ;;  %v4502_v33 = vand.u32 2147483648, %v8004_v56 }
 0x3ce   : > { %v4489_v0 = vsel %vm4487_vm5, %v4488_v39, %v4486_v15  ;;  %v4689_v48 = vmul.f32 %v7817_v12, %v4482_v2  ;;  %v4470_v10 = vmul.f32 %v5749_v52, %v7980_v50  ;;  %v8061_v38 = vpop.eup %5750  ;;  %v4495_v39 = vand.u32 2147483648, %v8000_v46 }
 0x3cf   : > { %v4690_v19 = vmul.f32 %v7817_v12, %v4489_v0  ;;  %v4465_v1 = vsel %vm4464_vm6, %v7978_v54, %v4463_v45  ;;  %v5753_v51 = vpop.eup %5752  ;;  %5764 = vrsqrt.f32 %v8047_v7  ;;  %v4403_v54 = vmul.f32 %v8008_v62, %v4251_v26 }
 0x3d0   : > { %4721 = vst [vmem:[%s8539_s3 + $0x10] sm:$0xff] %v4689_v48  ;;  %v4468_v24 = vsel %vm4466_vm7, %v4467_v37, %v4465_v1  ;;  %v4472_v23 = vsel %vm4471_vm8, %v7980_v50, %v4470_v10  ;;  %v5755_v42 = vpop.eup %5754  ;;  %v4505_v52 = vmul.f32 %v5753_v51, %v7996_v30  ;;  %vm4534_vm2 = vcmp.eq.f32.partialorder %v8026_v22, inf }
 0x3d1   : > { %4722 = vst [vmem:[%s8539_s3 + $0x18] sm:$0xff] %v4690_v19  ;;  %v4475_v2 = vsel %vm4473_vm9, %v4474_v28, %v4472_v23  ;;  %v4687_v15 = vmul.f32 %v7817_v12, %v4468_v24  ;;  %v5757_v37 = vpop.eup %5756  ;;  %v4512_v48 = vmul.f32 %v5755_v42, %v7998_v59  ;;  %5766 = vrsqrt.f32 %v8059_v3  ;;  %v8105_v28 = vpop.permute.xlu0 %4363 }
 0x3d2   : > { %v4688_v0 = vmul.f32 %v7817_v12, %v4475_v2  ;;  %v5759_v50 = vpop.eup %5758  ;;  %v4507_v40 = vsel %vm4506_vm10, %v7996_v30, %v4505_v52  ;;  %v4491_v20 = vmul.f32 %v5757_v37, %v8000_v46  ;;  %vm4536_vm3 = vcmp.eq.f32.partialorder %v8026_v22, 0.0 }
 0x3d3   : > { %4719 = vst [vmem:[%s8539_s3] sm:$0xff] %v4687_v15  ;;  %v4537_v26 = vand.u32 2147483648, %v8026_v22  ;;  %v4510_v45 = vsel %vm4508_vm11, %v4509_v13, %v4507_v40  ;;  %v4514_v19 = vsel %vm4513_vm12, %v7998_v59, %v4512_v48  ;;  %v4498_v10 = vmul.f32 %v5759_v50, %v8004_v56  ;;  %v8127_v13 = vpop.permute.xlu1 %4378 }
 0x3d4   : > { %4720 = vst [vmem:[%s8539_s3 + $0x8] sm:$0xff] %v4688_v0  ;;  %vm4541_vm4 = vcmp.eq.f32.partialorder %v8028_v17, inf  ;;  %v4517_v1 = vsel %vm4515_vm13, %v4516_v61, %v4514_v19  ;;  %v4693_v51 = vmul.f32 %v7817_v12, %v4510_v45  ;;  %v4493_v24 = vsel %vm4492_vm14, %v8000_v46, %v4491_v20  ;;  %v5761_v23 = vpop.eup %5760 }
 0x3d5   : > { %v4404_v30 = vmul.f32 %v8008_v62, %v4252_v43  ;;  %v4694_v42 = vmul.f32 %v7817_v12, %v4517_v1  ;;  %v4496_v59 = vsel %vm4494_vm15, %v4495_v39, %v4493_v24  ;;  %v4500_v61 = vsel %vm4499_vm0, %v8004_v56, %v4498_v10  ;;  %v5763_v46 = vpop.eup %5762  ;;  %v8162_v52 = vpop.permute.xlu0 %4373 }
 0x3d6   : > { %v8135_v2 = vmax.f32 %v4403_v54, 0.0  ;;  %4725 = vst [vmem:[%s8539_s3 + $0x30] sm:$0xff] %v4693_v51  ;;  %v4503_v9 = vsel %vm4501_vm1, %v4502_v33, %v4500_v61  ;;  %v4691_v18 = vmul.f32 %v7817_v12, %v4496_v59  ;;  %v4533_v43 = vmul.f32 %v5761_v23, %v8026_v22  ;;  %v4080_v23 = vld [vmem:[#allocation3 + $0x98] sm:$0xff] }
 0x3d7   : > { %v8144_v62 = vmax.f32 %v4404_v30, 0.0  ;;  %4726 = vst [vmem:[%s8539_s3 + $0x38] sm:$0xff] %v4694_v42  ;;  %v4692_v39 = vmul.f32 %v7817_v12, %v4503_v9  ;;  %vm4543_vm5 = vcmp.eq.f32.partialorder %v8028_v17, 0.0  ;;  %v4544_v15 = vand.u32 2147483648, %v8028_v17  ;;  %v4141_v20 = vpop.permute.xlu1 %4140  ;;  %v4079_v30 = vld [vmem:[#allocation3 + $0x90] sm:$0xff] }
 0x3d8   : > { %5768 = vrsqrt.f32 %v8135_v2  ;;  %4723 = vst [vmem:[%s8539_s3 + $0x20] sm:$0xff] %v4691_v18  ;;  %v4535_v56 = vsel %vm4534_vm2, %v8026_v22, %v4533_v43  ;;  %v4540_v33 = vmul.f32 %v5763_v46, %v8028_v17  ;;  %vm4520_vm6 = vcmp.eq.f32.partialorder %v8047_v7, inf }
 0x3d9   : > { %5770 = vrsqrt.f32 %v8144_v62  ;;  %v5765_v54 = vpop.eup %5764  ;;  %4724 = vst [vmem:[%s8539_s3 + $0x28] sm:$0xff] %v4692_v39  ;;  %v4538_v37 = vsel %vm4536_vm3, %v4537_v26, %v4535_v56  ;;  %vm4522_vm7 = vcmp.eq.f32.partialorder %v8047_v7, 0.0  ;;  %v4523_v0 = vand.u32 2147483648, %v8047_v7 }
 0x3da   : > { %vm4527_vm8 = vcmp.eq.f32.partialorder %v8059_v3, inf  ;;  %v4542_v48 = vsel %vm4541_vm4, %v8028_v17, %v4540_v33  ;;  %v4697_v50 = vmul.f32 %v7817_v12, %v4538_v37  ;;  %v4519_v40 = vmul.f32 %v5765_v54, %v8047_v7  ;;  %v4077_v54 = vld [vmem:[#allocation3 + $0x80] sm:$0xff] }
 0x3db   : > { %v4400_v22 = vmul.f32 %v8030_v57, %v4249_v14  ;;  %v5767_v26 = vpop.eup %5766  ;;  %v4545_v45 = vsel %vm4543_vm5, %v4544_v15, %v4542_v48  ;;  %v4530_v19 = vand.u32 2147483648, %v8059_v3  ;;  %v4401_v10 = vmul.f32 %v8030_v57, %v4250_v25  ;;  %v4151_v15 = vpop.permute.xlu1 %4150 }
 0x3dc   : > { %5772 = vrcp.f32 %v8014_v41  ;;  %v4698_v1 = vmul.f32 %v7817_v12, %v4545_v45  ;;  %4729 = vst [vmem:[%s8539_s3 + $0x50] sm:$0xff] %v4697_v50  ;;  %v4521_v21 = vsel %vm4520_vm6, %v8047_v7, %v4519_v40  ;;  %v4526_v29 = vmul.f32 %v5767_v26, %v8059_v3  ;;  %v4136_v7 = vpop.permute.xlu0 %4135 }
 0x3dd   : > { %v8197_v14 = vmax.f32 %v4400_v22, 0.0  ;;  %v4524_v49 = vsel %vm4522_vm7, %v4523_v0, %v4521_v21  ;;  %v8201_v53 = vmax.f32 %v4401_v10, 0.0  ;;  %v4191_v25 = vmul.f32 %v4141_v20, %v7846_v16  ;;  %v4078_v0 = vld [vmem:[#allocation3 + $0x88] sm:$0xff] }
 0x3de   : > { %v4192_v41 = vmul.f32 %v4141_v20, %v7848_v63  ;;  %4730 = vst [vmem:[%s8539_s3 + $0x58] sm:$0xff] %v4698_v1  ;;  %v4528_v17 = vsel %vm4527_vm8, %v8059_v3, %v4526_v29  ;;  %vm4529_vm9 = vcmp.eq.f32.partialorder %v8059_v3, 0.0  ;;  %v4695_v57 = vmul.f32 %v7817_v12, %v4524_v49 }
 0x3df   : > { %5774 = vrsqrt.f32 %v8197_v14  ;;  %v4531_v51 = vsel %vm4529_vm9, %v4530_v19, %v4528_v17  ;;  %vm4562_vm10 = vcmp.eq.f32.partialorder %v8135_v2, inf  ;;  %vm4564_vm11 = vcmp.eq.f32.partialorder %v8135_v2, 0.0  ;;  %v4083_v17 = vld [vmem:[#allocation3 + $0xb0] sm:$0xff] }
 0x3e0   : > { %5776 = vrsqrt.f32 %v8201_v53  ;;  %v4696_v24 = vmul.f32 %v7817_v12, %v4531_v51  ;;  %4727 = vst [vmem:[%s8539_s3 + $0x40] sm:$0xff] %v4695_v57  ;;  %v4565_v3 = vand.u32 2147483648, %v8135_v2  ;;  %vm4569_vm12 = vcmp.eq.f32.partialorder %v8144_v62, inf  ;;  %v4146_v29 = vpop.permute.xlu0 %4145 }
 0x3e1   : > { %vm4571_vm13 = vcmp.eq.f32.partialorder %v8144_v62, 0.0  ;;  %v4572_v59 = vand.u32 2147483648, %v8144_v62  ;;  %v4223_v61 = vmul.f32 %v4191_v25, %v7846_v16  ;;  %v4224_v9 = vmul.f32 %v4192_v41, %v7848_v63 }
 0x3e2   : > { %v5769_v42 = vpop.eup %5768  ;;  %v4189_v18 = vmul.f32 %v4136_v7, %v7850_v44  ;;  %4728 = vst [vmem:[%s8539_s3 + $0x48] sm:$0xff] %v4696_v24  ;;  %vm4548_vm14 = vcmp.eq.f32.partialorder %v8197_v14, inf  ;;  %5778 = vrcp.f32 %v8022_v31  ;;  %v4190_v39 = vmul.f32 %v4136_v7, %v7860_v6  ;;  %v3916_v24 = vld [vmem:[#allocation2 + $0xf8] sm:$0xff] }
 0x3e3   : > { %v5771_v43 = vpop.eup %5770  ;;  %v4561_v46 = vmul.f32 %v5769_v42, %v8135_v2  ;;  %vm4550_vm15 = vcmp.eq.f32.partialorder %v8197_v14, 0.0  ;;  %v4551_v63 = vand.u32 2147483648, %v8197_v14  ;;  %v4255_v56 = vsub.f32 %v4079_v30, %v4223_v61  ;;  %v3914_v61 = vld [vmem:[#allocation2 + $0xe8] sm:$0xff] }
 0x3e4   : > { %v4568_v16 = vmul.f32 %v5771_v43, %v8144_v62  ;;  %v4256_v33 = vsub.f32 %v4080_v23, %v4224_v9  ;;  %5780 = vrcp.f32 %v8054_v55  ;;  %v4221_v31 = vmul.f32 %v4189_v18, %v7850_v44  ;;  %v4084_v43 = vld [vmem:[#allocation3 + $0xb8] sm:$0xff] }
 0x3e5   : > { %v4563_v37 = vsel %vm4562_vm10, %v8135_v2, %v4561_v46  ;;  %v4222_v48 = vmul.f32 %v4190_v39, %v7860_v6  ;;  %v4409_v20 = vmul.f32 %v8061_v38, %v4255_v56  ;;  %v4195_v26 = vmul.f32 %v4151_v15, %v7862_v32 }
 0x3e6   : > { %v5773_v50 = vpop.eup %5772  ;;  %v4566_v40 = vsel %vm4564_vm11, %v4565_v3, %v4563_v37  ;;  %v4570_v22 = vsel %vm4569_vm12, %v8144_v62, %v4568_v16  ;;  %v4410_v44 = vmul.f32 %v8061_v38, %v4256_v33  ;;  %v4253_v6 = vsub.f32 %v4077_v54, %v4221_v31  ;;  %v4081_v33 = vld [vmem:[#allocation3 + $0xa0] sm:$0xff] }
 0x3e7   : > { %v4573_v55 = vsel %vm4571_vm13, %v4572_v59, %v4570_v22  ;;  %v4701_v45 = vmul.f32 %v7817_v12, %v4566_v40  ;;  %5782 = vrcp.f32 %v8072_v36  ;;  %v8257_v2 = vmax.f32 %v4409_v20, 0.0  ;;  %v4082_v40 = vld [vmem:[#allocation3 + $0xa8] sm:$0xff] }
 0x3e8   : > { %v4702_v19 = vmul.f32 %v7817_v12, %v4573_v55  ;;  %v4254_v10 = vsub.f32 %v4078_v0, %v4222_v48  ;;  %5784 = vrcp.f32 %v8105_v28  ;;  %v8263_v62 = vmax.f32 %v4410_v44, 0.0 }
 0x3e9   : > { %v5775_v1 = vpop.eup %5774  ;;  %4733 = vst [vmem:[%s8539_s3 + $0x70] sm:$0xff] %v4701_v45  ;;  %v4406_v21 = vmul.f32 %v5773_v50, %v4253_v6  ;;  %v4196_v38 = vmul.f32 %v4151_v15, %v7868_v11  ;;  %vm4555_vm0 = vcmp.eq.f32.partialorder %v8201_v53, inf  ;;  %5786 = vrsqrt.f32 %v8257_v2  ;;  %v4161_v15 = vpop.permute.xlu1 %4160 }
 0x3ea   : > { %v5777_v49 = vpop.eup %5776  ;;  %4734 = vst [vmem:[%s8539_s3 + $0x78] sm:$0xff] %v4702_v19  ;;  %v4547_v36 = vmul.f32 %v5775_v1, %v8197_v14  ;;  %v4227_v25 = vmul.f32 %v4195_v26, %v7862_v32  ;;  %vm4557_vm1 = vcmp.eq.f32.partialorder %v8201_v53, 0.0  ;;  %v4558_v41 = vand.u32 2147483648, %v8201_v53  ;;  %v3913_v32 = vld [vmem:[#allocation2 + $0xe0] sm:$0xff]  ;;  %v4156_v45 = vpop.permute.xlu0 %4155 }
 0x3eb   : > { %v4554_v28 = vmul.f32 %v5777_v49, %v8201_v53  ;;  %5788 = vrsqrt.f32 %v8263_v62  ;;  %v4407_v7 = vmul.f32 %v5773_v50, %v4254_v10  ;;  %v4193_v51 = vmul.f32 %v4146_v29, %v7870_v58 }
 0x3ec   : > { %v4549_v57 = vsel %vm4548_vm14, %v8197_v14, %v4547_v36  ;;  %5790 = vrcp.f32 %v8127_v13  ;;  %v5779_v3 = vpop.eup %5778  ;;  %v8287_v42 = vmax.f32 %v4406_v21, 0.0  ;;  %v4228_v59 = vmul.f32 %v4196_v38, %v7868_v11 }
 0x3ed   : > { %v4552_v30 = vsel %vm4550_vm15, %v4551_v63, %v4549_v57  ;;  %v4556_v23 = vsel %vm4555_vm0, %v8201_v53, %v4554_v28  ;;  %v8293_v18 = vmax.f32 %v4407_v7, 0.0  ;;  %v4259_v46 = vsub.f32 %v4083_v17, %v4227_v25  ;;  %v4088_v17 = vld [vmem:[#allocation3 + $0xd8] sm:$0xff] }
 0x3ee   : > { %v4559_v13 = vsel %vm4557_vm1, %v4558_v41, %v4556_v23  ;;  %v4699_v9 = vmul.f32 %v7817_v12, %v4552_v30  ;;  %v5781_v14 = vpop.eup %5780  ;;  %5792 = vrsqrt.f32 %v8287_v42  ;;  %v8298_v16 = vmul.f32 %v7901_v60, %v3916_v24 }
 0x3ef   : > { %v4700_v39 = vmul.f32 %v7817_v12, %v4559_v13  ;;  %v8301_v11 = vmul.f32 %v7926_v5, %v3913_v32  ;;  %vm4590_vm2 = vcmp.eq.f32.partialorder %v8257_v2, inf  ;;  %vm4592_vm3 = vcmp.eq.f32.partialorder %v8257_v2, 0.0 }
 0x3f0   : > { %4731 = vst [vmem:[%s8539_s3 + $0x60] sm:$0xff] %v4699_v9  ;;  %5794 = vrsqrt.f32 %v8293_v18  ;;  %v8310_v53 = vmul.f32 %v7926_v5, %v3914_v61  ;;  %v4593_v60 = vand.u32 2147483648, %v8257_v2  ;;  %v4260_v63 = vsub.f32 %v4084_v43, %v4228_v59 }
 0x3f1   : > { %4732 = vst [vmem:[%s8539_s3 + $0x68] sm:$0xff] %v4700_v39  ;;  %v4415_v56 = vmul.f32 %v5779_v3, %v4259_v46  ;;  %v4194_v54 = vmul.f32 %v4146_v29, %v7872_v35  ;;  %v8317_v37 = vpop.eup %5782  ;;  %vm4597_vm4 = vcmp.eq.f32.partialorder %v8263_v62, inf  ;;  %vm4599_vm5 = vcmp.eq.f32.partialorder %v8263_v62, 0.0  ;;  %v4087_v29 = vld [vmem:[#allocation3 + $0xd0] sm:$0xff] }
 0x3f2   : > { %v4225_v5 = vmul.f32 %v4193_v51, %v7870_v58  ;;  %v4199_v0 = vmul.f32 %v4161_v15, %v7893_v4  ;;  %v8323_v31 = vpop.eup %5784  ;;  %v4416_v48 = vmul.f32 %v5779_v3, %v4260_v63  ;;  %v4200_v20 = vmul.f32 %v4161_v15, %v7895_v47  ;;  %v4086_v63 = vld [vmem:[#allocation3 + $0xc8] sm:$0xff] }
 0x3f3   : > { %v8325_v50 = vmax.f32 %v4415_v56, 0.0  ;;  %v4226_v22 = vmul.f32 %v4194_v54, %v7872_v35  ;;  %v5787_v26 = vpop.eup %5786  ;;  %v4600_v55 = vand.u32 2147483648, %v8263_v62  ;;  %vm4576_vm6 = vcmp.eq.f32.partialorder %v8287_v42, inf }
 0x3f4   : > { %vm4578_vm7 = vcmp.eq.f32.partialorder %v8287_v42, 0.0  ;;  %v4257_v58 = vsub.f32 %v4081_v33, %v4225_v5  ;;  %v4589_v6 = vmul.f32 %v5787_v26, %v8257_v2  ;;  %v8333_v19 = vmax.f32 %v4416_v48, 0.0 }
 0x3f5   : > { %v5789_v44 = vpop.eup %5788  ;;  %5796 = vrsqrt.f32 %v8325_v50  ;;  %v4231_v35 = vmul.f32 %v4199_v0, %v7893_v4  ;;  %v4579_v21 = vand.u32 2147483648, %v8287_v42  ;;  %vm4583_vm8 = vcmp.eq.f32.partialorder %v8293_v18, inf }
 0x3f6   : > { %v8337_v10 = vpop.eup %5790  ;;  %v4596_v1 = vmul.f32 %v5789_v44, %v8263_v62  ;;  %v4258_v38 = vsub.f32 %v4082_v40, %v4226_v22  ;;  %v4591_v49 = vsel %vm4590_vm2, %v8257_v2, %v4589_v6  ;;  %5798 = vrsqrt.f32 %v8333_v19  ;;  %v4166_v44 = vpop.permute.xlu0 %4165 }
 0x3f7   : > { %v4232_v36 = vmul.f32 %v4200_v20, %v7895_v47  ;;  %v4197_v4 = vmul.f32 %v4156_v45, %v7907_v27  ;;  %v4594_v25 = vsel %vm4592_vm3, %v4593_v60, %v4591_v49  ;;  %v4412_v41 = vmul.f32 %v5781_v14, %v4257_v58  ;;  %v4085_v60 = vld [vmem:[#allocation3 + $0xc0] sm:$0xff] }
 0x3f8   : > { %v4598_v28 = vsel %vm4597_vm4, %v8263_v62, %v4596_v1  ;;  %v4198_v57 = vmul.f32 %v4156_v45, %v7909_v8  ;;  %v5793_v7 = vpop.eup %5792  ;;  %v4705_v24 = vmul.f32 %v7817_v12, %v4594_v25  ;;  %v4413_v47 = vmul.f32 %v5781_v14, %v4258_v38 }
 0x3f9   : > { %v4601_v51 = vsel %vm4599_vm5, %v4600_v55, %v4598_v28  ;;  %v4263_v32 = vsub.f32 %v4087_v29, %v4231_v35  ;;  %v4575_v30 = vmul.f32 %v5793_v7, %v8287_v42  ;;  %v4586_v23 = vand.u32 2147483648, %v8293_v18 }
 0x3fa   : > { %v5795_v3 = vpop.eup %5794  ;;  %v4706_v2 = vmul.f32 %v7817_v12, %v4601_v51  ;;  %v8360_v59 = vmax.f32 %v4412_v41, 0.0  ;;  %4737 = vst [vmem:[%s8539_s3 + $0x90] sm:$0xff] %v4705_v24  ;;  %v8366_v61 = vmax.f32 %v4413_v47, 0.0  ;;  %v4264_v13 = vsub.f32 %v4088_v17, %v4232_v36  ;;  %v4091_v41 = vld [vmem:[#allocation3 + $0xf0] sm:$0xff]  ;;  %v4092_v51 = vld [vmem:[#allocation3 + $0xf8] sm:$0xff] }
 0x3fb   : > { %v4582_v62 = vmul.f32 %v5795_v3, %v8293_v18  ;;  %v4421_v9 = vmul.f32 %v8317_v37, %v4263_v32  ;;  %v4577_v43 = vsel %vm4576_vm6, %v8287_v42, %v4575_v30  ;;  %v4229_v46 = vmul.f32 %v4197_v4, %v7907_v27  ;;  %v4089_v32 = vld [vmem:[#allocation3 + $0xe0] sm:$0xff] }
 0x3fc   : > { %4738 = vst [vmem:[%s8539_s3 + $0x98] sm:$0xff] %v4706_v2  ;;  %5800 = vrsqrt.f32 %v8360_v59  ;;  %v4230_v14 = vmul.f32 %v4198_v57, %v7909_v8  ;;  %v4580_v39 = vsel %vm4578_vm7, %v4579_v21, %v4577_v43  ;;  %vm4585_vm9 = vcmp.eq.f32.partialorder %v8293_v18, 0.0 }
 0x3fd   : > { %v4584_v15 = vsel %vm4583_vm8, %v8293_v18, %v4582_v62  ;;  %5802 = vrsqrt.f32 %v8366_v61  ;;  %v4703_v27 = vmul.f32 %v7817_v12, %v4580_v39  ;;  %vm4618_vm10 = vcmp.eq.f32.partialorder %v8325_v50, inf  ;;  %v4171_v18 = vpop.permute.xlu1 %4170 }
 0x3fe   : > { %5804 = vrcp.f32 %v8162_v52  ;;  %v4587_v56 = vsel %vm4585_vm9, %v4586_v23, %v4584_v15  ;;  %vm4620_vm11 = vcmp.eq.f32.partialorder %v8325_v50, 0.0  ;;  %v4422_v33 = vmul.f32 %v8317_v37, %v4264_v13  ;;  %v4090_v23 = vld [vmem:[#allocation3 + $0xe8] sm:$0xff] }
 0x3ff   : > { %v5797_v8 = vpop.eup %5796  ;;  %v4704_v42 = vmul.f32 %v7817_v12, %v4587_v56  ;;  %v8391_v54 = vmax.f32 %v4421_v9, 0.0  ;;  %4735 = vst [vmem:[%s8539_s3 + $0x80] sm:$0xff] %v4703_v27  ;;  %v4621_v5 = vand.u32 2147483648, %v8325_v50  ;;  %v4261_v0 = vsub.f32 %v4085_v60, %v4229_v46 }
 0x400   : > { %v4617_v52 = vmul.f32 %v5797_v8, %v8325_v50  ;;  %v4262_v48 = vsub.f32 %v4086_v63, %v4230_v14  ;;  %v5799_v40 = vpop.eup %5798  ;;  %vm4625_vm12 = vcmp.eq.f32.partialorder %v8333_v19, inf  ;;  %vm4627_vm13 = vcmp.eq.f32.partialorder %v8333_v19, 0.0 }
 0x401   : > { %4736 = vst [vmem:[%s8539_s3 + $0x88] sm:$0xff] %v4704_v42  ;;  %v8403_v37 = vmax.f32 %v4422_v33, 0.0  ;;  %5806 = vrsqrt.f32 %v8391_v54  ;;  %v4624_v20 = vmul.f32 %v5799_v40, %v8333_v19  ;;  %v4418_v26 = vmul.f32 %v8323_v31, %v4261_v0 }
 0x402   : > { %v4619_v22 = vsel %vm4618_vm10, %v8325_v50, %v4617_v52  ;;  %v4203_v55 = vmul.f32 %v4171_v18, %v7952_v34  ;;  %v4628_v45 = vand.u32 2147483648, %v8333_v19  ;;  %vm4604_vm14 = vcmp.eq.f32.partialorder %v8360_v59, inf }
 0x403   : > { %v4622_v58 = vsel %vm4620_vm11, %v4621_v5, %v4619_v22  ;;  %5808 = vrsqrt.f32 %v8403_v37  ;;  %v4626_v6 = vsel %vm4625_vm12, %v8333_v19, %v4624_v20  ;;  %vm4606_vm15 = vcmp.eq.f32.partialorder %v8360_v59, 0.0 }
 0x404   : > { %v4709_v35 = vmul.f32 %v7817_v12, %v4622_v58  ;;  %v4419_v1 = vmul.f32 %v8323_v31, %v4262_v48  ;;  %v4629_v21 = vsel %vm4627_vm13, %v4628_v45, %v4626_v6  ;;  %v4607_v50 = vand.u32 2147483648, %v8360_v59 }
 0x405   : > { %v8424_v38 = vmax.f32 %v4418_v26, 0.0  ;;  %v4204_v29 = vmul.f32 %v4171_v18, %v8298_v16  ;;  %v4710_v36 = vmul.f32 %v7817_v12, %v4629_v21  ;;  %v4235_v31 = vmul.f32 %v4203_v55, %v7952_v34 }
 0x406   : > { %v5801_v49 = vpop.eup %5800  ;;  %4741 = vst [vmem:[%s8539_s3 + $0xb0] sm:$0xff] %v4709_v35  ;;  %v8431_v4 = vmax.f32 %v4419_v1, 0.0  ;;  %v4201_v19 = vmul.f32 %v4166_v44, %v8301_v11  ;;  %vm4611_vm0 = vcmp.eq.f32.partialorder %v8366_v61, inf  ;;  %v4202_v17 = vmul.f32 %v4166_v44, %v8310_v53 }
 0x407   : > { %v5803_v25 = vpop.eup %5802  ;;  %v4603_v28 = vmul.f32 %v5801_v49, %v8360_v59  ;;  %5810 = vrsqrt.f32 %v8424_v38  ;;  %4742 = vst [vmem:[%s8539_s3 + $0xb8] sm:$0xff] %v4710_v36  ;;  %vm4613_vm1 = vcmp.eq.f32.partialorder %v8366_v61, 0.0  ;;  %v4614_v34 = vand.u32 2147483648, %v8366_v61 }
 0x408   : > { %v5805_v57 = vpop.eup %5804  ;;  %v4610_v7 = vmul.f32 %v5803_v25, %v8366_v61  ;;  %5812 = vrsqrt.f32 %v8431_v4  ;;  %vm4646_vm2 = vcmp.eq.f32.partialorder %v8391_v54, inf  ;;  %vm4648_vm3 = vcmp.eq.f32.partialorder %v8391_v54, 0.0 }
 0x409   : > { %v4605_v24 = vsel %vm4604_vm14, %v8360_v59, %v4603_v28  ;;  %v4236_v47 = vmul.f32 %v4204_v29, %v8298_v16  ;;  %v4267_v30 = vsub.f32 %v4091_v41, %v4235_v31  ;;  %v4233_v62 = vmul.f32 %v4201_v19, %v8301_v11 }
 0x40a   : > { %v4608_v3 = vsel %vm4606_vm15, %v4607_v50, %v4605_v24  ;;  %v4612_v2 = vsel %vm4611_vm0, %v8366_v61, %v4610_v7  ;;  %v4234_v14 = vmul.f32 %v4202_v17, %v8310_v53  ;;  %v4649_v11 = vand.u32 2147483648, %v8391_v54 }
 0x40b   : > { %v5807_v13 = vpop.eup %5806  ;;  %v4615_v9 = vsel %vm4613_vm1, %v4614_v34, %v4612_v2  ;;  %v4707_v43 = vmul.f32 %v7817_v12, %v4608_v3  ;;  %v4268_v46 = vsub.f32 %v4092_v51, %v4236_v47  ;;  %v4427_v39 = vmul.f32 %v8337_v10, %v4267_v30 }
 0x40c   : > { %v4708_v16 = vmul.f32 %v7817_v12, %v4615_v9  ;;  %v4645_v59 = vmul.f32 %v5807_v13, %v8391_v54  ;;  %v4265_v15 = vsub.f32 %v4089_v32, %v4233_v62  ;;  %vm4653_vm4 = vcmp.eq.f32.partialorder %v8403_v37, inf }
 0x40d   : > { %v5809_v60 = vpop.eup %5808  ;;  %4739 = vst [vmem:[%s8539_s3 + $0xa0] sm:$0xff] %v4707_v43  ;;  %v4428_v61 = vmul.f32 %v8337_v10, %v4268_v46  ;;  %v4266_v63 = vsub.f32 %v4090_v23, %v4234_v14  ;;  %v4656_v27 = vand.u32 2147483648, %v8403_v37  ;;  %v4460_v8 = vmax.f32 %v4427_v39, 0.0 }
 0x40e   : > { %4740 = vst [vmem:[%s8539_s3 + $0xa8] sm:$0xff] %v4708_v16  ;;  %v4647_v53 = vsel %vm4646_vm2, %v8391_v54, %v4645_v59  ;;  %v4652_v56 = vmul.f32 %v5809_v60, %v8403_v37  ;;  %v4424_v18 = vmul.f32 %v5805_v57, %v4265_v15  ;;  %vm4655_vm5 = vcmp.eq.f32.partialorder %v8403_v37, 0.0 }
 0x40f   : > { %v4650_v42 = vsel %vm4648_vm3, %v4649_v11, %v4647_v53  ;;  %v4461_v33 = vmax.f32 %v4428_v61, 0.0  ;;  %v4425_v10 = vmul.f32 %v5805_v57, %v4266_v63  ;;  %5814 = vrsqrt.f32 %v4460_v8 }
 0x410   : > { %v4654_v52 = vsel %vm4653_vm4, %v8403_v37, %v4652_v56  ;;  %v4713_v5 = vmul.f32 %v7817_v12, %v4650_v42  ;;  %vm4632_vm6 = vcmp.eq.f32.partialorder %v8424_v38, inf  ;;  %v4635_v20 = vand.u32 2147483648, %v8424_v38 }
 0x411   : > { %v5811_v0 = vpop.eup %5810  ;;  %v4657_v48 = vsel %vm4655_vm5, %v4656_v27, %v4654_v52  ;;  %5816 = vrsqrt.f32 %v4461_v33  ;;  %v4458_v26 = vmax.f32 %v4424_v18, 0.0  ;;  %v4459_v55 = vmax.f32 %v4425_v10, 0.0 }
 0x412   : > { %v5813_v40 = vpop.eup %5812  ;;  %v4714_v22 = vmul.f32 %v7817_v12, %v4657_v48  ;;  %4745 = vst [vmem:[%s8539_s3 + $0xd0] sm:$0xff] %v4713_v5  ;;  %v4631_v54 = vmul.f32 %v5811_v0, %v8424_v38  ;;  %vm4634_vm7 = vcmp.eq.f32.partialorder %v8424_v38, 0.0  ;;  %vm4639_vm8 = vcmp.eq.f32.partialorder %v8431_v4, inf }
 0x413   : > { %v4638_v37 = vmul.f32 %v5813_v40, %v8431_v4  ;;  %v4642_v45 = vand.u32 2147483648, %v8431_v4  ;;  %vm4641_vm9 = vcmp.eq.f32.partialorder %v8431_v4, 0.0  ;;  %5818 = vrsqrt.f32 %v4458_v26 }
 0x414   : > { %4746 = vst [vmem:[%s8539_s3 + $0xd8] sm:$0xff] %v4714_v22  ;;  %v4633_v58 = vsel %vm4632_vm6, %v8424_v38, %v4631_v54  ;;  %5820 = vrsqrt.f32 %v4459_v55  ;;  %vm4674_vm10 = vcmp.eq.f32.partialorder %v4460_v8, inf  ;;  %v4677_v49 = vand.u32 2147483648, %v4460_v8 }
 0x415   : > { %v4636_v44 = vsel %vm4634_vm7, %v4635_v20, %v4633_v58  ;;  %v4640_v6 = vsel %vm4639_vm8, %v8431_v4, %v4638_v37  ;;  %vm4676_vm11 = vcmp.eq.f32.partialorder %v4460_v8, 0.0  ;;  %vm4681_vm12 = vcmp.eq.f32.partialorder %v4461_v33, inf }
 0x416   : > { %v4643_v35 = vsel %vm4641_vm9, %v4642_v45, %v4640_v6  ;;  %v4711_v1 = vmul.f32 %v7817_v12, %v4636_v44  ;;  %v4684_v31 = vand.u32 2147483648, %v4461_v33  ;;  %vm4683_vm13 = vcmp.eq.f32.partialorder %v4461_v33, 0.0 }
 0x417   : > { %v4712_v21 = vmul.f32 %v7817_v12, %v4643_v35  ;;  %vm4660_vm14 = vcmp.eq.f32.partialorder %v4458_v26, inf  ;;  %v4663_v51 = vand.u32 2147483648, %v4458_v26  ;;  %vm4662_vm15 = vcmp.eq.f32.partialorder %v4458_v26, 0.0 }
 0x418   : > { %4743 = vst [vmem:[%s8539_s3 + $0xc0] sm:$0xff] %v4711_v1  ;;  %vm4667_vm0 = vcmp.eq.f32.partialorder %v4459_v55, inf  ;;  %v4670_v3 = vand.u32 2147483648, %v4459_v55  ;;  %vm4669_vm1 = vcmp.eq.f32.partialorder %v4459_v55, 0.0 }
 0x419   : > { %4744 = vst [vmem:[%s8539_s3 + $0xc8] sm:$0xff] %v4712_v21  ;;  %v5815_v50 = vpop.eup %5814 }
 0x41a   : > { %v4673_v29 = vmul.f32 %v5815_v50, %v4460_v8 }
 0x41b   : > { %v5817_v38 = vpop.eup %5816 }
 0x41c   : > { %v4680_v36 = vmul.f32 %v5817_v38, %v4461_v33  ;;  %v4675_v4 = vsel %vm4674_vm10, %v4460_v8, %v4673_v29 }
 0x41d   : > { %v4678_v19 = vsel %vm4676_vm11, %v4677_v49, %v4675_v4  ;;  %v5819_v28 = vpop.eup %5818 }
 0x41e   : > { %v4682_v25 = vsel %vm4681_vm12, %v4461_v33, %v4680_v36  ;;  %v4717_v17 = vmul.f32 %v7817_v12, %v4678_v19  ;;  %v4659_v7 = vmul.f32 %v5819_v28, %v4458_v26  ;;  %v5821_v34 = vpop.eup %5820 }
 0x41f   : > { %v4685_v41 = vsel %vm4683_vm13, %v4684_v31, %v4682_v25  ;;  %v4666_v47 = vmul.f32 %v5821_v34, %v4459_v55 }
 0x420   : > { %v4718_v57 = vmul.f32 %v7817_v12, %v4685_v41  ;;  %4749 = vst [vmem:[%s8539_s3 + $0xf0] sm:$0xff] %v4717_v17  ;;  %v4661_v24 = vsel %vm4660_vm14, %v4458_v26, %v4659_v7 }
 0x421   : > { %v4664_v32 = vsel %vm4662_vm15, %v4663_v51, %v4661_v24  ;;  %v4668_v2 = vsel %vm4667_vm0, %v4459_v55, %v4666_v47 }
 0x422   : > { %4750 = vst [vmem:[%s8539_s3 + $0xf8] sm:$0xff] %v4718_v57  ;;  %v4715_v30 = vmul.f32 %v7817_v12, %v4664_v32  ;;  %v4671_v23 = vsel %vm4669_vm1, %v4670_v3, %v4668_v2 }
 0x423   : > { %v4716_v62 = vmul.f32 %v7817_v12, %v4671_v23 }
 0x424   : > { %4747 = vst [vmem:[%s8539_s3 + $0xe0] sm:$0xff] %v4715_v30 }
 0x425   : > { %4748 = vst [vmem:[%s8539_s3 + $0xe8] sm:$0xff] %v4716_v62 }
 0x426 PF: > { %p14_p4 = scmp.ge.s32.totalorder %s5940_s18, 4   ;;  %s9290_s14 = smov %s5878_s15 }
 0x427   : > { %s9291_s15 = smov %s5882_s16  ;;  %s9292_s16 = smov %s5950_s21 }
 0x428   : > { %s9293_s17 = smov %s5940_s18  ;;  %16 = sbr.rel (!%p14_p4) target bundleno = 5 (0x5), region = 79 }
 0x42f   :  { %4762 = vsyncpa [#allocation7], 1 }
 0x430   :  { %4764 = vsyncpa [#allocation7 + $0x1], 1 }

</bundles_post_ra>
